<compile_context>
chip_gen: v7x
topology: tpu7x:2x2x1
jax: 0.10.0
libtpu: 0.0.40
codegen_flags: <defaults>
</compile_context>

<pallas_src>
import math
import functools

import jax
import jax.numpy as jnp
from jax.experimental import pallas as pl
from jax.experimental.pallas import tpu as pltpu

partial = functools.partial


def _round_up(x, m):
    return ((x + m - 1) // m) * m


def _cdiv(a, b):
    return -(-a // b)


# ----------------------------------------------------------------------------
# Fused matmul kernel:  O = act(A @ B + bias [+ residual])
# (1x1 convs and the downsample conv; BN already folded into B / bias)
# ----------------------------------------------------------------------------

def _mm_kernel(*refs, act, has_res):
    if has_res:
        a_ref, b_ref, bias_ref, r_ref, o_ref, acc_ref = refs
    else:
        a_ref, b_ref, bias_ref, o_ref, acc_ref = refs

    @pl.when(pl.program_id(2) == 0)
    def _():
        acc_ref[...] = jnp.zeros_like(acc_ref)

    # bf16 operands, f32 accumulation on the MXU.
    acc_ref[...] += jnp.dot(a_ref[...], b_ref[...], preferred_element_type=jnp.float32)

    @pl.when(pl.program_id(2) == pl.num_programs(2) - 1)
    def _():
        y = acc_ref[...] + bias_ref[...]
        if has_res:
            y = y + r_ref[...].astype(jnp.float32)
        if act == "relu":
            y = jnp.maximum(y, 0.0)
        o_ref[...] = y.astype(o_ref.dtype)


def matmul_bias_act(a, b, bias, residual=None, act="none", out_dtype=jnp.bfloat16):
    """act(A @ B + bias [+ residual]) with bf16 MXU inputs and f32 accumulation."""
    M, K = a.shape
    Kb, N = b.shape
    assert K == Kb and bias.shape == (N,)

    # Lane-dense N (callers pre-pad channels to 128 multiples, so normally Np == N);
    # tn up to 512 so the large activation matrix A is re-streamed from HBM as few
    # times as possible (HBM traffic ~ |A| * (Np/tn) + |B| * (Mp/tm)).
    Np = _round_up(N, 128)
    tn = next(t for t in (512, 384, 256, 128) if Np % t == 0)
    if K <= 128:
        tk, Kp = K, K                       # full-extent K block, no zero padding
    else:
        Kp = _round_up(K, 128)
        tk = next(t for t in (512, 384, 256, 128) if Kp % t == 0)
    # Large M tile (amortizes per-step overhead, ~85% of HBM roofline at 512),
    # but keep >=2 parallel grid blocks so v7x's second TensorCore has work.
    tm = min(512, _round_up(M, 8))
    if (_round_up(M, tm) // tm) * (Np // tn) < 2 and tm >= 16:
        tm = _round_up(tm // 2, 8)
    Mp = _round_up(M, tm)

    a_p = a.astype(jnp.bfloat16)
    if (Mp, Kp) != (M, K):
        a_p = jnp.pad(a_p, ((0, Mp - M), (0, Kp - K)))
    b_p = b.astype(jnp.bfloat16)
    if (Kp, Np) != (K, N):
        b_p = jnp.pad(b_p, ((0, Kp - K), (0, Np - N)))
    bias_p = bias.astype(jnp.float32)
    if Np != N:
        bias_p = jnp.pad(bias_p, (0, Np - N))
    bias_p = bias_p.reshape(1, Np)

    in_specs = [
        pl.BlockSpec((tm, tk), lambda i, j, k: (i, k)),
        pl.BlockSpec((tk, tn), lambda i, j, k: (k, j)),
        pl.BlockSpec((1, tn), lambda i, j, k: (0, j)),
    ]
    operands = [a_p, b_p, bias_p]
    has_res = residual is not None
    if has_res:
        r_p = residual.astype(jnp.bfloat16)
        if residual.shape[1] != Np or Mp != M:
            r_p = jnp.pad(r_p, ((0, Mp - M), (0, Np - residual.shape[1])))
        in_specs.append(pl.BlockSpec((tm, tn), lambda i, j, k: (i, j)))
        operands.append(r_p)

    grid = (Mp // tm, Np // tn, Kp // tk)
    out = pl.pallas_call(
        partial(_mm_kernel, act=act, has_res=has_res),
        out_shape=jax.ShapeDtypeStruct((Mp, Np), out_dtype),
        grid_spec=pltpu.PrefetchScalarGridSpec(
            num_scalar_prefetch=0,
            grid=grid,
            in_specs=in_specs,
            out_specs=pl.BlockSpec((tm, tn), lambda i, j, k: (i, j)),
            scratch_shapes=[pltpu.VMEM((tm, tn), jnp.float32)],
        ),
        compiler_params=pltpu.CompilerParams(
            dimension_semantics=("parallel", "parallel", "arbitrary")),
    )(*operands)
    if (Mp, Np) != (M, N):
        out = out[:M, :N]
    return out


# ----------------------------------------------------------------------------
# Direct 3x3 conv kernel (NHWC, no im2col).  Per grid step a non-overlapping
# "body" row block plus a tiny "halo" block are auto-pipelined from HBM and
# re-assembled into one VMEM band; the 9 taps accumulate straight into the f32
# accumulator as shifted matmuls.
# ----------------------------------------------------------------------------

def _conv3x3_kernel(body_ref, halo_ref, w_ref, b_ref, o_ref, band_ref, acc_ref, *,
                    th, wo, stride, dilation, act, body_rows, halo_rows):
    c = pl.program_id(3)

    @pl.when(c == 0)
    def _():
        acc_ref[...] = jnp.zeros_like(acc_ref)

    # Re-assemble the halo'd band in VMEM.  Body rows are fetched from HBM exactly
    # once; only `halo_rows` rows per band are fetched twice.
    band_ref[pl.ds(0, body_rows)] = body_ref[...]
    band_ref[pl.ds(body_rows, halo_rows)] = halo_ref[...]

    ci = body_ref.shape[-1]
    d = dilation
    band_rows = body_rows + halo_rows

    if stride == 1:
        # The expensive lane/sublane column shift (+ flattening reshape) happens
        # only 3x (once per kj); each ki is then a cheap contiguous row-range slice.
        for kj in range(3):
            xk = band_ref[:, pl.ds(kj * d, wo), :].reshape(band_rows * wo, ci)
            for ki in range(3):
                patch = xk[ki * d * wo: ki * d * wo + th * wo]
                acc_ref[...] += jnp.dot(patch, w_ref[ki * 3 + kj],
                                        preferred_element_type=jnp.float32)
    else:
        # TODO(synk): phase-decompose (space-to-depth) stride>1 in the wrapper so the
        # kernel reads dense rows/cols instead of strided VMEM slices.
        for ki in range(3):
            for kj in range(3):
                patch = band_ref[pl.ds(ki * d, th, stride=stride),
                                 pl.ds(kj * d, wo, stride=stride), :]
                acc_ref[...] += jnp.dot(patch.reshape(th * wo, ci), w_ref[ki * 3 + kj],
                                        preferred_element_type=jnp.float32)

    @pl.when(c == pl.num_programs(3) - 1)
    def _():
        y = acc_ref[...] + b_ref[...]
        if act == "relu":
            y = jnp.maximum(y, 0.0)
        o_ref[...] = y.astype(o_ref.dtype)


def conv3x3_bias_act(x, w9, bias, *, stride=1, dilation=1, act="relu",
                     out_dtype=jnp.bfloat16):
    """3x3 conv (padding=dilation), NHWC input, w9: (9, Cin, Cout), bias: (Cout,)."""
    B, H, W, Cin = x.shape
    _, wci, Cout = w9.shape
    assert wci == Cin
    s, d = stride, dilation
    assert 1 <= s <= 2 * d
    Ho = (H - 1) // s + 1
    Wo = (W - 1) // s + 1
    Wp = W + 2 * d

    halo_rows = 2 * d + 1 - s                   # rows shared between adjacent bands
    m = halo_rows // math.gcd(s, halo_rows)     # keeps (th*s) % halo_rows == 0
    row_mult = 8 * m // math.gcd(8, m)          # also keeps th (and th*Wo) 8-aligned

    def ch_tile(C):
        if C <= 512:
            return C
        for t in (512, 384, 256, 128):
            if C % t == 0:
                return t
        return C
    ci_t, co_t = ch_tile(Cin), ch_tile(Cout)

    def vmem_need(th_, ci_, co_):
        body = th_ * s * Wp * ci_ * 2
        halo = halo_rows * Wp * ci_ * 2
        wt = 9 * ci_ * co_ * 2
        acc = th_ * Wo * co_ * 4
        out = th_ * Wo * co_ * 2
        return 2 * (body + halo + wt + out) + (body + halo) + acc

    # Explicit VMEM budget: fits v5e's 16 MiB default scoped VMEM (v6e/v7x have more),
    # so no generation-specific vmem_limit_bytes is required.
    budget = 12 << 20
    th_cap = _round_up(64, row_mult)
    nT0 = _cdiv(Ho, th_cap)
    th = min(_round_up(_cdiv(Ho, nT0), row_mult), _round_up(Ho, row_mult))
    while vmem_need(th, ci_t, co_t) > budget:
        if th > row_mult:
            th -= row_mult
        elif co_t >= 256 and Cout % (co_t // 2) == 0:
            co_t //= 2
        elif ci_t >= 256 and Cin % (ci_t // 2) == 0:
            ci_t //= 2
        else:
            break
    nT = _cdiv(Ho, th)
    # Keep >=2 parallel grid blocks so a v7x megacore doesn't leave one core idle.
    if B * nT * (Cout // co_t) < 2 and th > row_mult:
        th = max(row_mult, _round_up(_cdiv(Ho, 2), row_mult))
        nT = _cdiv(Ho, th)

    body_rows = th * s
    band_rows = body_rows + halo_rows            # == (th-1)*s + 2*d + 1
    halo_ratio = body_rows // halo_rows          # exact by construction of th
    nCi, nCo = Cin // ci_t, Cout // co_t
    Hpad = nT * body_rows + halo_rows            # every band (incl. Ho padding) in-bounds

    x_p = jnp.pad(x.astype(jnp.bfloat16),
                  ((0, 0), (d, Hpad - d - H), (d, d), (0, 0)))
    w9 = w9.astype(jnp.bfloat16)
    bias_p = bias.astype(jnp.float32).reshape(1, Cout)

    kern = partial(_conv3x3_kernel, th=th, wo=Wo, stride=s, dilation=d, act=act,
                   body_rows=body_rows, halo_rows=halo_rows)
    out = pl.pallas_call(
        kern,
        out_shape=jax.ShapeDtypeStruct((B, nT * th * Wo, Cout), out_dtype),
        grid_spec=pltpu.PrefetchScalarGridSpec(
            num_scalar_prefetch=0,
            grid=(B, nT, nCo, nCi),
            in_specs=[
                # non-overlapping body rows of the padded input
                pl.BlockSpec((None, body_rows, Wp, ci_t),
                             lambda b, t, j, c: (b, t, 0, c)),
                # the small halo (first halo_rows rows of the next band)
                pl.BlockSpec((None, halo_rows, Wp, ci_t),
                             lambda b, t, j, c: (b, (t + 1) * halo_ratio, 0, c)),
                pl.BlockSpec((9, ci_t, co_t), lambda b, t, j, c: (0, c, j)),
                pl.BlockSpec((1, co_t), lambda b, t, j, c: (0, j)),
            ],
            out_specs=pl.BlockSpec((None, th * Wo, co_t), lambda b, t, j, c: (b, t, j)),
            scratch_shapes=[
                pltpu.VMEM((band_rows, Wp, ci_t), jnp.bfloat16),   # re-assembled band
                pltpu.VMEM((th * Wo, co_t), jnp.float32),          # f32 accumulator
            ],
        ),
        compiler_params=pltpu.CompilerParams(
            dimension_semantics=("parallel", "parallel", "parallel", "arbitrary")),
    )(x_p, x_p, w9, bias_p)

    out = out.reshape(B, nT * th, Wo, Cout)
    if nT * th != Ho:
        out = out[:, :Ho]
    return out


# ----------------------------------------------------------------------------
# Bottleneck forward (PyTorch-compatible NCHW interface, eval-mode BN folded)
# ----------------------------------------------------------------------------

@partial(jax.jit, static_argnames=("stride", "dilation", "out_channels"))
def bottleneck_forward(x_nchw, params, stride=1, dilation=1, out_channels=None):
    x = jnp.transpose(x_nchw, (0, 2, 3, 1)).astype(jnp.bfloat16)     # NHWC, bf16
    B, H, W, Cin = x.shape

    # conv1 (1x1) + bn1 + relu   (channel widths lane-dense / 128-padded throughout)
    h = matmul_bias_act(x.reshape(B * H * W, Cin), params["w1"], params["b1"], act="relu")
    P1 = h.shape[-1]
    h = h.reshape(B, H, W, P1)

    # conv2 (3x3, stride, dilation, padding=dilation) + bn2 + relu
    h = conv3x3_bias_act(h, params["w2"], params["b2"],
                         stride=stride, dilation=dilation, act="relu")
    _, Ho, Wo, _ = h.shape

    # residual branch (optional 1x1/stride downsample + bn)
    if "wd" in params:
        xs = x[:, ::stride, ::stride, :] if stride > 1 else x
        res = matmul_bias_act(xs.reshape(B * Ho * Wo, Cin), params["wd"], params["bd"],
                              act="none")
    else:
        assert stride == 1, "identity residual requires stride == 1"
        res = x.reshape(B * Ho * Wo, Cin)
        if res.shape[-1] != params["w3"].shape[-1]:
            res = jnp.pad(res, ((0, 0), (0, params["w3"].shape[-1] - Cin)))

    # conv3 (1x1) + bn3, residual add and final ReLU fused into the epilogue
    out = matmul_bias_act(h.reshape(B * Ho * Wo, P1), params["w3"], params["b3"],
                          residual=res, act="relu")
    P4 = out.shape[-1]
    out = out.reshape(B, Ho, Wo, P4)
    if out_channels is not None and out_channels != P4:
        out = out[..., :out_channels]                    # fuses with the transpose below
    return jnp.transpose(out, (0, 3, 1, 2))              # back to NCHW


# ----------------------------------------------------------------------------
# Deterministic parameters (mirrors the PyTorch module; eval-mode BN folded,
# channel widths padded to multiples of 128 with zero weights/bias for
# lane-dense Pallas outputs).
# ----------------------------------------------------------------------------

def make_bottleneck_params(seed, inplanes, planes, stride=1, dilation=1, eps=1e-5):
    key = jax.random.PRNGKey(seed)
    ks = jax.random.split(key, 4)

    def he(k, cout, cin, kh, kw):
        std = math.sqrt(2.0 / (kh * kw * cout))
        return jax.random.normal(k, (cout, cin, kh, kw), jnp.float32) * std

    def bn_identity(c):
        return dict(gamma=jnp.ones((c,), jnp.float32), beta=jnp.zeros((c,), jnp.float32),
                    mean=jnp.zeros((c,), jnp.float32), var=jnp.ones((c,), jnp.float32))

    def fold(w_oihw, bn):
        scale = bn["gamma"] / jnp.sqrt(bn["var"] + eps)
        bias = bn["beta"] - bn["mean"] * scale
        return w_oihw * scale[:, None, None, None], bias.astype(jnp.float32)

    P1 = _round_up(planes, 128)        # lane-dense hidden width inside the block
    P4 = _round_up(planes * 4, 128)    # lane-dense output width (sliced at the end)

    def pad_cols(w2d, b, target):
        return (jnp.pad(w2d, ((0, 0), (0, target - w2d.shape[1]))),
                jnp.pad(b, (0, target - b.shape[0])))

    w1, b1 = fold(he(ks[0], planes, inplanes, 1, 1), bn_identity(planes))
    w2, b2 = fold(he(ks[1], planes, planes, 3, 3), bn_identity(planes))
    w3, b3 = fold(he(ks[2], planes * 4, planes, 1, 1), bn_identity(planes * 4))

    w1m, b1 = pad_cols(w1.reshape(planes, inplanes).T, b1, P1)            # (Cin, P1)
    w2m = w2.transpose(2, 3, 1, 0).reshape(9, planes, planes)             # (9, Cin, Cout)
    w2m = jnp.pad(w2m, ((0, 0), (0, P1 - planes), (0, P1 - planes)))
    b2 = jnp.pad(b2, (0, P1 - planes))
    w3m, b3 = pad_cols(w3.reshape(planes * 4, planes).T, b3, P4)          # (planes, P4)
    w3m = jnp.pad(w3m, ((0, P1 - planes), (0, 0)))                        # -> (P1, P4)

    p = dict(w1=w1m.astype(jnp.bfloat16), b1=b1,
             w2=w2m.astype(jnp.bfloat16), b2=b2,
             w3=w3m.astype(jnp.bfloat16), b3=b3)
    if stride != 1 or inplanes != planes * 4:
        wd, bd = fold(he(ks[3], planes * 4, inplanes, 1, 1), bn_identity(planes * 4))
        wdm, bd = pad_cols(wd.reshape(planes * 4, inplanes).T, bd, P4)    # (Cin, P4)
        p["wd"] = wdm.astype(jnp.bfloat16)
        p["bd"] = bd
    return p


# ----------------------------------------------------------------------------

if __name__ == "__main__":
    B, H, W = 2, 16, 16
    inplanes, planes = 32, 16          # Bottleneck output channels = planes * 4 = 64
    stride, dilation = 1, 1            # downsample present (inplanes != planes * 4)

    x = jax.random.normal(jax.random.PRNGKey(0), (B, inplanes, H, W), jnp.float32)
    params = make_bottleneck_params(0, inplanes, planes, stride, dilation)

    out = bottleneck_forward(x, params, stride=stride, dilation=dilation,
                             out_channels=planes * 4)
    out = jax.block_until_ready(out)

    Ho = (H - 1) // stride + 1
    Wo = (W - 1) // stride + 1
    assert out.shape == (B, planes * 4, Ho, Wo), out.shape
    assert bool(jnp.all(jnp.isfinite(out.astype(jnp.float32))))
    print("KERNEL_OK")
</pallas_src>

<mosaic_0001>
module attributes {stable_mosaic.version = 11 : i64} {
  func.func @_mm_kernel(%arg0: i32, %arg1: i32, %arg2: i32, %arg3: memref<256x32xbf16, #tpu.memory_space<vmem>>, %arg4: memref<32x128xbf16, #tpu.memory_space<vmem>>, %arg5: memref<1x128xf32, #tpu.memory_space<vmem>>, %arg6: memref<256x128xbf16, #tpu.memory_space<vmem>>, %arg7: memref<256x128xf32, #tpu.memory_space<vmem>>) attributes {dimension_semantics = [#tpu.dimension_semantics<parallel>, #tpu.dimension_semantics<parallel>, #tpu.dimension_semantics<arbitrary>], iteration_bounds = array<i64: 2, 1, 1>, scalar_prefetch = 0 : i64, scratch_operands = 1 : i64, tpu.core_type = #tpu.core_type<tc>, window_params = [{transform_indices = @transform_0, window_bounds = array<i64: 256, 32>}, {transform_indices = @transform_1, window_bounds = array<i64: 32, 128>}, {transform_indices = @transform_2, window_bounds = array<i64: 1, 128>}, {transform_indices = @transform_3, window_bounds = array<i64: 256, 128>}]} {
    %c0_i32 = arith.constant 0 : i32
    %0 = arith.cmpi eq, %arg2, %c0_i32 : i32
    %1 = arith.extui %0 : i1 to i32
    %c0_i32_0 = arith.constant 0 : i32
    %2 = arith.cmpi ne, %1, %c0_i32_0 : i32
    scf.if %2 {
      %cst_10 = arith.constant 0.000000e+00 : f32
      %12 = vector.broadcast %cst_10 : f32 to vector<256x128xf32>
      %c0_11 = arith.constant 0 : index
      %c0_12 = arith.constant 0 : index
      %13 = vector.load %arg7[%c0_11, %c0_12] : memref<256x128xf32, #tpu.memory_space<vmem>>, vector<256x128xf32>
      tpu.vector_store %arg7[%c0_11, %c0_12], %12 {strides = array<i32>} : memref<256x128xf32, #tpu.memory_space<vmem>>, vector<256x128xf32>,
    } else {
    }
    %c0 = arith.constant 0 : index
    %c0_1 = arith.constant 0 : index
    %3 = vector.load %arg7[%c0, %c0_1] : memref<256x128xf32, #tpu.memory_space<vmem>>, vector<256x128xf32>
    %c0_2 = arith.constant 0 : index
    %c0_3 = arith.constant 0 : index
    %4 = vector.load %arg3[%c0_2, %c0_3] : memref<256x32xbf16, #tpu.memory_space<vmem>>, vector<256x32xbf16>
    %c0_4 = arith.constant 0 : index
    %c0_5 = arith.constant 0 : index
    %5 = vector.load %arg4[%c0_4, %c0_5] : memref<32x128xbf16, #tpu.memory_space<vmem>>, vector<32x128xbf16>
    %cst = arith.constant dense<0.000000e+00> : vector<256x128xf32>
    %6 = tpu.matmul %4, %5, %cst {dimension_numbers = #tpu.dot_dimension_numbers<[1], [0], [0], [1], [0, 0, 1, 1], [], []>} : vector<256x32xbf16>, vector<32x128xbf16>, vector<256x128xf32> -> vector<256x128xf32>
    %7 = arith.addf %3, %6 : vector<256x128xf32>
    %c0_6 = arith.constant 0 : index
    %c0_7 = arith.constant 0 : index
    %8 = vector.load %arg7[%c0_6, %c0_7] : memref<256x128xf32, #tpu.memory_space<vmem>>, vector<256x128xf32>
    tpu.vector_store %arg7[%c0_6, %c0_7], %7 {strides = array<i32>} : memref<256x128xf32, #tpu.memory_space<vmem>>, vector<256x128xf32>,
    %c0_i32_8 = arith.constant 0 : i32
    %9 = arith.cmpi eq, %arg2, %c0_i32_8 : i32
    %10 = arith.extui %9 : i1 to i32
    %c0_i32_9 = arith.constant 0 : i32
    %11 = arith.cmpi ne, %10, %c0_i32_9 : i32
    scf.if %11 {
      %c0_10 = arith.constant 0 : index
      %c0_11 = arith.constant 0 : index
      %12 = vector.load %arg7[%c0_10, %c0_11] : memref<256x128xf32, #tpu.memory_space<vmem>>, vector<256x128xf32>
      %c0_12 = arith.constant 0 : index
      %c0_13 = arith.constant 0 : index
      %13 = vector.load %arg5[%c0_12, %c0_13] : memref<1x128xf32, #tpu.memory_space<vmem>>, vector<1x128xf32>
      %14 = vector.broadcast %13 : vector<1x128xf32> to vector<256x128xf32>
      %15 = arith.addf %12, %14 : vector<256x128xf32>
      %16 = arith.truncf %15 : vector<256x128xf32> to vector<256x128xbf16>
      %c0_14 = arith.constant 0 : index
      %c0_15 = arith.constant 0 : index
      %17 = vector.load %arg6[%c0_14, %c0_15] : memref<256x128xbf16, #tpu.memory_space<vmem>>, vector<256x128xbf16>
      tpu.vector_store %arg6[%c0_14, %c0_15], %16 {strides = array<i32>} : memref<256x128xbf16, #tpu.memory_space<vmem>>, vector<256x128xbf16>,
    } else {
    }
    return
  }
  func.func @transform_0(%arg0: i32, %arg1: i32, %arg2: i32) -> (i32, i32) {
    %c0_i32 = arith.constant 0 : i32
    return %arg0, %arg2 : i32, i32
  }
  func.func @transform_1(%arg0: i32, %arg1: i32, %arg2: i32) -> (i32, i32) {
    %c0_i32 = arith.constant 0 : i32
    return %arg2, %arg1 : i32, i32
  }
  func.func @transform_2(%arg0: i32, %arg1: i32, %arg2: i32) -> (i32, i32) {
    %c0_i32 = arith.constant 0 : i32
    %c0_i32_0 = arith.constant 0 : i32
    return %c0_i32, %arg1 : i32, i32
  }
  func.func @transform_3(%arg0: i32, %arg1: i32, %arg2: i32) -> (i32, i32) {
    %c0_i32 = arith.constant 0 : i32
    return %arg0, %arg1 : i32, i32
  }
}

module attributes {stable_mosaic.version = 11 : i64} {
  func.func @_mm_kernel(%arg0: i32, %arg1: i32, %arg2: i32, %arg3: memref<256x32xbf16, #tpu.memory_space<vmem>>, %arg4: memref<32x128xbf16, #tpu.memory_space<vmem>>, %arg5: memref<1x128xf32, #tpu.memory_space<vmem>>, %arg6: memref<256x128xbf16, #tpu.memory_space<vmem>>, %arg7: memref<256x128xf32, #tpu.memory_space<vmem>>) attributes {dimension_semantics = [#tpu.dimension_semantics<parallel>, #tpu.dimension_semantics<parallel>, #tpu.dimension_semantics<arbitrary>], iteration_bounds = array<i64: 2, 1, 1>, scalar_prefetch = 0 : i64, scratch_operands = 1 : i64, tpu.core_type = #tpu.core_type<tc>, window_params = [{transform_indices = @transform_0, window_bounds = array<i64: 256, 32>}, {transform_indices = @transform_1, window_bounds = array<i64: 32, 128>}, {transform_indices = @transform_2, window_bounds = array<i64: 1, 128>}, {transform_indices = @transform_3, window_bounds = array<i64: 256, 128>}]} {
    %c0_i32 = arith.constant 0 : i32
    %0 = arith.cmpi eq, %arg2, %c0_i32 : i32
    %1 = arith.extui %0 : i1 to i32
    %c0_i32_0 = arith.constant 0 : i32
    %2 = arith.cmpi ne, %1, %c0_i32_0 : i32
    scf.if %2 {
      %cst_10 = arith.constant 0.000000e+00 : f32
      %12 = vector.broadcast %cst_10 : f32 to vector<256x128xf32>
      %c0_11 = arith.constant 0 : index
      %c0_12 = arith.constant 0 : index
      %13 = vector.load %arg7[%c0_11, %c0_12] : memref<256x128xf32, #tpu.memory_space<vmem>>, vector<256x128xf32>
      tpu.vector_store %arg7[%c0_11, %c0_12], %12 {strides = array<i32>} : memref<256x128xf32, #tpu.memory_space<vmem>>, vector<256x128xf32>,
    } else {
    }
    %c0 = arith.constant 0 : index
    %c0_1 = arith.constant 0 : index
    %3 = vector.load %arg7[%c0, %c0_1] : memref<256x128xf32, #tpu.memory_space<vmem>>, vector<256x128xf32>
    %c0_2 = arith.constant 0 : index
    %c0_3 = arith.constant 0 : index
    %4 = vector.load %arg3[%c0_2, %c0_3] : memref<256x32xbf16, #tpu.memory_space<vmem>>, vector<256x32xbf16>
    %c0_4 = arith.constant 0 : index
    %c0_5 = arith.constant 0 : index
    %5 = vector.load %arg4[%c0_4, %c0_5] : memref<32x128xbf16, #tpu.memory_space<vmem>>, vector<32x128xbf16>
    %cst = arith.constant dense<0.000000e+00> : vector<256x128xf32>
    %6 = tpu.matmul %4, %5, %cst {dimension_numbers = #tpu.dot_dimension_numbers<[1], [0], [0], [1], [0, 0, 1, 1], [], []>} : vector<256x32xbf16>, vector<32x128xbf16>, vector<256x128xf32> -> vector<256x128xf32>
    %7 = arith.addf %3, %6 : vector<256x128xf32>
    %c0_6 = arith.constant 0 : index
    %c0_7 = arith.constant 0 : index
    %8 = vector.load %arg7[%c0_6, %c0_7] : memref<256x128xf32, #tpu.memory_space<vmem>>, vector<256x128xf32>
    tpu.vector_store %arg7[%c0_6, %c0_7], %7 {strides = array<i32>} : memref<256x128xf32, #tpu.memory_space<vmem>>, vector<256x128xf32>,
    %c0_i32_8 = arith.constant 0 : i32
    %9 = arith.cmpi eq, %arg2, %c0_i32_8 : i32
    %10 = arith.extui %9 : i1 to i32
    %c0_i32_9 = arith.constant 0 : i32
    %11 = arith.cmpi ne, %10, %c0_i32_9 : i32
    scf.if %11 {
      %c0_10 = arith.constant 0 : index
      %c0_11 = arith.constant 0 : index
      %12 = vector.load %arg7[%c0_10, %c0_11] : memref<256x128xf32, #tpu.memory_space<vmem>>, vector<256x128xf32>
      %c0_12 = arith.constant 0 : index
      %c0_13 = arith.constant 0 : index
      %13 = vector.load %arg5[%c0_12, %c0_13] : memref<1x128xf32, #tpu.memory_space<vmem>>, vector<1x128xf32>
      %14 = vector.broadcast %13 : vector<1x128xf32> to vector<256x128xf32>
      %15 = arith.addf %12, %14 : vector<256x128xf32>
      %cst_14 = arith.constant 0.000000e+00 : f32
      %16 = vector.broadcast %cst_14 : f32 to vector<256x128xf32>
      %17 = arith.maximumf %15, %16 : vector<256x128xf32>
      %18 = arith.truncf %17 : vector<256x128xf32> to vector<256x128xbf16>
      %c0_15 = arith.constant 0 : index
      %c0_16 = arith.constant 0 : index
      %19 = vector.load %arg6[%c0_15, %c0_16] : memref<256x128xbf16, #tpu.memory_space<vmem>>, vector<256x128xbf16>
      tpu.vector_store %arg6[%c0_15, %c0_16], %18 {strides = array<i32>} : memref<256x128xbf16, #tpu.memory_space<vmem>>, vector<256x128xbf16>,
    } else {
    }
    return
  }
  func.func @transform_0(%arg0: i32, %arg1: i32, %arg2: i32) -> (i32, i32) {
    %c0_i32 = arith.constant 0 : i32
    return %arg0, %arg2 : i32, i32
  }
  func.func @transform_1(%arg0: i32, %arg1: i32, %arg2: i32) -> (i32, i32) {
    %c0_i32 = arith.constant 0 : i32
    return %arg2, %arg1 : i32, i32
  }
  func.func @transform_2(%arg0: i32, %arg1: i32, %arg2: i32) -> (i32, i32) {
    %c0_i32 = arith.constant 0 : i32
    %c0_i32_0 = arith.constant 0 : i32
    return %c0_i32, %arg1 : i32, i32
  }
  func.func @transform_3(%arg0: i32, %arg1: i32, %arg2: i32) -> (i32, i32) {
    %c0_i32 = arith.constant 0 : i32
    return %arg0, %arg1 : i32, i32
  }
}

module attributes {stable_mosaic.version = 11 : i64} {
  func.func @_conv3x3_kernel(%arg0: i32, %arg1: i32, %arg2: i32, %arg3: i32, %arg4: memref<1x16x18x128xbf16, #tpu.memory_space<vmem>>, %arg5: memref<1x2x18x128xbf16, #tpu.memory_space<vmem>>, %arg6: memref<9x128x128xbf16, #tpu.memory_space<vmem>>, %arg7: memref<1x128xf32, #tpu.memory_space<vmem>>, %arg8: memref<1x256x128xbf16, #tpu.memory_space<vmem>>, %arg9: memref<18x18x128xbf16, #tpu.memory_space<vmem>>, %arg10: memref<256x128xf32, #tpu.memory_space<vmem>>) attributes {dimension_semantics = [#tpu.dimension_semantics<parallel>, #tpu.dimension_semantics<parallel>, #tpu.dimension_semantics<parallel>, #tpu.dimension_semantics<arbitrary>], iteration_bounds = array<i64: 2, 1, 1, 1>, scalar_prefetch = 0 : i64, scratch_operands = 2 : i64, tpu.core_type = #tpu.core_type<tc>, window_params = [{transform_indices = @transform_0, window_bounds = array<i64: 1, 16, 18, 128>}, {transform_indices = @transform_1, window_bounds = array<i64: 1, 2, 18, 128>}, {transform_indices = @transform_2, window_bounds = array<i64: 9, 128, 128>}, {transform_indices = @transform_3, window_bounds = array<i64: 1, 128>}, {transform_indices = @transform_4, window_bounds = array<i64: 1, 256, 128>}]} {
    %c0_i32 = arith.constant 0 : i32
    %0 = arith.cmpi eq, %arg3, %c0_i32 : i32
    %1 = arith.extui %0 : i1 to i32
    %c0_i32_0 = arith.constant 0 : i32
    %2 = arith.cmpi ne, %1, %c0_i32_0 : i32
    scf.if %2 {
      %cst_87 = arith.constant 0.000000e+00 : f32
      %81 = vector.broadcast %cst_87 : f32 to vector<256x128xf32>
      %c0_88 = arith.constant 0 : index
      %c0_89 = arith.constant 0 : index
      %82 = vector.load %arg10[%c0_88, %c0_89] : memref<256x128xf32, #tpu.memory_space<vmem>>, vector<256x128xf32>
      tpu.vector_store %arg10[%c0_88, %c0_89], %81 {strides = array<i32>} : memref<256x128xf32, #tpu.memory_space<vmem>>, vector<256x128xf32>,
    } else {
    }
    %c0 = arith.constant 0 : index
    %c0_1 = arith.constant 0 : index
    %c0_2 = arith.constant 0 : index
    %c0_3 = arith.constant 0 : index
    %3 = vector.load %arg4[%c0, %c0_1, %c0_2, %c0_3] : memref<1x16x18x128xbf16, #tpu.memory_space<vmem>>, vector<1x16x18x128xbf16>
    %4 = vector.shape_cast %3 : vector<1x16x18x128xbf16> to vector<16x18x128xbf16>
    %c0_4 = arith.constant 0 : index
    %c0_5 = arith.constant 0 : index
    %c0_6 = arith.constant 0 : index
    %5 = vector.load %arg9[%c0_4, %c0_5, %c0_6] : memref<18x18x128xbf16, #tpu.memory_space<vmem>>, vector<16x18x128xbf16>
    tpu.vector_store %arg9[%c0_4, %c0_5, %c0_6], %4 {strides = array<i32>} : memref<18x18x128xbf16, #tpu.memory_space<vmem>>, vector<16x18x128xbf16>,
    %c0_7 = arith.constant 0 : index
    %c0_8 = arith.constant 0 : index
    %c0_9 = arith.constant 0 : index
    %c0_10 = arith.constant 0 : index
    %6 = vector.load %arg5[%c0_7, %c0_8, %c0_9, %c0_10] : memref<1x2x18x128xbf16, #tpu.memory_space<vmem>>, vector<1x2x18x128xbf16>
    %7 = vector.shape_cast %6 : vector<1x2x18x128xbf16> to vector<2x18x128xbf16>
    %c16 = arith.constant 16 : index
    %c0_11 = arith.constant 0 : index
    %c0_12 = arith.constant 0 : index
    %8 = vector.load %arg9[%c16, %c0_11, %c0_12] : memref<18x18x128xbf16, #tpu.memory_space<vmem>>, vector<2x18x128xbf16>
    tpu.vector_store %arg9[%c16, %c0_11, %c0_12], %7 {strides = array<i32>} : memref<18x18x128xbf16, #tpu.memory_space<vmem>>, vector<2x18x128xbf16>,
    %c0_13 = arith.constant 0 : index
    %c0_14 = arith.constant 0 : index
    %c0_15 = arith.constant 0 : index
    %9 = vector.load %arg9[%c0_13, %c0_14, %c0_15] : memref<18x18x128xbf16, #tpu.memory_space<vmem>>, vector<18x16x128xbf16>
    %10 = vector.shape_cast %9 : vector<18x16x128xbf16> to vector<288x128xbf16>
    %11 = vector.extract_strided_slice %10 {offsets = [0, 0], sizes = [256, 128], strides = [1, 1]} : vector<288x128xbf16> to vector<256x128xbf16>
    %c0_16 = arith.constant 0 : index
    %c0_17 = arith.constant 0 : index
    %12 = vector.load %arg10[%c0_16, %c0_17] : memref<256x128xf32, #tpu.memory_space<vmem>>, vector<256x128xf32>
    %c0_18 = arith.constant 0 : index
    %c0_19 = arith.constant 0 : index
    %c0_20 = arith.constant 0 : index
    %13 = vector.load %arg6[%c0_18, %c0_19, %c0_20] : memref<9x128x128xbf16, #tpu.memory_space<vmem>>, vector<1x128x128xbf16>
    %14 = vector.shape_cast %13 : vector<1x128x128xbf16> to vector<128x128xbf16>
    %cst = arith.constant dense<0.000000e+00> : vector<256x128xf32>
    %15 = tpu.matmul %11, %14, %cst {dimension_numbers = #tpu.dot_dimension_numbers<[1], [0], [0], [1], [0, 0, 1, 1], [], []>} : vector<256x128xbf16>, vector<128x128xbf16>, vector<256x128xf32> -> vector<256x128xf32>
    %16 = arith.addf %12, %15 : vector<256x128xf32>
    %c0_21 = arith.constant 0 : index
    %c0_22 = arith.constant 0 : index
    %17 = vector.load %arg10[%c0_21, %c0_22] : memref<256x128xf32, #tpu.memory_space<vmem>>, vector<256x128xf32>
    tpu.vector_store %arg10[%c0_21, %c0_22], %16 {strides = array<i32>} : memref<256x128xf32, #tpu.memory_space<vmem>>, vector<256x128xf32>,
    %18 = vector.extract_strided_slice %10 {offsets = [16, 0], sizes = [256, 128], strides = [1, 1]} : vector<288x128xbf16> to vector<256x128xbf16>
    %c0_23 = arith.constant 0 : index
    %c0_24 = arith.constant 0 : index
    %19 = vector.load %arg10[%c0_23, %c0_24] : memref<256x128xf32, #tpu.memory_space<vmem>>, vector<256x128xf32>
    %c3 = arith.constant 3 : index
    %c0_25 = arith.constant 0 : index
    %c0_26 = arith.constant 0 : index
    %20 = vector.load %arg6[%c3, %c0_25, %c0_26] : memref<9x128x128xbf16, #tpu.memory_space<vmem>>, vector<1x128x128xbf16>
    %21 = vector.shape_cast %20 : vector<1x128x128xbf16> to vector<128x128xbf16>
    %cst_27 = arith.constant dense<0.000000e+00> : vector<256x128xf32>
    %22 = tpu.matmul %18, %21, %cst_27 {dimension_numbers = #tpu.dot_dimension_numbers<[1], [0], [0], [1], [0, 0, 1, 1], [], []>} : vector<256x128xbf16>, vector<128x128xbf16>, vector<256x128xf32> -> vector<256x128xf32>
    %23 = arith.addf %19, %22 : vector<256x128xf32>
    %c0_28 = arith.constant 0 : index
    %c0_29 = arith.constant 0 : index
    %24 = vector.load %arg10[%c0_28, %c0_29] : memref<256x128xf32, #tpu.memory_space<vmem>>, vector<256x128xf32>
    tpu.vector_store %arg10[%c0_28, %c0_29], %23 {strides = array<i32>} : memref<256x128xf32, #tpu.memory_space<vmem>>, vector<256x128xf32>,
    %25 = vector.extract_strided_slice %10 {offsets = [32, 0], sizes = [256, 128], strides = [1, 1]} : vector<288x128xbf16> to vector<256x128xbf16>
    %c0_30 = arith.constant 0 : index
    %c0_31 = arith.constant 0 : index
    %26 = vector.load %arg10[%c0_30, %c0_31] : memref<256x128xf32, #tpu.memory_space<vmem>>, vector<256x128xf32>
    %c6 = arith.constant 6 : index
    %c0_32 = arith.constant 0 : index
    %c0_33 = arith.constant 0 : index
    %27 = vector.load %arg6[%c6, %c0_32, %c0_33] : memref<9x128x128xbf16, #tpu.memory_space<vmem>>, vector<1x128x128xbf16>
    %28 = vector.shape_cast %27 : vector<1x128x128xbf16> to vector<128x128xbf16>
    %cst_34 = arith.constant dense<0.000000e+00> : vector<256x128xf32>
    %29 = tpu.matmul %25, %28, %cst_34 {dimension_numbers = #tpu.dot_dimension_numbers<[1], [0], [0], [1], [0, 0, 1, 1], [], []>} : vector<256x128xbf16>, vector<128x128xbf16>, vector<256x128xf32> -> vector<256x128xf32>
    %30 = arith.addf %26, %29 : vector<256x128xf32>
    %c0_35 = arith.constant 0 : index
    %c0_36 = arith.constant 0 : index
    %31 = vector.load %arg10[%c0_35, %c0_36] : memref<256x128xf32, #tpu.memory_space<vmem>>, vector<256x128xf32>
    tpu.vector_store %arg10[%c0_35, %c0_36], %30 {strides = array<i32>} : memref<256x128xf32, #tpu.memory_space<vmem>>, vector<256x128xf32>,
    %c0_37 = arith.constant 0 : index
    %c1 = arith.constant 1 : index
    %c0_38 = arith.constant 0 : index
    %32 = vector.load %arg9[%c0_37, %c1, %c0_38] : memref<18x18x128xbf16, #tpu.memory_space<vmem>>, vector<18x16x128xbf16>
    %33 = vector.shape_cast %32 : vector<18x16x128xbf16> to vector<288x128xbf16>
    %34 = vector.extract_strided_slice %33 {offsets = [0, 0], sizes = [256, 128], strides = [1, 1]} : vector<288x128xbf16> to vector<256x128xbf16>
    %c0_39 = arith.constant 0 : index
    %c0_40 = arith.constant 0 : index
    %35 = vector.load %arg10[%c0_39, %c0_40] : memref<256x128xf32, #tpu.memory_space<vmem>>, vector<256x128xf32>
    %c1_41 = arith.constant 1 : index
    %c0_42 = arith.constant 0 : index
    %c0_43 = arith.constant 0 : index
    %36 = vector.load %arg6[%c1_41, %c0_42, %c0_43] : memref<9x128x128xbf16, #tpu.memory_space<vmem>>, vector<1x128x128xbf16>
    %37 = vector.shape_cast %36 : vector<1x128x128xbf16> to vector<128x128xbf16>
    %cst_44 = arith.constant dense<0.000000e+00> : vector<256x128xf32>
    %38 = tpu.matmul %34, %37, %cst_44 {dimension_numbers = #tpu.dot_dimension_numbers<[1], [0], [0], [1], [0, 0, 1, 1], [], []>} : vector<256x128xbf16>, vector<128x128xbf16>, vector<256x128xf32> -> vector<256x128xf32>
    %39 = arith.addf %35, %38 : vector<256x128xf32>
    %c0_45 = arith.constant 0 : index
    %c0_46 = arith.constant 0 : index
    %40 = vector.load %arg10[%c0_45, %c0_46] : memref<256x128xf32, #tpu.memory_space<vmem>>, vector<256x128xf32>
    tpu.vector_store %arg10[%c0_45, %c0_46], %39 {strides = array<i32>} : memref<256x128xf32, #tpu.memory_space<vmem>>, vector<256x128xf32>,
    %41 = vector.extract_strided_slice %33 {offsets = [16, 0], sizes = [256, 128], strides = [1, 1]} : vector<288x128xbf16> to vector<256x128xbf16>
    %c0_47 = arith.constant 0 : index
    %c0_48 = arith.constant 0 : index
    %42 = vector.load %arg10[%c0_47, %c0_48] : memref<256x128xf32, #tpu.memory_space<vmem>>, vector<256x128xf32>
    %c4 = arith.constant 4 : index
    %c0_49 = arith.constant 0 : index
    %c0_50 = arith.constant 0 : index
    %43 = vector.load %arg6[%c4, %c0_49, %c0_50] : memref<9x128x128xbf16, #tpu.memory_space<vmem>>, vector<1x128x128xbf16>
    %44 = vector.shape_cast %43 : vector<1x128x128xbf16> to vector<128x128xbf16>
    %cst_51 = arith.constant dense<0.000000e+00> : vector<256x128xf32>
    %45 = tpu.matmul %41, %44, %cst_51 {dimension_numbers = #tpu.dot_dimension_numbers<[1], [0], [0], [1], [0, 0, 1, 1], [], []>} : vector<256x128xbf16>, vector<128x128xbf16>, vector<256x128xf32> -> vector<256x128xf32>
    %46 = arith.addf %42, %45 : vector<256x128xf32>
    %c0_52 = arith.constant 0 : index
    %c0_53 = arith.constant 0 : index
    %47 = vector.load %arg10[%c0_52, %c0_53] : memref<256x128xf32, #tpu.memory_space<vmem>>, vector<256x128xf32>
    tpu.vector_store %arg10[%c0_52, %c0_53], %46 {strides = array<i32>} : memref<256x128xf32, #tpu.memory_space<vmem>>, vector<256x128xf32>,
    %48 = vector.extract_strided_slice %33 {offsets = [32, 0], sizes = [256, 128], strides = [1, 1]} : vector<288x128xbf16> to vector<256x128xbf16>
    %c0_54 = arith.constant 0 : index
    %c0_55 = arith.constant 0 : index
    %49 = vector.load %arg10[%c0_54, %c0_55] : memref<256x128xf32, #tpu.memory_space<vmem>>, vector<256x128xf32>
    %c7 = arith.constant 7 : index
    %c0_56 = arith.constant 0 : index
    %c0_57 = arith.constant 0 : index
    %50 = vector.load %arg6[%c7, %c0_56, %c0_57] : memref<9x128x128xbf16, #tpu.memory_space<vmem>>, vector<1x128x128xbf16>
    %51 = vector.shape_cast %50 : vector<1x128x128xbf16> to vector<128x128xbf16>
    %cst_58 = arith.constant dense<0.000000e+00> : vector<256x128xf32>
    %52 = tpu.matmul %48, %51, %cst_58 {dimension_numbers = #tpu.dot_dimension_numbers<[1], [0], [0], [1], [0, 0, 1, 1], [], []>} : vector<256x128xbf16>, vector<128x128xbf16>, vector<256x128xf32> -> vector<256x128xf32>
    %53 = arith.addf %49, %52 : vector<256x128xf32>
    %c0_59 = arith.constant 0 : index
    %c0_60 = arith.constant 0 : index
    %54 = vector.load %arg10[%c0_59, %c0_60] : memref<256x128xf32, #tpu.memory_space<vmem>>, vector<256x128xf32>
    tpu.vector_store %arg10[%c0_59, %c0_60], %53 {strides = array<i32>} : memref<256x128xf32, #tpu.memory_space<vmem>>, vector<256x128xf32>,
    %c0_61 = arith.constant 0 : index
    %c2 = arith.constant 2 : index
    %c0_62 = arith.constant 0 : index
    %55 = vector.load %arg9[%c0_61, %c2, %c0_62] : memref<18x18x128xbf16, #tpu.memory_space<vmem>>, vector<18x16x128xbf16>
    %56 = vector.shape_cast %55 : vector<18x16x128xbf16> to vector<288x128xbf16>
    %57 = vector.extract_strided_slice %56 {offsets = [0, 0], sizes = [256, 128], strides = [1, 1]} : vector<288x128xbf16> to vector<256x128xbf16>
    %c0_63 = arith.constant 0 : index
    %c0_64 = arith.constant 0 : index
    %58 = vector.load %arg10[%c0_63, %c0_64] : memref<256x128xf32, #tpu.memory_space<vmem>>, vector<256x128xf32>
    %c2_65 = arith.constant 2 : index
    %c0_66 = arith.constant 0 : index
    %c0_67 = arith.constant 0 : index
    %59 = vector.load %arg6[%c2_65, %c0_66, %c0_67] : memref<9x128x128xbf16, #tpu.memory_space<vmem>>, vector<1x128x128xbf16>
    %60 = vector.shape_cast %59 : vector<1x128x128xbf16> to vector<128x128xbf16>
    %cst_68 = arith.constant dense<0.000000e+00> : vector<256x128xf32>
    %61 = tpu.matmul %57, %60, %cst_68 {dimension_numbers = #tpu.dot_dimension_numbers<[1], [0], [0], [1], [0, 0, 1, 1], [], []>} : vector<256x128xbf16>, vector<128x128xbf16>, vector<256x128xf32> -> vector<256x128xf32>
    %62 = arith.addf %58, %61 : vector<256x128xf32>
    %c0_69 = arith.constant 0 : index
    %c0_70 = arith.constant 0 : index
    %63 = vector.load %arg10[%c0_69, %c0_70] : memref<256x128xf32, #tpu.memory_space<vmem>>, vector<256x128xf32>
    tpu.vector_store %arg10[%c0_69, %c0_70], %62 {strides = array<i32>} : memref<256x128xf32, #tpu.memory_space<vmem>>, vector<256x128xf32>,
    %64 = vector.extract_strided_slice %56 {offsets = [16, 0], sizes = [256, 128], strides = [1, 1]} : vector<288x128xbf16> to vector<256x128xbf16>
    %c0_71 = arith.constant 0 : index
    %c0_72 = arith.constant 0 : index
    %65 = vector.load %arg10[%c0_71, %c0_72] : memref<256x128xf32, #tpu.memory_space<vmem>>, vector<256x128xf32>
    %c5 = arith.constant 5 : index
    %c0_73 = arith.constant 0 : index
    %c0_74 = arith.constant 0 : index
    %66 = vector.load %arg6[%c5, %c0_73, %c0_74] : memref<9x128x128xbf16, #tpu.memory_space<vmem>>, vector<1x128x128xbf16>
    %67 = vector.shape_cast %66 : vector<1x128x128xbf16> to vector<128x128xbf16>
    %cst_75 = arith.constant dense<0.000000e+00> : vector<256x128xf32>
    %68 = tpu.matmul %64, %67, %cst_75 {dimension_numbers = #tpu.dot_dimension_numbers<[1], [0], [0], [1], [0, 0, 1, 1], [], []>} : vector<256x128xbf16>, vector<128x128xbf16>, vector<256x128xf32> -> vector<256x128xf32>
    %69 = arith.addf %65, %68 : vector<256x128xf32>
    %c0_76 = arith.constant 0 : index
    %c0_77 = arith.constant 0 : index
    %70 = vector.load %arg10[%c0_76, %c0_77] : memref<256x128xf32, #tpu.memory_space<vmem>>, vector<256x128xf32>
    tpu.vector_store %arg10[%c0_76, %c0_77], %69 {strides = array<i32>} : memref<256x128xf32, #tpu.memory_space<vmem>>, vector<256x128xf32>,
    %71 = vector.extract_strided_slice %56 {offsets = [32, 0], sizes = [256, 128], strides = [1, 1]} : vector<288x128xbf16> to vector<256x128xbf16>
    %c0_78 = arith.constant 0 : index
    %c0_79 = arith.constant 0 : index
    %72 = vector.load %arg10[%c0_78, %c0_79] : memref<256x128xf32, #tpu.memory_space<vmem>>, vector<256x128xf32>
    %c8 = arith.constant 8 : index
    %c0_80 = arith.constant 0 : index
    %c0_81 = arith.constant 0 : index
    %73 = vector.load %arg6[%c8, %c0_80, %c0_81] : memref<9x128x128xbf16, #tpu.memory_space<vmem>>, vector<1x128x128xbf16>
    %74 = vector.shape_cast %73 : vector<1x128x128xbf16> to vector<128x128xbf16>
    %cst_82 = arith.constant dense<0.000000e+00> : vector<256x128xf32>
    %75 = tpu.matmul %71, %74, %cst_82 {dimension_numbers = #tpu.dot_dimension_numbers<[1], [0], [0], [1], [0, 0, 1, 1], [], []>} : vector<256x128xbf16>, vector<128x128xbf16>, vector<256x128xf32> -> vector<256x128xf32>
    %76 = arith.addf %72, %75 : vector<256x128xf32>
    %c0_83 = arith.constant 0 : index
    %c0_84 = arith.constant 0 : index
    %77 = vector.load %arg10[%c0_83, %c0_84] : memref<256x128xf32, #tpu.memory_space<vmem>>, vector<256x128xf32>
    tpu.vector_store %arg10[%c0_83, %c0_84], %76 {strides = array<i32>} : memref<256x128xf32, #tpu.memory_space<vmem>>, vector<256x128xf32>,
    %c0_i32_85 = arith.constant 0 : i32
    %78 = arith.cmpi eq, %arg3, %c0_i32_85 : i32
    %79 = arith.extui %78 : i1 to i32
    %c0_i32_86 = arith.constant 0 : i32
    %80 = arith.cmpi ne, %79, %c0_i32_86 : i32
    scf.if %80 {
      %c0_87 = arith.constant 0 : index
      %c0_88 = arith.constant 0 : index
      %81 = vector.load %arg10[%c0_87, %c0_88] : memref<256x128xf32, #tpu.memory_space<vmem>>, vector<256x128xf32>
      %c0_89 = arith.constant 0 : index
      %c0_90 = arith.constant 0 : index
      %82 = vector.load %arg7[%c0_89, %c0_90] : memref<1x128xf32, #tpu.memory_space<vmem>>, vector<1x128xf32>
      %83 = vector.broadcast %82 : vector<1x128xf32> to vector<256x128xf32>
      %84 = arith.addf %81, %83 : vector<256x128xf32>
      %cst_91 = arith.constant 0.000000e+00 : f32
      %85 = vector.broadcast %cst_91 : f32 to vector<256x128xf32>
      %86 = arith.maximumf %84, %85 : vector<256x128xf32>
      %87 = arith.truncf %86 : vector<256x128xf32> to vector<256x128xbf16>
      %c0_92 = arith.constant 0 : index
      %c0_93 = arith.constant 0 : index
      %c0_94 = arith.constant 0 : index
      %88 = vector.load %arg8[%c0_92, %c0_93, %c0_94] : memref<1x256x128xbf16, #tpu.memory_space<vmem>>, vector<1x256x128xbf16>
      %89 = vector.shape_cast %88 : vector<1x256x128xbf16> to vector<256x128xbf16>
      %90 = vector.shape_cast %87 : vector<256x128xbf16> to vector<1x256x128xbf16>
      tpu.vector_store %arg8[%c0_92, %c0_93, %c0_94], %90 {strides = array<i32>} : memref<1x256x128xbf16, #tpu.memory_space<vmem>>, vector<1x256x128xbf16>,
    } else {
    }
    return
  }
  func.func @transform_0(%arg0: i32, %arg1: i32, %arg2: i32, %arg3: i32) -> (i32, i32, i32, i32) {
    %c0_i32 = arith.constant 0 : i32
    %c0_i32_0 = arith.constant 0 : i32
    return %arg0, %arg1, %c0_i32, %arg3 : i32, i32, i32, i32
  }
  func.func @transform_1(%arg0: i32, %arg1: i32, %arg2: i32, %arg3: i32) -> (i32, i32, i32, i32) {
    %c1_i32 = arith.constant 1 : i32
    %0 = arith.addi %arg1, %c1_i32 : i32
    %c8_i32 = arith.constant 8 : i32
    %1 = arith.muli %0, %c8_i32 : i32
    %c0_i32 = arith.constant 0 : i32
    %c0_i32_0 = arith.constant 0 : i32
    return %arg0, %1, %c0_i32, %arg3 : i32, i32, i32, i32
  }
  func.func @transform_2(%arg0: i32, %arg1: i32, %arg2: i32, %arg3: i32) -> (i32, i32, i32) {
    %c0_i32 = arith.constant 0 : i32
    %c0_i32_0 = arith.constant 0 : i32
    return %c0_i32, %arg3, %arg2 : i32, i32, i32
  }
  func.func @transform_3(%arg0: i32, %arg1: i32, %arg2: i32, %arg3: i32) -> (i32, i32) {
    %c0_i32 = arith.constant 0 : i32
    %c0_i32_0 = arith.constant 0 : i32
    return %c0_i32, %arg2 : i32, i32
  }
  func.func @transform_4(%arg0: i32, %arg1: i32, %arg2: i32, %arg3: i32) -> (i32, i32, i32) {
    %c0_i32 = arith.constant 0 : i32
    return %arg0, %arg1, %arg2 : i32, i32, i32
  }
}

module attributes {stable_mosaic.version = 11 : i64} {
  func.func @_mm_kernel(%arg0: i32, %arg1: i32, %arg2: i32, %arg3: memref<256x128xbf16, #tpu.memory_space<vmem>>, %arg4: memref<128x128xbf16, #tpu.memory_space<vmem>>, %arg5: memref<1x128xf32, #tpu.memory_space<vmem>>, %arg6: memref<256x128xbf16, #tpu.memory_space<vmem>>, %arg7: memref<256x128xbf16, #tpu.memory_space<vmem>>, %arg8: memref<256x128xf32, #tpu.memory_space<vmem>>) attributes {dimension_semantics = [#tpu.dimension_semantics<parallel>, #tpu.dimension_semantics<parallel>, #tpu.dimension_semantics<arbitrary>], iteration_bounds = array<i64: 2, 1, 1>, scalar_prefetch = 0 : i64, scratch_operands = 1 : i64, tpu.core_type = #tpu.core_type<tc>, window_params = [{transform_indices = @transform_0, window_bounds = array<i64: 256, 128>}, {transform_indices = @transform_1, window_bounds = array<i64: 128, 128>}, {transform_indices = @transform_2, window_bounds = array<i64: 1, 128>}, {transform_indices = @transform_3, window_bounds = array<i64: 256, 128>}, {transform_indices = @transform_4, window_bounds = array<i64: 256, 128>}]} {
    %c0_i32 = arith.constant 0 : i32
    %0 = arith.cmpi eq, %arg2, %c0_i32 : i32
    %1 = arith.extui %0 : i1 to i32
    %c0_i32_0 = arith.constant 0 : i32
    %2 = arith.cmpi ne, %1, %c0_i32_0 : i32
    scf.if %2 {
      %cst_10 = arith.constant 0.000000e+00 : f32
      %12 = vector.broadcast %cst_10 : f32 to vector<256x128xf32>
      %c0_11 = arith.constant 0 : index
      %c0_12 = arith.constant 0 : index
      %13 = vector.load %arg8[%c0_11, %c0_12] : memref<256x128xf32, #tpu.memory_space<vmem>>, vector<256x128xf32>
      tpu.vector_store %arg8[%c0_11, %c0_12], %12 {strides = array<i32>} : memref<256x128xf32, #tpu.memory_space<vmem>>, vector<256x128xf32>,
    } else {
    }
    %c0 = arith.constant 0 : index
    %c0_1 = arith.constant 0 : index
    %3 = vector.load %arg8[%c0, %c0_1] : memref<256x128xf32, #tpu.memory_space<vmem>>, vector<256x128xf32>
    %c0_2 = arith.constant 0 : index
    %c0_3 = arith.constant 0 : index
    %4 = vector.load %arg3[%c0_2, %c0_3] : memref<256x128xbf16, #tpu.memory_space<vmem>>, vector<256x128xbf16>
    %c0_4 = arith.constant 0 : index
    %c0_5 = arith.constant 0 : index
    %5 = vector.load %arg4[%c0_4, %c0_5] : memref<128x128xbf16, #tpu.memory_space<vmem>>, vector<128x128xbf16>
    %cst = arith.constant dense<0.000000e+00> : vector<256x128xf32>
    %6 = tpu.matmul %4, %5, %cst {dimension_numbers = #tpu.dot_dimension_numbers<[1], [0], [0], [1], [0, 0, 1, 1], [], []>} : vector<256x128xbf16>, vector<128x128xbf16>, vector<256x128xf32> -> vector<256x128xf32>
    %7 = arith.addf %3, %6 : vector<256x128xf32>
    %c0_6 = arith.constant 0 : index
    %c0_7 = arith.constant 0 : index
    %8 = vector.load %arg8[%c0_6, %c0_7] : memref<256x128xf32, #tpu.memory_space<vmem>>, vector<256x128xf32>
    tpu.vector_store %arg8[%c0_6, %c0_7], %7 {strides = array<i32>} : memref<256x128xf32, #tpu.memory_space<vmem>>, vector<256x128xf32>,
    %c0_i32_8 = arith.constant 0 : i32
    %9 = arith.cmpi eq, %arg2, %c0_i32_8 : i32
    %10 = arith.extui %9 : i1 to i32
    %c0_i32_9 = arith.constant 0 : i32
    %11 = arith.cmpi ne, %10, %c0_i32_9 : i32
    scf.if %11 {
      %c0_10 = arith.constant 0 : index
      %c0_11 = arith.constant 0 : index
      %12 = vector.load %arg8[%c0_10, %c0_11] : memref<256x128xf32, #tpu.memory_space<vmem>>, vector<256x128xf32>
      %c0_12 = arith.constant 0 : index
      %c0_13 = arith.constant 0 : index
      %13 = vector.load %arg5[%c0_12, %c0_13] : memref<1x128xf32, #tpu.memory_space<vmem>>, vector<1x128xf32>
      %14 = vector.broadcast %13 : vector<1x128xf32> to vector<256x128xf32>
      %15 = arith.addf %12, %14 : vector<256x128xf32>
      %c0_14 = arith.constant 0 : index
      %c0_15 = arith.constant 0 : index
      %16 = vector.load %arg6[%c0_14, %c0_15] : memref<256x128xbf16, #tpu.memory_space<vmem>>, vector<256x128xbf16>
      %17 = arith.extf %16 : vector<256x128xbf16> to vector<256x128xf32>
      %18 = arith.addf %15, %17 : vector<256x128xf32>
      %cst_16 = arith.constant 0.000000e+00 : f32
      %19 = vector.broadcast %cst_16 : f32 to vector<256x128xf32>
      %20 = arith.maximumf %18, %19 : vector<256x128xf32>
      %21 = arith.truncf %20 : vector<256x128xf32> to vector<256x128xbf16>
      %c0_17 = arith.constant 0 : index
      %c0_18 = arith.constant 0 : index
      %22 = vector.load %arg7[%c0_17, %c0_18] : memref<256x128xbf16, #tpu.memory_space<vmem>>, vector<256x128xbf16>
      tpu.vector_store %arg7[%c0_17, %c0_18], %21 {strides = array<i32>} : memref<256x128xbf16, #tpu.memory_space<vmem>>, vector<256x128xbf16>,
    } else {
    }
    return
  }
  func.func @transform_0(%arg0: i32, %arg1: i32, %arg2: i32) -> (i32, i32) {
    %c0_i32 = arith.constant 0 : i32
    return %arg0, %arg2 : i32, i32
  }
  func.func @transform_1(%arg0: i32, %arg1: i32, %arg2: i32) -> (i32, i32) {
    %c0_i32 = arith.constant 0 : i32
    return %arg2, %arg1 : i32, i32
  }
  func.func @transform_2(%arg0: i32, %arg1: i32, %arg2: i32) -> (i32, i32) {
    %c0_i32 = arith.constant 0 : i32
    %c0_i32_0 = arith.constant 0 : i32
    return %c0_i32, %arg1 : i32, i32
  }
  func.func @transform_3(%arg0: i32, %arg1: i32, %arg2: i32) -> (i32, i32) {
    %c0_i32 = arith.constant 0 : i32
    return %arg0, %arg1 : i32, i32
  }
  func.func @transform_4(%arg0: i32, %arg1: i32, %arg2: i32) -> (i32, i32) {
    %c0_i32 = arith.constant 0 : i32
    return %arg0, %arg1 : i32, i32
  }
}

</mosaic_0001>

<bundles_post_ra>
// kernel: bottleneck_forward.4
= control target key start
LH: loop header
LB: loop body
LE: loop exit
PB: predicated region body
PF: predicated region fallthrough
CT: control target
= control target key end

     0   :  { %s1458_s12 = smov 0   ;;  %s1460_s13 = smov 0   ;;  %s1593_s0 = inlined_call_operand.vmem [shape: bf16[512,32], index: 0, kind: input, shape index: {}]   ;;  %s1594_s1 = inlined_call_operand.vmem [shape: bf16[32,128], index: 1, kind: input, shape index: {}]   ;;  %s1595_s2 = inlined_call_operand.vmem [shape: f32[1,128], index: 2, kind: input, shape index: {}]   ;;  %s1596_s3 = inlined_call_operand.vmem [shape: bf16[512,128], index: 3, kind: output, shape index: {}]  }
   0x1   :  { %s1462_s14 = smov 0  }
   0x2 LB: > { %s32_s15 = sadd.s32 1, %s1432_s13  ;;  %p1113_p0 = scmp.ge.s32.totalorder %s1436_s14, 1  ;;  %s1436_s14 = sphi %s1462_s14, %s13_s14   ;;  %s1432_s13 = sphi %s1460_s13, %s1598_s13   ;;  %s1428_s12 = sphi %s1458_s12, %s1597_s12  }
   0x3   : > { %p34_p1 = scmp.ge.s32.totalorder %s32_s15, 2  ;;  %p188_p2 = scmp.lt.s32.totalorder %s1436_s14, 3 }
   0x5   : > { %s1600_s15 = smov (%p34_p1, %s32_s15), 0  ;;  %p189_p3 = pnand %p1113_p0, %p188_p2 }
   0x6   : > { %v1396_v0 = vld [vmem:[%s1594_s1] sm:$0xff] (!%p189_p3)   ;;  %s1114_s18 = sshll.u32 (!%p189_p3), %s1428_s12, 5  ;;  %v1397_v1 = vld [vmem:[%s1594_s1 + $0x8] sm:$0xff] (!%p189_p3)   ;;  %vm456_vm0 = vcmask (!%p189_p3), 261120  }
   0x7   : > { %192 = sbr.rel (%p189_p3) target bundleno = 266 (0x10a), region = 32  ;;  %p230_p4 = scmp.lt.s32.totalorder (!%p189_p3), %s1114_s18, 63  ;;  %1332 = vmatprep.subr.bf16.mxu0 (!%p189_p3), %v1396_v0  ;;  %1368 = vmatprep.subr.bf16.mxu1 (!%p189_p3), %v1396_v0  ;;  %v1527_v18 = vld [vmem:[%s1595_s2] ss:$0 sm:$0xff] (!%p189_p3) }
   0x8   : > { %1333 = vmatpush3.bf16.msra.mxu0 (!%p189_p3), %v1396_v0  ;;  %1370 = vmatpush3.bf16.msra.mxu1 (!%p189_p3), %v1396_v0 }
   0x9   : > { %1334 = vmatprep.subr.bf16.mxu0 (!%p189_p3), %v1397_v1  ;;  %1369 = vmatprep.subr.bf16.mxu1 (!%p189_p3), %v1397_v1 }
   0xc   : > { %1335 = vmatpush3.bf16.msra.mxu0 (!%p189_p3), %v1397_v1  ;;  %1371 = vmatpush3.bf16.msra.mxu1 (!%p189_p3), %v1397_v1 }
   0xe   : > { %s1602_s18 = smov (!%p230_p4, %s1114_s18), 63 }
   0xf   : > { %s1115_s21 = sshll.u32 %s1602_s18, 2 }
  0x10   : > { %s1490_s24 = scalar_lea.vmem %s1593_s0, %s1115_s21  ;;  %s1542_s29 = scalar_lea.vmem %s1596_s3, %s1115_s21 }
  0x11   : > { %v1398_v2 = vld [vmem:[%s1490_s24] sm:$0xff]   ;;  %v1400_v4 = vld [vmem:[%s1490_s24 + $0x8] sm:$0xff]   ;;  %v1402_v6 = vld [vmem:[%s1490_s24 + $0x10] sm:$0xff]  }
  0x12   : > { %v1399_v3 = vld [vmem:[%s1490_s24 + $0x40] sm:$0xff]   ;;  %1336 = vmatprep.mubr.msk.bf16.mxu0 %vm456_vm0, %v1398_v2  ;;  %v1401_v5 = vld [vmem:[%s1490_s24 + $0x48] sm:$0xff]   ;;  %v1403_v7 = vld [vmem:[%s1490_s24 + $0x50] sm:$0xff]  }
  0x13   : > { %1352 = vmatprep.mubr.msk.bf16.mxu1 %vm456_vm0, %v1399_v3  ;;  %1337 = vmatmul.mubr.msk.bf16.vlgmr.msra.gmra.mrb[0].mxu0 %vm456_vm0, %v1400_v4  ;;  %v1404_v8 = vld [vmem:[%s1490_s24 + $0x18] sm:$0xff]   ;;  %v1406_v10 = vld [vmem:[%s1490_s24 + $0x20] sm:$0xff]   ;;  %v1408_v12 = vld [vmem:[%s1490_s24 + $0x28] sm:$0xff]  }
  0x14   : > { %1353 = vmatmul.mubr.msk.bf16.vlgmr.msra.gmra.mrb[0].mxu1 %vm456_vm0, %v1401_v5  ;;  %1340 = vmatprep.mubr.msk.bf16.mxu0 %vm456_vm0, %v1402_v6  ;;  %v1405_v9 = vld [vmem:[%s1490_s24 + $0x58] sm:$0xff]   ;;  %v1407_v11 = vld [vmem:[%s1490_s24 + $0x60] sm:$0xff]   ;;  %v1409_v13 = vld [vmem:[%s1490_s24 + $0x68] sm:$0xff]  }
  0x15   : > { %1356 = vmatprep.mubr.msk.bf16.mxu1 %vm456_vm0, %v1403_v7  ;;  %v1410_v14 = vld [vmem:[%s1490_s24 + $0x30] sm:$0xff]   ;;  %v1412_v16 = vld [vmem:[%s1490_s24 + $0x38] sm:$0xff]  }
  0x16   : > { %v1411_v15 = vld [vmem:[%s1490_s24 + $0x70] sm:$0xff]   ;;  %v1413_v17 = vld [vmem:[%s1490_s24 + $0x78] sm:$0xff]  }
  0x1b   : > { %1341 = vmatmul.mubr.msk.bf16.gmra.mrb[4].mxu0 %vm456_vm0, %v1404_v8 }
  0x1c   : > { %1357 = vmatmul.mubr.msk.bf16.gmra.mrb[4].mxu1 %vm456_vm0, %v1405_v9  ;;  %1344 = vmatprep.mubr.msk.bf16.mxu0 %vm456_vm0, %v1406_v10 }
  0x1d   : > { %1360 = vmatprep.mubr.msk.bf16.mxu1 %vm456_vm0, %v1407_v11 }
  0x23   : > { %1345 = vmatmul.mubr.msk.bf16.gmra.mrb[8].mxu0 %vm456_vm0, %v1408_v12 }
  0x24   : > { %1361 = vmatmul.mubr.msk.bf16.gmra.mrb[8].mxu1 %vm456_vm0, %v1409_v13  ;;  %1348 = vmatprep.mubr.msk.bf16.mxu0 %vm456_vm0, %v1410_v14 }
  0x25   : > { %1364 = vmatprep.mubr.msk.bf16.mxu1 %vm456_vm0, %v1411_v15 }
  0x2b   : > { %1349 = vmatmul.mubr.msk.bf16.gmra.mrb[12].mxu0 %vm456_vm0, %v1412_v16 }
  0x2c   : > { %1365 = vmatmul.mubr.msk.bf16.gmra.mrb[12].mxu1 %vm456_vm0, %v1413_v17 }
  0xe6   : > { %v1338_v19 = vpop.f32.mrb[0].mxu0 }
  0xe7   : > { %v774_v20 = vadd.f32 %v1338_v19, %v1527_v18  ;;  %v1354_v21 = vpop.f32.mrb[0].mxu1  ;;  %v539_v22 = vpop.f32.mrb[1].mxu0 }
  0xe8   : > { %v790_v23 = vadd.f32 %v1354_v21, %v1527_v18  ;;  %v772_v24 = vadd.f32 %v1527_v18, %v539_v22  ;;  %v603_v25 = vpop.f32.mrb[1].mxu1  ;;  %v1339_v26 = vpop.f32.mrb[2].mxu0 }
  0xe9   : > { %v788_v27 = vadd.f32 %v1527_v18, %v603_v25  ;;  %v775_v28 = vadd.f32 %v1339_v26, %v1527_v18  ;;  %v1355_v29 = vpop.f32.mrb[2].mxu1  ;;  %v542_v30 = vpop.f32.mrb[3].mxu0  ;;  %v806_v34 = vmax.f32 %v774_v20, 0.0 }
  0xea   : > { %v791_v31 = vadd.f32 %v1355_v29, %v1527_v18  ;;  %v773_v32 = vadd.f32 %v1527_v18, %v542_v30  ;;  %v606_v33 = vpop.f32.mrb[3].mxu1  ;;  %v822_v37 = vmax.f32 %v790_v23, 0.0  ;;  %v804_v38 = vmax.f32 %v772_v24, 0.0 }
  0xeb   : > { %v807_v35 = vmax.f32 %v775_v28, 0.0  ;;  %v789_v36 = vadd.f32 %v1527_v18, %v606_v33  ;;  %v820_v41 = vmax.f32 %v788_v27, 0.0 }
  0xec   : > { %v823_v39 = vmax.f32 %v791_v31, 0.0  ;;  %v805_v40 = vmax.f32 %v773_v32, 0.0 }
  0xed   : > { %v1227_v42 = vpack.c.bf16 %v807_v35, %v806_v34  ;;  %v821_v43 = vmax.f32 %v789_v36, 0.0 }
  0xee   : > { %v1267_v44 = vpack.c.bf16 %v823_v39, %v822_v37  ;;  %v1222_v45 = vpack.c.bf16 %v805_v40, %v804_v38  ;;  %v1342_v46 = vpop.f32.mrb[4].mxu0 }
  0xef   : > { %1299 = vst [vmem:[%s1542_s29 + $0x8] sm:$0xff] %v1227_v42   ;;  %v1262_v47 = vpack.c.bf16 %v821_v43, %v820_v41  ;;  %v778_v48 = vadd.f32 %v1342_v46, %v1527_v18  ;;  %v1358_v49 = vpop.f32.mrb[4].mxu1  ;;  %v555_v50 = vpop.f32.mrb[5].mxu0 }
  0xf0   : > { %1307 = vst [vmem:[%s1542_s29 + $0x48] sm:$0xff] %v1267_v44   ;;  %1223 = vst [vmem:[%s1542_s29] sm:$0xff] %v1222_v45   ;;  %v794_v51 = vadd.f32 %v1358_v49, %v1527_v18  ;;  %v776_v52 = vadd.f32 %v1527_v18, %v555_v50  ;;  %v619_v53 = vpop.f32.mrb[5].mxu1  ;;  %v1343_v54 = vpop.f32.mrb[6].mxu0 }
  0xf1   : > { %1306 = vst [vmem:[%s1542_s29 + $0x40] sm:$0xff] %v1262_v47   ;;  %v792_v55 = vadd.f32 %v1527_v18, %v619_v53  ;;  %v779_v56 = vadd.f32 %v1343_v54, %v1527_v18  ;;  %v1359_v57 = vpop.f32.mrb[6].mxu1  ;;  %v558_v58 = vpop.f32.mrb[7].mxu0  ;;  %v810_v62 = vmax.f32 %v778_v48, 0.0 }
  0xf2   : > { %v795_v59 = vadd.f32 %v1359_v57, %v1527_v18  ;;  %v777_v60 = vadd.f32 %v1527_v18, %v558_v58  ;;  %v622_v61 = vpop.f32.mrb[7].mxu1  ;;  %v826_v1 = vmax.f32 %v794_v51, 0.0  ;;  %v808_v2 = vmax.f32 %v776_v52, 0.0 }
  0xf3   : > { %v811_v63 = vmax.f32 %v779_v56, 0.0  ;;  %v793_v0 = vadd.f32 %v1527_v18, %v622_v61  ;;  %v824_v5 = vmax.f32 %v792_v55, 0.0 }
  0xf4   : > { %v827_v3 = vmax.f32 %v795_v59, 0.0  ;;  %v809_v4 = vmax.f32 %v777_v60, 0.0 }
  0xf5   : > { %v1237_v6 = vpack.c.bf16 %v811_v63, %v810_v62  ;;  %v825_v7 = vmax.f32 %v793_v0, 0.0 }
  0xf6   : > { %v1277_v8 = vpack.c.bf16 %v827_v3, %v826_v1  ;;  %v1232_v9 = vpack.c.bf16 %v809_v4, %v808_v2  ;;  %v1346_v10 = vpop.f32.mrb[8].mxu0 }
  0xf7   : > { %1301 = vst [vmem:[%s1542_s29 + $0x18] sm:$0xff] %v1237_v6   ;;  %v1272_v11 = vpack.c.bf16 %v825_v7, %v824_v5  ;;  %v782_v12 = vadd.f32 %v1346_v10, %v1527_v18  ;;  %v1362_v13 = vpop.f32.mrb[8].mxu1  ;;  %v571_v14 = vpop.f32.mrb[9].mxu0 }
  0xf8   : > { %1309 = vst [vmem:[%s1542_s29 + $0x58] sm:$0xff] %v1277_v8   ;;  %1300 = vst [vmem:[%s1542_s29 + $0x10] sm:$0xff] %v1232_v9   ;;  %v798_v15 = vadd.f32 %v1362_v13, %v1527_v18  ;;  %v780_v16 = vadd.f32 %v1527_v18, %v571_v14  ;;  %v635_v17 = vpop.f32.mrb[9].mxu1  ;;  %v1347_v19 = vpop.f32.mrb[10].mxu0 }
  0xf9   : > { %1308 = vst [vmem:[%s1542_s29 + $0x50] sm:$0xff] %v1272_v11   ;;  %v796_v20 = vadd.f32 %v1527_v18, %v635_v17  ;;  %v783_v21 = vadd.f32 %v1347_v19, %v1527_v18  ;;  %v1363_v22 = vpop.f32.mrb[10].mxu1  ;;  %v574_v23 = vpop.f32.mrb[11].mxu0  ;;  %v814_v27 = vmax.f32 %v782_v12, 0.0 }
  0xfa   : > { %v799_v24 = vadd.f32 %v1363_v22, %v1527_v18  ;;  %v781_v25 = vadd.f32 %v1527_v18, %v574_v23  ;;  %v638_v26 = vpop.f32.mrb[11].mxu1  ;;  %v830_v30 = vmax.f32 %v798_v15, 0.0  ;;  %v812_v31 = vmax.f32 %v780_v16, 0.0 }
  0xfb   : > { %v815_v28 = vmax.f32 %v783_v21, 0.0  ;;  %v797_v29 = vadd.f32 %v1527_v18, %v638_v26  ;;  %v828_v34 = vmax.f32 %v796_v20, 0.0 }
  0xfc   : > { %v831_v32 = vmax.f32 %v799_v24, 0.0  ;;  %v813_v33 = vmax.f32 %v781_v25, 0.0 }
  0xfd   : > { %v1247_v35 = vpack.c.bf16 %v815_v28, %v814_v27  ;;  %v829_v36 = vmax.f32 %v797_v29, 0.0 }
  0xfe   : > { %v1287_v37 = vpack.c.bf16 %v831_v32, %v830_v30  ;;  %v1242_v38 = vpack.c.bf16 %v813_v33, %v812_v31  ;;  %v1350_v39 = vpop.f32.mrb[12].mxu0 }
  0xff   : > { %1303 = vst [vmem:[%s1542_s29 + $0x28] sm:$0xff] %v1247_v35   ;;  %v1282_v40 = vpack.c.bf16 %v829_v36, %v828_v34  ;;  %v786_v41 = vadd.f32 %v1350_v39, %v1527_v18  ;;  %v1366_v42 = vpop.f32.mrb[12].mxu1  ;;  %v587_v43 = vpop.f32.mrb[13].mxu0 }
 0x100   : > { %1311 = vst [vmem:[%s1542_s29 + $0x68] sm:$0xff] %v1287_v37   ;;  %1302 = vst [vmem:[%s1542_s29 + $0x20] sm:$0xff] %v1242_v38   ;;  %v802_v44 = vadd.f32 %v1366_v42, %v1527_v18  ;;  %v784_v45 = vadd.f32 %v1527_v18, %v587_v43  ;;  %v651_v46 = vpop.f32.mrb[13].mxu1  ;;  %v1351_v47 = vpop.f32.mrb[14].mxu0 }
 0x101   : > { %1310 = vst [vmem:[%s1542_s29 + $0x60] sm:$0xff] %v1282_v40   ;;  %v800_v48 = vadd.f32 %v1527_v18, %v651_v46  ;;  %v787_v49 = vadd.f32 %v1351_v47, %v1527_v18  ;;  %v1367_v50 = vpop.f32.mrb[14].mxu1  ;;  %v590_v51 = vpop.f32.mrb[15].mxu0  ;;  %v818_v55 = vmax.f32 %v786_v41, 0.0 }
 0x102   : > { %v803_v52 = vadd.f32 %v1367_v50, %v1527_v18  ;;  %v785_v53 = vadd.f32 %v1527_v18, %v590_v51  ;;  %v654_v54 = vpop.f32.mrb[15].mxu1  ;;  %v834_v58 = vmax.f32 %v802_v44, 0.0  ;;  %v816_v59 = vmax.f32 %v784_v45, 0.0 }
 0x103   : > { %v819_v56 = vmax.f32 %v787_v49, 0.0  ;;  %v801_v57 = vadd.f32 %v1527_v18, %v654_v54  ;;  %v832_v62 = vmax.f32 %v800_v48, 0.0 }
 0x104   : > { %v835_v60 = vmax.f32 %v803_v52, 0.0  ;;  %v817_v61 = vmax.f32 %v785_v53, 0.0 }
 0x105   : > { %v1257_v63 = vpack.c.bf16 %v819_v56, %v818_v55  ;;  %v833_v0 = vmax.f32 %v801_v57, 0.0 }
 0x106   : > { %v1297_v1 = vpack.c.bf16 %v835_v60, %v834_v58  ;;  %v1252_v2 = vpack.c.bf16 %v817_v61, %v816_v59 }
 0x107   : > { %1305 = vst [vmem:[%s1542_s29 + $0x38] sm:$0xff] %v1257_v63   ;;  %v1292_v3 = vpack.c.bf16 %v833_v0, %v832_v62 }
 0x108   : > { %1313 = vst [vmem:[%s1542_s29 + $0x78] sm:$0xff] %v1297_v1   ;;  %1304 = vst [vmem:[%s1542_s29 + $0x30] sm:$0xff] %v1252_v2  }
 0x109   : > { %1312 = vst [vmem:[%s1542_s29 + $0x70] sm:$0xff] %v1292_v3  }
 0x10a PF: > { %s13_s14 = sadd.s32 1, %s1436_s14   ;;  %s1597_s12 = smov %s1432_s13 }
 0x10b   : > { %p10_p5 = scmp.ge.s32.totalorder %s13_s14, 4   ;;  %s1598_s13 = smov %s1600_s15 }
 0x10d   :  { %12 = sbr.rel (!%p10_p5) target bundleno = 2 (0x2), region = 76 }

// kernel: bottleneck_forward.6
= control target key start
LH: loop header
LB: loop body
LE: loop exit
PB: predicated region body
PF: predicated region fallthrough
CT: control target
= control target key end

     0   :  { %s1426_s12 = smov 0   ;;  %s1428_s13 = smov 0   ;;  %s1561_s0 = inlined_call_operand.vmem [shape: bf16[512,32], index: 0, kind: input, shape index: {}]   ;;  %s1562_s1 = inlined_call_operand.vmem [shape: bf16[32,128], index: 1, kind: input, shape index: {}]   ;;  %s1563_s2 = inlined_call_operand.vmem [shape: f32[1,128], index: 2, kind: input, shape index: {}]   ;;  %s1564_s3 = inlined_call_operand.vmem [shape: bf16[512,128], index: 3, kind: output, shape index: {}]  }
   0x1   :  { %s1430_s14 = smov 0  }
   0x2 LB: > { %s32_s15 = sadd.s32 1, %s1400_s13  ;;  %p1081_p0 = scmp.ge.s32.totalorder %s1404_s14, 1  ;;  %s1404_s14 = sphi %s1430_s14, %s13_s14   ;;  %s1400_s13 = sphi %s1428_s13, %s1566_s13   ;;  %s1396_s12 = sphi %s1426_s12, %s1565_s12  }
   0x3   : > { %p34_p1 = scmp.ge.s32.totalorder %s32_s15, 2  ;;  %p188_p2 = scmp.lt.s32.totalorder %s1404_s14, 3 }
   0x5   : > { %s1568_s15 = smov (%p34_p1, %s32_s15), 0  ;;  %p189_p3 = pnand %p1081_p0, %p188_p2 }
   0x6   : > { %v1364_v0 = vld [vmem:[%s1562_s1] sm:$0xff] (!%p189_p3)   ;;  %s1082_s18 = sshll.u32 (!%p189_p3), %s1396_s12, 5  ;;  %v1365_v1 = vld [vmem:[%s1562_s1 + $0x8] sm:$0xff] (!%p189_p3)   ;;  %vm456_vm0 = vcmask (!%p189_p3), 261120  }
   0x7   : > { %192 = sbr.rel (%p189_p3) target bundleno = 264 (0x108), region = 32  ;;  %p230_p4 = scmp.lt.s32.totalorder (!%p189_p3), %s1082_s18, 63  ;;  %1300 = vmatprep.subr.bf16.mxu0 (!%p189_p3), %v1364_v0  ;;  %1336 = vmatprep.subr.bf16.mxu1 (!%p189_p3), %v1364_v0  ;;  %v1495_v19 = vld [vmem:[%s1563_s2] ss:$0 sm:$0xff] (!%p189_p3) }
   0x8   : > { %1301 = vmatpush3.bf16.msra.mxu0 (!%p189_p3), %v1364_v0  ;;  %1338 = vmatpush3.bf16.msra.mxu1 (!%p189_p3), %v1364_v0 }
   0x9   : > { %1302 = vmatprep.subr.bf16.mxu0 (!%p189_p3), %v1365_v1  ;;  %1337 = vmatprep.subr.bf16.mxu1 (!%p189_p3), %v1365_v1 }
   0xc   : > { %1303 = vmatpush3.bf16.msra.mxu0 (!%p189_p3), %v1365_v1  ;;  %1339 = vmatpush3.bf16.msra.mxu1 (!%p189_p3), %v1365_v1 }
   0xe   : > { %s1570_s18 = smov (!%p230_p4, %s1082_s18), 63 }
   0xf   : > { %s1083_s21 = sshll.u32 %s1570_s18, 2 }
  0x10   : > { %s1458_s24 = scalar_lea.vmem %s1561_s0, %s1083_s21  ;;  %s1506_s29 = scalar_lea.vmem %s1564_s3, %s1083_s21 }
  0x11   : > { %v1366_v2 = vld [vmem:[%s1458_s24] sm:$0xff]   ;;  %v1368_v4 = vld [vmem:[%s1458_s24 + $0x8] sm:$0xff]   ;;  %v1370_v6 = vld [vmem:[%s1458_s24 + $0x10] sm:$0xff]  }
  0x12   : > { %v1367_v3 = vld [vmem:[%s1458_s24 + $0x40] sm:$0xff]   ;;  %1304 = vmatprep.mubr.msk.bf16.mxu0 %vm456_vm0, %v1366_v2  ;;  %v1369_v5 = vld [vmem:[%s1458_s24 + $0x48] sm:$0xff]   ;;  %v1371_v7 = vld [vmem:[%s1458_s24 + $0x50] sm:$0xff]  }
  0x13   : > { %1320 = vmatprep.mubr.msk.bf16.mxu1 %vm456_vm0, %v1367_v3  ;;  %1305 = vmatmul.mubr.msk.bf16.vlgmr.msra.gmra.mrb[0].mxu0 %vm456_vm0, %v1368_v4  ;;  %v1372_v8 = vld [vmem:[%s1458_s24 + $0x18] sm:$0xff]   ;;  %v1374_v10 = vld [vmem:[%s1458_s24 + $0x20] sm:$0xff]   ;;  %v1376_v12 = vld [vmem:[%s1458_s24 + $0x28] sm:$0xff]  }
  0x14   : > { %1321 = vmatmul.mubr.msk.bf16.vlgmr.msra.gmra.mrb[0].mxu1 %vm456_vm0, %v1369_v5  ;;  %1308 = vmatprep.mubr.msk.bf16.mxu0 %vm456_vm0, %v1370_v6  ;;  %v1373_v9 = vld [vmem:[%s1458_s24 + $0x58] sm:$0xff]   ;;  %v1375_v11 = vld [vmem:[%s1458_s24 + $0x60] sm:$0xff]   ;;  %v1377_v13 = vld [vmem:[%s1458_s24 + $0x68] sm:$0xff]  }
  0x15   : > { %1324 = vmatprep.mubr.msk.bf16.mxu1 %vm456_vm0, %v1371_v7  ;;  %v1378_v14 = vld [vmem:[%s1458_s24 + $0x30] sm:$0xff]   ;;  %v1380_v16 = vld [vmem:[%s1458_s24 + $0x38] sm:$0xff]  }
  0x16   : > { %v1379_v15 = vld [vmem:[%s1458_s24 + $0x70] sm:$0xff]   ;;  %v1381_v17 = vld [vmem:[%s1458_s24 + $0x78] sm:$0xff]  }
  0x1b   : > { %1309 = vmatmul.mubr.msk.bf16.gmra.mrb[4].mxu0 %vm456_vm0, %v1372_v8 }
  0x1c   : > { %1325 = vmatmul.mubr.msk.bf16.gmra.mrb[4].mxu1 %vm456_vm0, %v1373_v9  ;;  %1312 = vmatprep.mubr.msk.bf16.mxu0 %vm456_vm0, %v1374_v10 }
  0x1d   : > { %1328 = vmatprep.mubr.msk.bf16.mxu1 %vm456_vm0, %v1375_v11 }
  0x23   : > { %1313 = vmatmul.mubr.msk.bf16.gmra.mrb[8].mxu0 %vm456_vm0, %v1376_v12 }
  0x24   : > { %1329 = vmatmul.mubr.msk.bf16.gmra.mrb[8].mxu1 %vm456_vm0, %v1377_v13  ;;  %1316 = vmatprep.mubr.msk.bf16.mxu0 %vm456_vm0, %v1378_v14 }
  0x25   : > { %1332 = vmatprep.mubr.msk.bf16.mxu1 %vm456_vm0, %v1379_v15 }
  0x2b   : > { %1317 = vmatmul.mubr.msk.bf16.gmra.mrb[12].mxu0 %vm456_vm0, %v1380_v16 }
  0x2c   : > { %1333 = vmatmul.mubr.msk.bf16.gmra.mrb[12].mxu1 %vm456_vm0, %v1381_v17 }
  0xe6   : > { %v1306_v18 = vpop.f32.mrb[0].mxu0 }
  0xe7   : > { %v1322_v20 = vpop.f32.mrb[0].mxu1  ;;  %v539_v21 = vpop.f32.mrb[1].mxu0  ;;  %v774_v24 = vadd.f32 %v1306_v18, %v1495_v19 }
  0xe8   : > { %v603_v22 = vpop.f32.mrb[1].mxu1  ;;  %v1307_v23 = vpop.f32.mrb[2].mxu0  ;;  %v790_v28 = vadd.f32 %v1322_v20, %v1495_v19  ;;  %v772_v29 = vadd.f32 %v1495_v19, %v539_v21 }
  0xe9   : > { %v775_v25 = vadd.f32 %v1307_v23, %v1495_v19  ;;  %v1323_v26 = vpop.f32.mrb[2].mxu1  ;;  %v542_v27 = vpop.f32.mrb[3].mxu0  ;;  %v788_v33 = vadd.f32 %v1495_v19, %v603_v22 }
  0xea   : > { %v791_v30 = vadd.f32 %v1323_v26, %v1495_v19  ;;  %v773_v31 = vadd.f32 %v1495_v19, %v542_v27  ;;  %v606_v32 = vpop.f32.mrb[3].mxu1 }
  0xeb   : > { %v1195_v34 = vpack.c.bf16 %v775_v25, %v774_v24  ;;  %v789_v35 = vadd.f32 %v1495_v19, %v606_v32 }
  0xec   : > { %v1235_v36 = vpack.c.bf16 %v791_v30, %v790_v28  ;;  %v1190_v37 = vpack.c.bf16 %v773_v31, %v772_v29 }
  0xed   : > { %1267 = vst [vmem:[%s1506_s29 + $0x8] sm:$0xff] %v1195_v34   ;;  %v1230_v38 = vpack.c.bf16 %v789_v35, %v788_v33 }
  0xee   : > { %1275 = vst [vmem:[%s1506_s29 + $0x48] sm:$0xff] %v1235_v36   ;;  %1191 = vst [vmem:[%s1506_s29] sm:$0xff] %v1190_v37   ;;  %v1310_v39 = vpop.f32.mrb[4].mxu0 }
  0xef   : > { %1274 = vst [vmem:[%s1506_s29 + $0x40] sm:$0xff] %v1230_v38   ;;  %v1326_v40 = vpop.f32.mrb[4].mxu1  ;;  %v555_v41 = vpop.f32.mrb[5].mxu0  ;;  %v778_v44 = vadd.f32 %v1310_v39, %v1495_v19 }
  0xf0   : > { %v619_v42 = vpop.f32.mrb[5].mxu1  ;;  %v1311_v43 = vpop.f32.mrb[6].mxu0  ;;  %v794_v48 = vadd.f32 %v1326_v40, %v1495_v19  ;;  %v776_v49 = vadd.f32 %v1495_v19, %v555_v41 }
  0xf1   : > { %v779_v45 = vadd.f32 %v1311_v43, %v1495_v19  ;;  %v1327_v46 = vpop.f32.mrb[6].mxu1  ;;  %v558_v47 = vpop.f32.mrb[7].mxu0  ;;  %v792_v53 = vadd.f32 %v1495_v19, %v619_v42 }
  0xf2   : > { %v795_v50 = vadd.f32 %v1327_v46, %v1495_v19  ;;  %v777_v51 = vadd.f32 %v1495_v19, %v558_v47  ;;  %v622_v52 = vpop.f32.mrb[7].mxu1 }
  0xf3   : > { %v1205_v54 = vpack.c.bf16 %v779_v45, %v778_v44  ;;  %v793_v55 = vadd.f32 %v1495_v19, %v622_v52 }
  0xf4   : > { %v1245_v56 = vpack.c.bf16 %v795_v50, %v794_v48  ;;  %v1200_v57 = vpack.c.bf16 %v777_v51, %v776_v49 }
  0xf5   : > { %1269 = vst [vmem:[%s1506_s29 + $0x18] sm:$0xff] %v1205_v54   ;;  %v1240_v58 = vpack.c.bf16 %v793_v55, %v792_v53 }
  0xf6   : > { %1277 = vst [vmem:[%s1506_s29 + $0x58] sm:$0xff] %v1245_v56   ;;  %1268 = vst [vmem:[%s1506_s29 + $0x10] sm:$0xff] %v1200_v57   ;;  %v1314_v59 = vpop.f32.mrb[8].mxu0 }
  0xf7   : > { %1276 = vst [vmem:[%s1506_s29 + $0x50] sm:$0xff] %v1240_v58   ;;  %v1330_v60 = vpop.f32.mrb[8].mxu1  ;;  %v571_v61 = vpop.f32.mrb[9].mxu0  ;;  %v782_v0 = vadd.f32 %v1314_v59, %v1495_v19 }
  0xf8   : > { %v635_v62 = vpop.f32.mrb[9].mxu1  ;;  %v1315_v63 = vpop.f32.mrb[10].mxu0  ;;  %v798_v4 = vadd.f32 %v1330_v60, %v1495_v19  ;;  %v780_v5 = vadd.f32 %v1495_v19, %v571_v61 }
  0xf9   : > { %v783_v1 = vadd.f32 %v1315_v63, %v1495_v19  ;;  %v1331_v2 = vpop.f32.mrb[10].mxu1  ;;  %v574_v3 = vpop.f32.mrb[11].mxu0  ;;  %v796_v9 = vadd.f32 %v1495_v19, %v635_v62 }
  0xfa   : > { %v799_v6 = vadd.f32 %v1331_v2, %v1495_v19  ;;  %v781_v7 = vadd.f32 %v1495_v19, %v574_v3  ;;  %v638_v8 = vpop.f32.mrb[11].mxu1 }
  0xfb   : > { %v1215_v10 = vpack.c.bf16 %v783_v1, %v782_v0  ;;  %v797_v11 = vadd.f32 %v1495_v19, %v638_v8 }
  0xfc   : > { %v1255_v12 = vpack.c.bf16 %v799_v6, %v798_v4  ;;  %v1210_v13 = vpack.c.bf16 %v781_v7, %v780_v5 }
  0xfd   : > { %1271 = vst [vmem:[%s1506_s29 + $0x28] sm:$0xff] %v1215_v10   ;;  %v1250_v14 = vpack.c.bf16 %v797_v11, %v796_v9 }
  0xfe   : > { %1279 = vst [vmem:[%s1506_s29 + $0x68] sm:$0xff] %v1255_v12   ;;  %1270 = vst [vmem:[%s1506_s29 + $0x20] sm:$0xff] %v1210_v13   ;;  %v1318_v15 = vpop.f32.mrb[12].mxu0 }
  0xff   : > { %1278 = vst [vmem:[%s1506_s29 + $0x60] sm:$0xff] %v1250_v14   ;;  %v1334_v16 = vpop.f32.mrb[12].mxu1  ;;  %v587_v17 = vpop.f32.mrb[13].mxu0  ;;  %v786_v21 = vadd.f32 %v1318_v15, %v1495_v19 }
 0x100   : > { %v651_v18 = vpop.f32.mrb[13].mxu1  ;;  %v1319_v20 = vpop.f32.mrb[14].mxu0  ;;  %v802_v25 = vadd.f32 %v1334_v16, %v1495_v19  ;;  %v784_v26 = vadd.f32 %v1495_v19, %v587_v17 }
 0x101   : > { %v787_v22 = vadd.f32 %v1319_v20, %v1495_v19  ;;  %v1335_v23 = vpop.f32.mrb[14].mxu1  ;;  %v590_v24 = vpop.f32.mrb[15].mxu0  ;;  %v800_v30 = vadd.f32 %v1495_v19, %v651_v18 }
 0x102   : > { %v803_v27 = vadd.f32 %v1335_v23, %v1495_v19  ;;  %v785_v28 = vadd.f32 %v1495_v19, %v590_v24  ;;  %v654_v29 = vpop.f32.mrb[15].mxu1 }
 0x103   : > { %v1225_v31 = vpack.c.bf16 %v787_v22, %v786_v21  ;;  %v801_v32 = vadd.f32 %v1495_v19, %v654_v29 }
 0x104   : > { %v1265_v33 = vpack.c.bf16 %v803_v27, %v802_v25  ;;  %v1220_v34 = vpack.c.bf16 %v785_v28, %v784_v26 }
 0x105   : > { %1273 = vst [vmem:[%s1506_s29 + $0x38] sm:$0xff] %v1225_v31   ;;  %v1260_v35 = vpack.c.bf16 %v801_v32, %v800_v30 }
 0x106   : > { %1281 = vst [vmem:[%s1506_s29 + $0x78] sm:$0xff] %v1265_v33   ;;  %1272 = vst [vmem:[%s1506_s29 + $0x30] sm:$0xff] %v1220_v34  }
 0x107   : > { %1280 = vst [vmem:[%s1506_s29 + $0x70] sm:$0xff] %v1260_v35  }
 0x108 PF: > { %s13_s14 = sadd.s32 1, %s1404_s14   ;;  %s1565_s12 = smov %s1400_s13 }
 0x109   : > { %p10_p5 = scmp.ge.s32.totalorder %s13_s14, 4   ;;  %s1566_s13 = smov %s1568_s15 }
 0x10b   :  { %12 = sbr.rel (!%p10_p5) target bundleno = 2 (0x2), region = 76 }

// kernel: bottleneck_forward.7
= control target key start
LH: loop header
LB: loop body
LE: loop exit
PB: predicated region body
PF: predicated region fallthrough
CT: control target
= control target key end

     0   :  { %s1756_s15 = smov 0   ;;  %s1758_s16 = smov 0   ;;  %s2000_s0 = inlined_call_operand.vmem [shape: bf16[512,128], index: 0, kind: input, shape index: {}]   ;;  %s2001_s1 = inlined_call_operand.vmem [shape: bf16[128,128], index: 1, kind: input, shape index: {}]   ;;  %s2002_s2 = inlined_call_operand.vmem [shape: f32[1,128], index: 2, kind: input, shape index: {}]   ;;  %s2003_s3 = inlined_call_operand.vmem [shape: bf16[512,128], index: 3, kind: input, shape index: {}]   ;;  %s2004_s4 = inlined_call_operand.vmem [shape: bf16[512,128], index: 4, kind: output, shape index: {}]  }
   0x1   :  { %s1760_s17 = smov 0  }
   0x2 LB: > { %s33_s18 = sadd.s32 1, %s1725_s16  ;;  %p1299_p0 = scmp.ge.s32.totalorder %s1729_s17, 1  ;;  %s1729_s17 = sphi %s1760_s17, %s14_s17   ;;  %s1725_s16 = sphi %s1758_s16, %s2006_s16   ;;  %s1721_s15 = sphi %s1756_s15, %s2005_s15  }
   0x3   : > { %p35_p1 = scmp.ge.s32.totalorder %s33_s18, 2  ;;  %p229_p2 = scmp.lt.s32.totalorder %s1729_s17, 3 }
   0x5   : > { %s2008_s18 = smov (%p35_p1, %s33_s18), 0  ;;  %p230_p3 = pnand %p1299_p0, %p229_p2 }
   0x6   : > { %v1683_v0 = vld [vmem:[%s2001_s1] sm:$0xff] (!%p230_p3)   ;;  %s1300_s21 = sshll.u32 (!%p230_p3), %s1721_s15, 5  ;;  %v1684_v1 = vld [vmem:[%s2001_s1 + $0x8] sm:$0xff] (!%p230_p3)   ;;  %v1685_v2 = vld [vmem:[%s2001_s1 + $0x10] sm:$0xff] (!%p230_p3)  }
   0x7   : > { %233 = sbr.rel (%p230_p3) target bundleno = 288 (0x120), region = 36  ;;  %p281_p4 = scmp.lt.s32.totalorder (!%p230_p3), %s1300_s21, 63  ;;  %1595 = vmatprep.subr.bf16.mxu0 (!%p230_p3), %v1683_v0  ;;  %1643 = vmatprep.subr.bf16.mxu1 (!%p230_p3), %v1683_v0  ;;  %v1686_v3 = vld [vmem:[%s2001_s1 + $0x18] sm:$0xff] (!%p230_p3)   ;;  %v1687_v6 = vld [vmem:[%s2001_s1 + $0x20] sm:$0xff] (!%p230_p3)   ;;  %v1688_v7 = vld [vmem:[%s2001_s1 + $0x28] sm:$0xff] (!%p230_p3)  }
   0x8   : > { %1596 = vmatpush3.bf16.msra.mxu0 (!%p230_p3), %v1683_v0  ;;  %1651 = vmatpush3.bf16.msra.mxu1 (!%p230_p3), %v1683_v0  ;;  %v1689_v8 = vld [vmem:[%s2001_s1 + $0x30] sm:$0xff] (!%p230_p3)   ;;  %v1690_v9 = vld [vmem:[%s2001_s1 + $0x38] sm:$0xff] (!%p230_p3)   ;;  %v1847_v36 = vld [vmem:[%s2002_s2] ss:$0 sm:$0xff] (!%p230_p3) }
   0x9   : > { %1597 = vmatprep.subr.bf16.mxu0 (!%p230_p3), %v1684_v1  ;;  %1644 = vmatprep.subr.bf16.mxu1 (!%p230_p3), %v1684_v1 }
   0xc   : > { %1598 = vmatpush3.bf16.msra.mxu0 (!%p230_p3), %v1684_v1  ;;  %1652 = vmatpush3.bf16.msra.mxu1 (!%p230_p3), %v1684_v1 }
   0xd   : > { %1599 = vmatprep.subr.bf16.mxu0 (!%p230_p3), %v1685_v2  ;;  %1645 = vmatprep.subr.bf16.mxu1 (!%p230_p3), %v1685_v2 }
   0xe   : > { %s2010_s21 = smov (!%p281_p4, %s1300_s21), 63 }
   0xf   : > { %s1783_s26 = sshll.u32 %s2010_s21, 2 }
  0x10   : > { %s1789_s29 = scalar_lea.vmem %s2000_s0, %s1783_s26  ;;  %1600 = vmatpush3.bf16.msra.mxu0 %v1685_v2  ;;  %1653 = vmatpush3.bf16.msra.mxu1 %v1685_v2  ;;  %s1826_s19 = scalar_lea.vmem %s2003_s3, %s1783_s26 }
  0x11   : > { %v1691_v4 = vld [vmem:[%s1789_s29] sm:$0xff]   ;;  %1601 = vmatprep.subr.bf16.mxu0 %v1686_v3  ;;  %1646 = vmatprep.subr.bf16.mxu1 %v1686_v3  ;;  %v1693_v10 = vld [vmem:[%s1789_s29 + $0x8] sm:$0xff]   ;;  %v1695_v12 = vld [vmem:[%s1789_s29 + $0x10] sm:$0xff]   ;;  %s1889_s24 = scalar_lea.vmem %s2004_s4, %s1783_s26 }
  0x12   : > { %v1692_v5 = vld [vmem:[%s1789_s29 + $0x40] sm:$0xff]   ;;  %1611 = vmatprep.mubr.bf16.mxu0 %v1691_v4  ;;  %v1694_v11 = vld [vmem:[%s1789_s29 + $0x48] sm:$0xff]   ;;  %v1696_v13 = vld [vmem:[%s1789_s29 + $0x50] sm:$0xff]  }
  0x13   : > { %1627 = vmatprep.mubr.bf16.mxu1 %v1692_v5  ;;  %v1697_v14 = vld [vmem:[%s1789_s29 + $0x18] sm:$0xff]   ;;  %v1699_v16 = vld [vmem:[%s1789_s29 + $0x20] sm:$0xff]   ;;  %v1701_v18 = vld [vmem:[%s1789_s29 + $0x28] sm:$0xff]  }
  0x14   : > { %1602 = vmatpush3.bf16.msra.mxu0 %v1686_v3  ;;  %1654 = vmatpush3.bf16.msra.mxu1 %v1686_v3  ;;  %v1698_v15 = vld [vmem:[%s1789_s29 + $0x58] sm:$0xff]   ;;  %v1700_v17 = vld [vmem:[%s1789_s29 + $0x60] sm:$0xff]   ;;  %v1702_v19 = vld [vmem:[%s1789_s29 + $0x68] sm:$0xff]  }
  0x15   : > { %1603 = vmatprep.subr.bf16.mxu0 %v1687_v6  ;;  %1647 = vmatprep.subr.bf16.mxu1 %v1687_v6  ;;  %v1703_v20 = vld [vmem:[%s1789_s29 + $0x30] sm:$0xff]   ;;  %v1705_v22 = vld [vmem:[%s1789_s29 + $0x38] sm:$0xff]   ;;  %v1541_v24 = vld [vmem:[%s1826_s19 + $0x8] sm:$0xff]  }
  0x16   : > { %v1704_v21 = vld [vmem:[%s1789_s29 + $0x70] sm:$0xff]   ;;  %v1706_v23 = vld [vmem:[%s1789_s29 + $0x78] sm:$0xff]   ;;  %v1549_v25 = vld [vmem:[%s1826_s19 + $0x48] sm:$0xff]   ;;  %v1403_v32 = vunpack.c.l.bf16 %v1541_v24  ;;  %v1404_v37 = vunpack.c.h.bf16 %v1541_v24 }
  0x17   : > { %v1398_v26 = vld [vmem:[%s1826_s19] sm:$0xff]   ;;  %v1833_v28 = vld [vmem:[%s1826_s19 + $0x18] sm:$0xff]   ;;  %v1839_v30 = vld [vmem:[%s1826_s19 + $0x10] sm:$0xff]   ;;  %v1435_v33 = vunpack.c.l.bf16 %v1549_v25  ;;  %v1436_v38 = vunpack.c.h.bf16 %v1549_v25 }
  0x18   : > { %1604 = vmatpush3.bf16.msra.mxu0 %v1687_v6  ;;  %1655 = vmatpush3.bf16.msra.mxu1 %v1687_v6  ;;  %v1548_v27 = vld [vmem:[%s1826_s19 + $0x40] sm:$0xff]   ;;  %v1836_v29 = vld [vmem:[%s1826_s19 + $0x58] sm:$0xff]   ;;  %v1842_v31 = vld [vmem:[%s1826_s19 + $0x50] sm:$0xff]   ;;  %v1399_v34 = vunpack.c.l.bf16 %v1398_v26  ;;  %v1400_v39 = vunpack.c.h.bf16 %v1398_v26  ;;  %v1411_v43 = vunpack.c.l.bf16 %v1833_v28  ;;  %v1407_v45 = vunpack.c.l.bf16 %v1839_v30 }
  0x19   : > { %1605 = vmatprep.subr.bf16.mxu0 %v1688_v7  ;;  %1648 = vmatprep.subr.bf16.mxu1 %v1688_v7  ;;  %v1431_v35 = vunpack.c.l.bf16 %v1548_v27  ;;  %v1432_v40 = vunpack.c.h.bf16 %v1548_v27  ;;  %v1850_v41 = vld [vmem:[%s1826_s19 + $0x28] sm:$0xff]   ;;  %v1443_v44 = vunpack.c.l.bf16 %v1836_v29  ;;  %v1439_v46 = vunpack.c.l.bf16 %v1842_v31  ;;  %v1860_v47 = vld [vmem:[%s1826_s19 + $0x20] sm:$0xff]  }
  0x1a   : > { %v1853_v42 = vld [vmem:[%s1826_s19 + $0x68] sm:$0xff]   ;;  %v1863_v48 = vld [vmem:[%s1826_s19 + $0x60] sm:$0xff]   ;;  %v1412_v51 = vunpack.c.h.bf16 %v1833_v28  ;;  %v1444_v52 = vunpack.c.h.bf16 %v1836_v29  ;;  %v1408_v53 = vunpack.c.h.bf16 %v1839_v30  ;;  %v1440_v54 = vunpack.c.h.bf16 %v1842_v31 }
  0x1b   : > { %v1419_v59 = vunpack.c.l.bf16 %v1850_v41  ;;  %v1451_v60 = vunpack.c.l.bf16 %v1853_v42  ;;  %v1415_v1 = vunpack.c.l.bf16 %v1860_v47  ;;  %v1447_v2 = vunpack.c.l.bf16 %v1863_v48 }
  0x1c   : > { %1606 = vmatpush3.bf16.msra.mxu0 %v1688_v7  ;;  %1656 = vmatpush3.bf16.msra.mxu1 %v1688_v7 }
  0x1d   : > { %1607 = vmatprep.subr.bf16.mxu0 %v1689_v8  ;;  %1649 = vmatprep.subr.bf16.mxu1 %v1689_v8 }
  0x20   : > { %1608 = vmatpush3.bf16.msra.mxu0 %v1689_v8  ;;  %1657 = vmatpush3.bf16.msra.mxu1 %v1689_v8 }
  0x21   : > { %1609 = vmatprep.subr.bf16.mxu0 %v1690_v9  ;;  %1650 = vmatprep.subr.bf16.mxu1 %v1690_v9 }
  0x24   : > { %1610 = vmatpush3.bf16.msra.mxu0 %v1690_v9  ;;  %1658 = vmatpush3.bf16.msra.mxu1 %v1690_v9 }
  0x27   : > { %1612 = vmatmul.mubr.bf16.vlgmr.msra.gmra.mrb[0].mxu0 %v1693_v10  ;;  %1628 = vmatmul.mubr.bf16.vlgmr.msra.gmra.mrb[0].mxu1 %v1694_v11 }
  0x28   : > { %1615 = vmatprep.mubr.bf16.mxu0 %v1695_v12  ;;  %1631 = vmatprep.mubr.bf16.mxu1 %v1696_v13 }
  0x2f   : > { %1616 = vmatmul.mubr.bf16.gmra.mrb[4].mxu0 %v1697_v14  ;;  %1632 = vmatmul.mubr.bf16.gmra.mrb[4].mxu1 %v1698_v15  ;;  %v1420_v15 = vunpack.c.h.bf16 %v1850_v41 }
  0x30   : > { %1619 = vmatprep.mubr.bf16.mxu0 %v1699_v16  ;;  %1635 = vmatprep.mubr.bf16.mxu1 %v1700_v17  ;;  %v1452_v16 = vunpack.c.h.bf16 %v1853_v42 }
  0x37   : > { %1620 = vmatmul.mubr.bf16.gmra.mrb[8].mxu0 %v1701_v18  ;;  %1636 = vmatmul.mubr.bf16.gmra.mrb[8].mxu1 %v1702_v19  ;;  %v1416_v19 = vunpack.c.h.bf16 %v1860_v47 }
  0x38   : > { %1623 = vmatprep.mubr.bf16.mxu0 %v1703_v20  ;;  %1639 = vmatprep.mubr.bf16.mxu1 %v1704_v21  ;;  %v1448_v20 = vunpack.c.h.bf16 %v1863_v48 }
  0x3f   : > { %1624 = vmatmul.mubr.bf16.gmra.mrb[12].mxu0 %v1705_v22  ;;  %1640 = vmatmul.mubr.bf16.gmra.mrb[12].mxu1 %v1706_v23 }
  0xfa   : > { %v1613_v49 = vpop.f32.mrb[0].mxu0  ;;  %v1629_v50 = vpop.f32.mrb[0].mxu1 }
  0xfb   : > { %v849_v55 = vadd.f32 %v1613_v49, %v1847_v36  ;;  %v865_v56 = vadd.f32 %v1629_v50, %v1847_v36  ;;  %v614_v57 = vpop.f32.mrb[1].mxu0  ;;  %v678_v58 = vpop.f32.mrb[1].mxu1 }
  0xfc   : > { %v847_v61 = vadd.f32 %v1847_v36, %v614_v57  ;;  %v863_v62 = vadd.f32 %v1847_v36, %v678_v58  ;;  %v1614_v63 = vpop.f32.mrb[2].mxu0  ;;  %v1630_v0 = vpop.f32.mrb[2].mxu1 }
  0xfd   : > { %v945_v3 = vadd.f32 %v1403_v32, %v849_v55  ;;  %v961_v4 = vadd.f32 %v1435_v33, %v865_v56  ;;  %v850_v5 = vadd.f32 %v1614_v63, %v1847_v36  ;;  %v866_v6 = vadd.f32 %v1630_v0, %v1847_v36  ;;  %v617_v7 = vpop.f32.mrb[3].mxu0  ;;  %v681_v8 = vpop.f32.mrb[3].mxu1  ;;  %v1899_v63 = vld [vmem:[%s1826_s19 + $0x78] sm:$0xff]  }
  0xfe   : > { %v943_v9 = vadd.f32 %v1399_v34, %v847_v61  ;;  %v959_v10 = vadd.f32 %v1431_v35, %v863_v62  ;;  %v848_v11 = vadd.f32 %v1847_v36, %v617_v7  ;;  %v864_v12 = vadd.f32 %v1847_v36, %v681_v8  ;;  %v1896_v62 = vld [vmem:[%s1826_s19 + $0x38] sm:$0xff]   ;;  %v1910_v8 = vld [vmem:[%s1826_s19 + $0x30] sm:$0xff]  }
  0xff   : > { %v946_v13 = vadd.f32 %v1404_v37, %v850_v5  ;;  %v962_v14 = vadd.f32 %v1436_v38, %v866_v6  ;;  %v977_v21 = vmax.f32 %v945_v3, 0.0  ;;  %v993_v22 = vmax.f32 %v961_v4, 0.0 }
 0x100   : > { %v944_v17 = vadd.f32 %v1400_v39, %v848_v11  ;;  %v960_v18 = vadd.f32 %v1432_v40, %v864_v12  ;;  %v975_v25 = vmax.f32 %v943_v9, 0.0  ;;  %v991_v26 = vmax.f32 %v959_v10, 0.0  ;;  %v1913_v9 = vld [vmem:[%s1826_s19 + $0x70] sm:$0xff]  }
 0x101   : > { %v978_v23 = vmax.f32 %v946_v13, 0.0  ;;  %v994_v24 = vmax.f32 %v962_v14, 0.0  ;;  %v1427_v14 = vunpack.c.l.bf16 %v1896_v62 }
 0x102   : > { %v976_v27 = vmax.f32 %v944_v17, 0.0  ;;  %v992_v32 = vmax.f32 %v960_v18, 0.0  ;;  %v1617_v33 = vpop.f32.mrb[4].mxu0  ;;  %v1633_v34 = vpop.f32.mrb[4].mxu1  ;;  %v1459_v17 = vunpack.c.l.bf16 %v1899_v63  ;;  %v1423_v18 = vunpack.c.l.bf16 %v1910_v8 }
 0x103   : > { %v1469_v35 = vpack.c.bf16 %v978_v23, %v977_v21  ;;  %v1509_v37 = vpack.c.bf16 %v994_v24, %v993_v22  ;;  %v853_v38 = vadd.f32 %v1617_v33, %v1847_v36  ;;  %v869_v39 = vadd.f32 %v1633_v34, %v1847_v36  ;;  %v630_v40 = vpop.f32.mrb[5].mxu0  ;;  %v694_v49 = vpop.f32.mrb[5].mxu1 }
 0x104   : > { %v1464_v50 = vpack.c.bf16 %v976_v27, %v975_v25  ;;  %v1504_v55 = vpack.c.bf16 %v992_v32, %v991_v26  ;;  %v851_v56 = vadd.f32 %v1847_v36, %v630_v40  ;;  %v867_v57 = vadd.f32 %v1847_v36, %v694_v49  ;;  %v1618_v58 = vpop.f32.mrb[6].mxu0  ;;  %v1634_v61 = vpop.f32.mrb[6].mxu1 }
 0x105   : > { %1556 = vst [vmem:[%s1889_s24 + $0x8] sm:$0xff] %v1469_v35   ;;  %1564 = vst [vmem:[%s1889_s24 + $0x48] sm:$0xff] %v1509_v37   ;;  %v949_v0 = vadd.f32 %v1411_v43, %v853_v38  ;;  %v965_v3 = vadd.f32 %v1443_v44, %v869_v39  ;;  %v854_v4 = vadd.f32 %v1618_v58, %v1847_v36  ;;  %v633_v6 = vpop.f32.mrb[7].mxu0  ;;  %v697_v7 = vpop.f32.mrb[7].mxu1  ;;  %v1455_v21 = vunpack.c.l.bf16 %v1913_v9 }
 0x106   : > { %v870_v5 = vadd.f32 %v1634_v61, %v1847_v36  ;;  %1465 = vst [vmem:[%s1889_s24] sm:$0xff] %v1464_v50   ;;  %1563 = vst [vmem:[%s1889_s24 + $0x40] sm:$0xff] %v1504_v55   ;;  %v947_v10 = vadd.f32 %v1407_v45, %v851_v56  ;;  %v963_v43 = vadd.f32 %v1439_v46, %v867_v57 }
 0x107   : > { %v852_v44 = vadd.f32 %v1847_v36, %v633_v6  ;;  %v868_v11 = vadd.f32 %v1847_v36, %v697_v7  ;;  %v950_v12 = vadd.f32 %v1412_v51, %v854_v4  ;;  %v981_v22 = vmax.f32 %v949_v0, 0.0 }
 0x108   : > { %v966_v13 = vadd.f32 %v1444_v52, %v870_v5  ;;  %v997_v28 = vmax.f32 %v965_v3, 0.0  ;;  %v979_v29 = vmax.f32 %v947_v10, 0.0  ;;  %v995_v52 = vmax.f32 %v963_v43, 0.0 }
 0x109   : > { %v948_v45 = vadd.f32 %v1408_v53, %v852_v44  ;;  %v964_v46 = vadd.f32 %v1440_v54, %v868_v11  ;;  %v982_v51 = vmax.f32 %v950_v12, 0.0  ;;  %v1428_v5 = vunpack.c.h.bf16 %v1896_v62 }
 0x10a   : > { %v998_v23 = vmax.f32 %v966_v13, 0.0  ;;  %v1621_v26 = vpop.f32.mrb[8].mxu0  ;;  %v1637_v30 = vpop.f32.mrb[8].mxu1  ;;  %v1460_v6 = vunpack.c.h.bf16 %v1899_v63  ;;  %v1424_v7 = vunpack.c.h.bf16 %v1910_v8  ;;  %v1456_v10 = vunpack.c.h.bf16 %v1913_v9 }
 0x10b   : > { %v980_v24 = vmax.f32 %v948_v45, 0.0  ;;  %v996_v25 = vmax.f32 %v964_v46, 0.0  ;;  %v1479_v53 = vpack.c.bf16 %v982_v51, %v981_v22  ;;  %v857_v31 = vadd.f32 %v1621_v26, %v1847_v36  ;;  %v646_v32 = vpop.f32.mrb[9].mxu0  ;;  %v710_v33 = vpop.f32.mrb[9].mxu1 }
 0x10c   : > { %v1519_v27 = vpack.c.bf16 %v998_v23, %v997_v28  ;;  %v873_v54 = vadd.f32 %v1637_v30, %v1847_v36  ;;  %v855_v37 = vadd.f32 %v1847_v36, %v646_v32  ;;  %v871_v38 = vadd.f32 %v1847_v36, %v710_v33  ;;  %v1622_v39 = vpop.f32.mrb[10].mxu0  ;;  %v1638_v40 = vpop.f32.mrb[10].mxu1 }
 0x10d   : > { %v1474_v34 = vpack.c.bf16 %v980_v24, %v979_v29  ;;  %v1514_v35 = vpack.c.bf16 %v996_v25, %v995_v52  ;;  %1558 = vst [vmem:[%s1889_s24 + $0x18] sm:$0xff] %v1479_v53   ;;  %v953_v49 = vadd.f32 %v1419_v59, %v857_v31  ;;  %v858_v55 = vadd.f32 %v1622_v39, %v1847_v36  ;;  %v649_v57 = vpop.f32.mrb[11].mxu0  ;;  %v713_v58 = vpop.f32.mrb[11].mxu1 }
 0x10e   : > { %1566 = vst [vmem:[%s1889_s24 + $0x58] sm:$0xff] %v1519_v27   ;;  %v969_v50 = vadd.f32 %v1451_v60, %v873_v54  ;;  %v874_v56 = vadd.f32 %v1638_v40, %v1847_v36  ;;  %v951_v61 = vadd.f32 %v1415_v1, %v855_v37  ;;  %v967_v0 = vadd.f32 %v1447_v2, %v871_v38 }
 0x10f   : > { %1557 = vst [vmem:[%s1889_s24 + $0x10] sm:$0xff] %v1474_v34   ;;  %1565 = vst [vmem:[%s1889_s24 + $0x50] sm:$0xff] %v1514_v35   ;;  %v856_v3 = vadd.f32 %v1847_v36, %v649_v57  ;;  %v872_v59 = vadd.f32 %v1847_v36, %v713_v58  ;;  %v954_v60 = vadd.f32 %v1420_v15, %v858_v55  ;;  %v985_v43 = vmax.f32 %v953_v49, 0.0 }
 0x110   : > { %v970_v4 = vadd.f32 %v1452_v16, %v874_v56  ;;  %v1001_v41 = vmax.f32 %v969_v50, 0.0  ;;  %v983_v42 = vmax.f32 %v951_v61, 0.0  ;;  %v999_v16 = vmax.f32 %v967_v0, 0.0 }
 0x111   : > { %v952_v1 = vadd.f32 %v1416_v19, %v856_v3  ;;  %v968_v2 = vadd.f32 %v1448_v20, %v872_v59  ;;  %v986_v15 = vmax.f32 %v954_v60, 0.0 }
 0x112   : > { %v1002_v44 = vmax.f32 %v970_v4, 0.0  ;;  %v1625_v13 = vpop.f32.mrb[12].mxu0  ;;  %v1641_v47 = vpop.f32.mrb[12].mxu1 }
 0x113   : > { %v984_v11 = vmax.f32 %v952_v1, 0.0  ;;  %v1000_v12 = vmax.f32 %v968_v2, 0.0  ;;  %v1489_v19 = vpack.c.bf16 %v986_v15, %v985_v43  ;;  %v861_v48 = vadd.f32 %v1625_v13, %v1847_v36  ;;  %v662_v46 = vpop.f32.mrb[13].mxu0  ;;  %v726_v22 = vpop.f32.mrb[13].mxu1 }
 0x114   : > { %v1529_v45 = vpack.c.bf16 %v1002_v44, %v1001_v41  ;;  %v877_v20 = vadd.f32 %v1641_v47, %v1847_v36  ;;  %v859_v23 = vadd.f32 %v1847_v36, %v662_v46  ;;  %v875_v29 = vadd.f32 %v1847_v36, %v726_v22  ;;  %v1626_v52 = vpop.f32.mrb[14].mxu0  ;;  %v1642_v24 = vpop.f32.mrb[14].mxu1 }
 0x115   : > { %v1484_v28 = vpack.c.bf16 %v984_v11, %v983_v42  ;;  %v1524_v51 = vpack.c.bf16 %v1000_v12, %v999_v16  ;;  %1560 = vst [vmem:[%s1889_s24 + $0x28] sm:$0xff] %v1489_v19   ;;  %v957_v25 = vadd.f32 %v1427_v14, %v861_v48  ;;  %v862_v30 = vadd.f32 %v1626_v52, %v1847_v36  ;;  %v665_v27 = vpop.f32.mrb[15].mxu0  ;;  %v729_v31 = vpop.f32.mrb[15].mxu1 }
 0x116   : > { %1568 = vst [vmem:[%s1889_s24 + $0x68] sm:$0xff] %v1529_v45   ;;  %v973_v26 = vadd.f32 %v1459_v17, %v877_v20  ;;  %v878_v53 = vadd.f32 %v1642_v24, %v1847_v36  ;;  %v955_v54 = vadd.f32 %v1423_v18, %v859_v23  ;;  %v971_v32 = vadd.f32 %v1455_v21, %v875_v29 }
 0x117   : > { %1559 = vst [vmem:[%s1889_s24 + $0x20] sm:$0xff] %v1484_v28   ;;  %1567 = vst [vmem:[%s1889_s24 + $0x60] sm:$0xff] %v1524_v51   ;;  %v860_v62 = vadd.f32 %v1847_v36, %v665_v27  ;;  %v876_v14 = vadd.f32 %v1847_v36, %v729_v31  ;;  %v958_v63 = vadd.f32 %v1428_v5, %v862_v30  ;;  %v989_v35 = vmax.f32 %v957_v25, 0.0 }
 0x118   : > { %v974_v17 = vadd.f32 %v1460_v6, %v878_v53  ;;  %v1005_v37 = vmax.f32 %v973_v26, 0.0  ;;  %v987_v18 = vmax.f32 %v955_v54, 0.0  ;;  %v1003_v39 = vmax.f32 %v971_v32, 0.0 }
 0x119   : > { %v956_v33 = vadd.f32 %v1424_v7, %v860_v62  ;;  %v972_v34 = vadd.f32 %v1456_v10, %v876_v14  ;;  %v990_v38 = vmax.f32 %v958_v63, 0.0 }
 0x11a   : > { %v1006_v8 = vmax.f32 %v974_v17, 0.0 }
 0x11b   : > { %v988_v9 = vmax.f32 %v956_v33, 0.0  ;;  %v1004_v21 = vmax.f32 %v972_v34, 0.0  ;;  %v1499_v40 = vpack.c.bf16 %v990_v38, %v989_v35 }
 0x11c   : > { %v1539_v49 = vpack.c.bf16 %v1006_v8, %v1005_v37 }
 0x11d   : > { %v1494_v50 = vpack.c.bf16 %v988_v9, %v987_v18  ;;  %v1534_v36 = vpack.c.bf16 %v1004_v21, %v1003_v39  ;;  %1562 = vst [vmem:[%s1889_s24 + $0x38] sm:$0xff] %v1499_v40  }
 0x11e   : > { %1570 = vst [vmem:[%s1889_s24 + $0x78] sm:$0xff] %v1539_v49  }
 0x11f   : > { %1561 = vst [vmem:[%s1889_s24 + $0x30] sm:$0xff] %v1494_v50   ;;  %1569 = vst [vmem:[%s1889_s24 + $0x70] sm:$0xff] %v1534_v36  }
 0x120 PF: > { %s14_s17 = sadd.s32 1, %s1729_s17   ;;  %s2005_s15 = smov %s1725_s16 }
 0x121   : > { %p11_p5 = scmp.ge.s32.totalorder %s14_s17, 4   ;;  %s2006_s16 = smov %s2008_s18 }
 0x123   :  { %13 = sbr.rel (!%p11_p5) target bundleno = 2 (0x2), region = 83 }

// kernel: bottleneck_forward.5
= control target key start
LH: loop header
LB: loop body
LE: loop exit
PB: predicated region body
PF: predicated region fallthrough
CT: control target
= control target key end

     0   :  { %s6451_s15 = smov 0   ;;  %s6453_s16 = smov 0   ;;  %s7293_s0 = inlined_call_operand.vmem [shape: bf16[2,18,18,128], index: 0, kind: input, shape index: {}, may-alias: {0,1}]   ;;  %s7294_s1 = inlined_call_operand.vmem [shape: bf16[2,18,18,128], index: 1, kind: input, shape index: {}, may-alias: {0,1}]   ;;  %s7295_s2 = inlined_call_operand.vmem [shape: bf16[9,128,128], index: 2, kind: input, shape index: {}]   ;;  %s7296_s3 = inlined_call_operand.vmem [shape: f32[1,128], index: 3, kind: input, shape index: {}]   ;;  %s7297_s4 = inlined_call_operand.vmem [shape: bf16[2,256,128], index: 4, kind: output, shape index: {}]  }
   0x1   :  { %s6455_s17 = smov 0  }
   0x2 LB: > { %s40_s18 = sadd.s32 1, %s6420_s16  ;;  %p4901_p0 = scmp.ge.s32.totalorder %s6424_s17, 1  ;;  %s6424_s17 = sphi %s6455_s17, %s14_s17   ;;  %s6420_s16 = sphi %s6453_s16, %s7303_s16   ;;  %s6416_s15 = sphi %s6451_s15, %s7302_s15  }
   0x3   : > { %p42_p1 = scmp.ge.s32.totalorder %s40_s18, 2  ;;  %p270_p2 = scmp.lt.s32.totalorder %s6424_s17, 3 }
   0x5   : > { %s7305_s18 = smov (%p42_p1, %s40_s18), 0  ;;  %p271_p3 = pnand %p4901_p0, %p270_p2 }
   0x6   : > { %v6290_v0 = vld [vmem:[%s7295_s2] sm:$0xff] (!%p271_p3)   ;;  %p348_p4 = scmp.lt.s32.totalorder (!%p271_p3), %s6416_s15, 1  ;;  %v6292_v2 = vld [vmem:[%s7295_s2 + $0x8] sm:$0xff] (!%p271_p3)   ;;  %v6294_v4 = vld [vmem:[%s7295_s2 + $0x10] sm:$0xff] (!%p271_p3)   ;;  %vm1718_vm0 = vsmask.f32 (!%p271_p3), 3328 }
   0x7   : > { %274 = sbr.rel (%p271_p3) target bundleno = 550 (0x226), region = 36  ;;  %v6291_v1 = vld [vmem:[%s7295_s2 + $0x100] sm:$0xff] (!%p271_p3)   ;;  %5559 = vmatprep.subr.bf16.mxu1 (!%p271_p3), %v6290_v0  ;;  %v6293_v3 = vld [vmem:[%s7295_s2 + $0x108] sm:$0xff] (!%p271_p3)   ;;  %v6295_v5 = vld [vmem:[%s7295_s2 + $0x110] sm:$0xff] (!%p271_p3)   ;;  %vm1719_vm1 = vsmask.f32 (!%p271_p3), 7440 }
   0x8   : > { %5751 = vmatprep.subr.bf16.mxu0 (!%p271_p3), %v6291_v1  ;;  %5560 = vmatpush3.bf16.msra.mxu1 (!%p271_p3), %v6290_v0  ;;  %v6296_v6 = vld [vmem:[%s7295_s2 + $0x18] sm:$0xff] (!%p271_p3)   ;;  %v6298_v8 = vld [vmem:[%s7295_s2 + $0x20] sm:$0xff] (!%p271_p3)   ;;  %v6300_v10 = vld [vmem:[%s7295_s2 + $0x28] sm:$0xff] (!%p271_p3)   ;;  %vm3299_vm3 = vcmask (!%p271_p3), 1042432   ;;  %vm3300_vm4 = vcmask (!%p271_p3), 1046532  }
   0x9   : > { %5752 = vmatpush3.bf16.msra.mxu0 (!%p271_p3), %v6291_v1  ;;  %5561 = vmatprep.subr.bf16.mxu1 (!%p271_p3), %v6292_v2  ;;  %v6297_v7 = vld [vmem:[%s7295_s2 + $0x118] sm:$0xff] (!%p271_p3)   ;;  %v6299_v9 = vld [vmem:[%s7295_s2 + $0x120] sm:$0xff] (!%p271_p3)   ;;  %v6301_v14 = vld [vmem:[%s7295_s2 + $0x128] sm:$0xff] (!%p271_p3)  }
   0xa   : > { %5753 = vmatprep.subr.bf16.mxu0 (!%p271_p3), %v6293_v3  ;;  %v6302_v17 = vld [vmem:[%s7295_s2 + $0x30] sm:$0xff] (!%p271_p3)   ;;  %v6304_v21 = vld [vmem:[%s7295_s2 + $0x38] sm:$0xff] (!%p271_p3)   ;;  %v6308_v33 = vld [vmem:[%s7295_s2 + $0xc0] sm:$0xff] (!%p271_p3)  }
   0xb   : > { %v6303_v18 = vld [vmem:[%s7295_s2 + $0x130] sm:$0xff] (!%p271_p3)   ;;  %v6305_v22 = vld [vmem:[%s7295_s2 + $0x138] sm:$0xff] (!%p271_p3)   ;;  %v6542_v36 = vld [vmem:[%s7295_s2 + $0x1c0] sm:$0xff] (!%p271_p3)  }
   0xc   : > { %5562 = vmatpush3.bf16.msra.mxu1 (!%p271_p3), %v6292_v2  ;;  %v6313_v52 = vld [vmem:[%s7295_s2 + $0xc8] sm:$0xff] (!%p271_p3)   ;;  %vm6551_vm2 = vmor (!%p271_p3), %vm1718_vm0, %vm1719_vm1  ;;  %v6378_v53 = vld [vmem:[%s7295_s2 + $0x230] sm:$0xff] (!%p271_p3)  }
   0xd   : > { %5754 = vmatpush3.bf16.msra.mxu0 (!%p271_p3), %v6293_v3  ;;  %5563 = vmatprep.subr.bf16.mxu1 (!%p271_p3), %v6294_v4  ;;  %vm6914_vm5 = vmor (!%p271_p3), %vm3299_vm3, %vm3300_vm4 }
   0xe   : > { %s7307_s15 = smov (!%p348_p4, %s6416_s15), 1  ;;  %5755 = vmatprep.subr.bf16.mxu0 %v6295_v5 }
   0xf   : > { %s6263_s9 = smul.u32 216, %s7307_s15  ;;  %s5215_s13 = sshll.u32 %s7307_s15, 7 }
  0x10   : > { %5564 = vmatpush3.bf16.msra.mxu1 %v6294_v4  ;;  %s7234_s21 = scalar_lea.vmem %s7297_s4, %s5215_s13 }
  0x11   : > { %5756 = vmatpush3.bf16.msra.mxu0 %v6295_v5  ;;  %5565 = vmatprep.subr.bf16.mxu1 %v6296_v6  ;;  %s6507_s20 = scalar_lea.vmem %s7293_s0, %s6263_s9  ;;  %s6709_s27 = sadd.s32 192, %s6263_s9 }
  0x12   : > { %5757 = vmatprep.subr.bf16.mxu0 %v6297_v7  ;;  %v446_v11 = vld [vmem:[%s6507_s20] sm:$0xff]   ;;  %v449_v12 = vld [vmem:[%s6507_s20 + $0xc] sm:$0xff]   ;;  %v451_v13 = vld [vmem:[%s6507_s20 + $0x14] sm:$0x1]  ;;  %s6746_s12 = scalar_lea.vmem %s7294_s1, %s6709_s27 }
  0x13   : > { %494 = vst [vmem:[#allocation2] sm:$0xff] %v446_v11   ;;  %497 = vst [vmem:[#allocation2 + $0xc] sm:$0xff] %v449_v12   ;;  %v452_v15 = vld [vmem:[%s6507_s20 + $0x18] sm:$0xff]   ;;  %v454_v16 = vld [vmem:[%s6507_s20 + $0x20] sm:$0x1] }
  0x14   : > { %5566 = vmatpush3.bf16.msra.mxu1 %v6296_v6  ;;  %499 = vst [vmem:[#allocation2 + $0x14] sm:$0x1] %v451_v13  ;;  %500 = vst [vmem:[#allocation2 + $0x18] sm:$0xff] %v452_v15   ;;  %v455_v19 = vld [vmem:[%s6507_s20 + $0x24] sm:$0xff]   ;;  %v457_v20 = vld [vmem:[%s6507_s20 + $0x2c] sm:$0x1] }
  0x15   : > { %5758 = vmatpush3.bf16.msra.mxu0 %v6297_v7  ;;  %5567 = vmatprep.subr.bf16.mxu1 %v6298_v8  ;;  %502 = vst [vmem:[#allocation2 + $0x20] sm:$0x1] %v454_v16  ;;  %503 = vst [vmem:[#allocation2 + $0x24] sm:$0xff] %v455_v19   ;;  %v458_v23 = vld [vmem:[%s6507_s20 + $0x30] sm:$0xff]   ;;  %v460_v24 = vld [vmem:[%s6507_s20 + $0x38] sm:$0x1] }
  0x16   : > { %5759 = vmatprep.subr.bf16.mxu0 %v6299_v9  ;;  %505 = vst [vmem:[#allocation2 + $0x2c] sm:$0x1] %v457_v20  ;;  %506 = vst [vmem:[#allocation2 + $0x30] sm:$0xff] %v458_v23  }
  0x17   : > { %508 = vst [vmem:[#allocation2 + $0x38] sm:$0x1] %v460_v24 }
  0x18   : > { %5568 = vmatpush3.bf16.msra.mxu1 %v6298_v8 }
  0x19   : > { %5760 = vmatpush3.bf16.msra.mxu0 %v6299_v9  ;;  %5569 = vmatprep.subr.bf16.mxu1 %v6300_v10 }
  0x1a   : > { %5761 = vmatprep.subr.bf16.mxu0 %v6301_v14  ;;  %v6306_v25 = vld [vmem:[#allocation2] sm:$0xff]   ;;  %v1667_v26 = vld [vmem:[#allocation2 + $0xc] sm:$0xf]  ;;  %v1668_v27 = vld [vmem:[#allocation2 + $0x10] sm:$0xf] }
  0x1b   : > { %v1669_v28 = vld [vmem:[#allocation2 + $0x14] sm:$0x1]  ;;  %5575 = vmatprep.mubr.bf16.mxu1 %v6306_v25  ;;  %v1746_v29 = vshrl.u32 %v1667_v26, 16  ;;  %v1749_v30 = vshll.u32 %v1667_v26, 16  ;;  %v1755_v31 = vshll.u32 %v1668_v27, 16  ;;  %v1759_v32 = vshrl.u32 %v1668_v27, 16 }
  0x1c   : > { %5570 = vmatpush3.bf16.msra.mxu1 %v6300_v10  ;;  %v1765_v34 = vshll.u32 %v1669_v28, 16  ;;  %v1670_v35 = vld [vmem:[#allocation2 + $0x18] sm:$0xf]  ;;  %v6544_v41 = vld [vmem:[#allocation2 + $0xc] sm:$0xff]   ;;  %v1671_v42 = vld [vmem:[#allocation2 + $0x1c] sm:$0xf] }
  0x1d   : > { %5762 = vmatpush3.bf16.msra.mxu0 %v6301_v14  ;;  %5571 = vmatprep.subr.bf16.mxu1 %v6302_v17  ;;  %v1748_v37 = vrot.slane %v1746_v29, 4  ;;  %v1751_v38 = vrot.slane %v1749_v30, 5  ;;  %v1757_v39 = vrot.slane %v1755_v31, 5  ;;  %v1761_v40 = vrot.slane %v1759_v32, 4  ;;  %v1672_v44 = vld [vmem:[#allocation2 + $0x20] sm:$0x1] }
  0x1e   : > { %5763 = vmatprep.subr.bf16.mxu0 %v6303_v18  ;;  %v1767_v43 = vrot.slane %v1765_v34, 5  ;;  %v1770_v45 = vshrl.u32 %v1670_v35, 16  ;;  %v1773_v46 = vshll.u32 %v1670_v35, 16  ;;  %v1779_v47 = vshll.u32 %v1671_v42, 16  ;;  %v6555_v57 = vld [vmem:[#allocation2 + $0x18] sm:$0xff]   ;;  %v6578_v34 = vld [vmem:[#allocation2 + $0x30] sm:$0xff]  }
  0x1f   : > { %v1752_v48 = vor.u32 %v1751_v38, %v1748_v37  ;;  %v1762_v49 = vor.u32 %v1761_v40, %v1757_v39  ;;  %v1783_v50 = vshrl.u32 %v1671_v42, 16  ;;  %v1789_v51 = vshll.u32 %v1672_v44, 16  ;;  %v1673_v58 = vld [vmem:[#allocation2 + $0x24] sm:$0xf]  ;;  %v1674_v63 = vld [vmem:[#allocation2 + $0x28] sm:$0xf] }
  0x20   : > { %5572 = vmatpush3.bf16.msra.mxu1 %v6302_v17  ;;  %v1772_v54 = vrot.slane %v1770_v45, 4  ;;  %v1775_v55 = vrot.slane %v1773_v46, 5  ;;  %v1781_v56 = vrot.slane %v1779_v47, 5  ;;  %v1675_v1 = vld [vmem:[#allocation2 + $0x2c] sm:$0x1]  ;;  %v1794_v2 = vshrl.u32 %v1673_v58, 16 }
  0x21   : > { %5764 = vmatpush3.bf16.msra.mxu0 %v6303_v18  ;;  %5573 = vmatprep.subr.bf16.mxu1 %v6304_v21  ;;  %v1753_v59 = vrot.slane %v1752_v48, 4  ;;  %v1763_v60 = vrot.slane %v1762_v49, 4  ;;  %v1785_v61 = vrot.slane %v1783_v50, 4  ;;  %v1791_v62 = vrot.slane %v1789_v51, 5  ;;  %v1676_v13 = vld [vmem:[#allocation2 + $0x30] sm:$0xf] }
  0x22   : > { %5765 = vmatprep.subr.bf16.mxu0 %v6305_v22  ;;  %v1776_v0 = vor.u32 %v1775_v55, %v1772_v54  ;;  %v1797_v3 = vshll.u32 %v1673_v58, 16  ;;  %v1803_v4 = vshll.u32 %v1674_v63, 16  ;;  %v1807_v8 = vshrl.u32 %v1674_v63, 16  ;;  %v6566_v18 = vld [vmem:[#allocation2 + $0x24] sm:$0xff]   ;;  %v1677_v19 = vld [vmem:[#allocation2 + $0x34] sm:$0xf] }
  0x23   : > { %v1758_v5 = vsel %vm6551_vm2, %v1753_v59, %v1757_v39  ;;  %v1768_v6 = vsel %vm6551_vm2, %v1763_v60, %v1767_v43  ;;  %v1786_v7 = vor.u32 %v1785_v61, %v1781_v56  ;;  %v1796_v11 = vrot.slane %v1794_v2, 4  ;;  %v1678_v23 = vld [vmem:[#allocation2 + $0x38] sm:$0x1]  ;;  %v6314_v43 = vld [vmem:[%s7295_s2 + $0x1d0] sm:$0xff]   ;;  %v461_v44 = vld [vmem:[%s6507_s20 + $0x3c] sm:$0xff]  }
  0x24   : > { %5574 = vmatpush3.bf16.msra.mxu1 %v6304_v21  ;;  %v6563_v9 = vcombine.low %v1758_v5, %v1768_v6  ;;  %v1777_v10 = vrot.slane %v1776_v0, 4  ;;  %v1799_v12 = vrot.slane %v1797_v3, 5  ;;  %v1805_v15 = vrot.slane %v1803_v4, 5  ;;  %v6310_v21 = vld [vmem:[%s7295_s2 + $0x1c8] sm:$0xff]   ;;  %v463_v45 = vld [vmem:[%s6507_s20 + $0x44] sm:$0x1] }
  0x25   : > { %5766 = vmatpush3.bf16.msra.mxu0 %v6305_v22  ;;  %5607 = vmatprep.subr.bf16.mxu1 %v6308_v33  ;;  %v1787_v14 = vrot.slane %v1786_v7, 4  ;;  %v1809_v16 = vrot.slane %v1807_v8, 4  ;;  %v1813_v17 = vshll.u32 %v1675_v1, 16  ;;  %v1818_v24 = vshrl.u32 %v1676_v13, 16  ;;  %509 = vst [vmem:[#allocation2 + $0x3c] sm:$0xff] %v461_v44   ;;  %v6318_v48 = vld [vmem:[%s7295_s2 + $0xd0] sm:$0xff]  }
  0x26   : > { %5799 = vmatprep.subr.bf16.mxu0 %v6542_v36  ;;  %5767 = vmatprep.mubr.bf16.mxu0 %v6563_v9  ;;  %v1782_v20 = vsel %vm6551_vm2, %v1777_v10, %v1781_v56  ;;  %v1800_v22 = vor.u32 %v1799_v12, %v1796_v11  ;;  %v1821_v25 = vshll.u32 %v1676_v13, 16  ;;  %v1827_v29 = vshll.u32 %v1677_v19, 16  ;;  %511 = vst [vmem:[#allocation2 + $0x44] sm:$0x1] %v463_v45  ;;  %v464_v49 = vld [vmem:[%s6507_s20 + $0x48] sm:$0xff]   ;;  %v6315_v55 = vld [vmem:[%s7295_s2 + $0x1d8] sm:$0xff]  }
  0x27   : > { %5576 = vmatmul.mubr.bf16.vlgmr.msra.gmra.mrb[0].mxu1 %v6544_v41  ;;  %v1792_v26 = vsel %vm6551_vm2, %v1787_v14, %v1791_v62  ;;  %v1810_v27 = vor.u32 %v1809_v16, %v1805_v15  ;;  %v1815_v28 = vrot.slane %v1813_v17, 5  ;;  %v1820_v32 = vrot.slane %v1818_v24, 4  ;;  %512 = vst [vmem:[#allocation2 + $0x48] sm:$0xff] %v464_v49   ;;  %v467_v56 = vld [vmem:[%s6507_s20 + $0x54] sm:$0xff]   ;;  %v469_v58 = vld [vmem:[%s6507_s20 + $0x5c] sm:$0x1] }
  0x28   : > { %5608 = vmatpush3.bf16.msra.mxu1 %v6308_v33  ;;  %5579 = vmatprep.mubr.bf16.mxu1 %v6555_v57  ;;  %v6576_v30 = vcombine.low %v1782_v20, %v1792_v26  ;;  %v1801_v31 = vrot.slane %v1800_v22, 4  ;;  %v1823_v33 = vrot.slane %v1821_v25, 5  ;;  %v1829_v37 = vrot.slane %v1827_v29, 5  ;;  %515 = vst [vmem:[#allocation2 + $0x54] sm:$0xff] %v467_v56   ;;  %517 = vst [vmem:[#allocation2 + $0x5c] sm:$0x1] %v469_v58 }
  0x29   : > { %5609 = vmatprep.subr.bf16.mxu1 %v6313_v52  ;;  %v1811_v35 = vrot.slane %v1810_v27, 4  ;;  %v1831_v38 = vshrl.u32 %v1677_v19, 16  ;;  %v1837_v39 = vshll.u32 %v1678_v23, 16  ;;  %v6323_v61 = vld [vmem:[%s7295_s2 + $0xd8] sm:$0xff]   ;;  %v470_v62 = vld [vmem:[%s6507_s20 + $0x60] sm:$0xff]   ;;  %v6320_v25 = vld [vmem:[%s7295_s2 + $0x1e8] sm:$0xff]  }
  0x2a   : > { %5768 = vmatmul.mubr.bf16.vlgmr.msra.gmra.mrb[0].mxu0 %v6576_v30  ;;  %v1806_v40 = vsel %vm6551_vm2, %v1801_v31, %v1805_v15  ;;  %v1824_v42 = vor.u32 %v1823_v33, %v1820_v32  ;;  %v472_v63 = vld [vmem:[%s6507_s20 + $0x68] sm:$0x1]  ;;  %518 = vst [vmem:[#allocation2 + $0x60] sm:$0xff] %v470_v62   ;;  %v6319_v5 = vld [vmem:[%s7295_s2 + $0x1e0] sm:$0xff]  }
  0x2b   : > { %5800 = vmatpush3.bf16.msra.mxu0 %v6542_v36  ;;  %v1816_v46 = vsel %vm6551_vm2, %v1811_v35, %v1815_v28  ;;  %v1833_v47 = vrot.slane %v1831_v38, 4  ;;  %v1839_v36 = vrot.slane %v1837_v39, 5  ;;  %520 = vst [vmem:[#allocation2 + $0x68] sm:$0x1] %v472_v63 }
  0x2c   : > { %5610 = vmatpush3.bf16.msra.mxu1 %v6313_v52  ;;  %5801 = vmatprep.subr.bf16.mxu0 %v6310_v21  ;;  %v6596_v50 = vcombine.low %v1806_v40, %v1816_v46  ;;  %v1825_v51 = vrot.slane %v1824_v42, 4  ;;  %v466_v52 = vld [vmem:[%s6507_s20 + $0x50] sm:$0x1]  ;;  %v1679_v2 = vld [vmem:[#allocation2 + $0x3c] sm:$0xf] }
  0x2d   : > { %v1834_v54 = vor.u32 %v1833_v47, %v1829_v37  ;;  %5611 = vmatprep.subr.bf16.mxu1 %v6318_v48  ;;  %514 = vst [vmem:[#allocation2 + $0x50] sm:$0x1] %v466_v52  ;;  %v1680_v3 = vld [vmem:[#allocation2 + $0x40] sm:$0xf]  ;;  %v1681_v4 = vld [vmem:[#allocation2 + $0x44] sm:$0x1] }
  0x2e   : > { %5771 = vmatprep.mubr.bf16.mxu0 %v6596_v50  ;;  %v1830_v59 = vsel %vm6551_vm2, %v1825_v51, %v1829_v37  ;;  %v1842_v6 = vshrl.u32 %v1679_v2, 16  ;;  %v1845_v7 = vshll.u32 %v1679_v2, 16  ;;  %v1851_v8 = vshll.u32 %v1680_v3, 16  ;;  %v6621_v12 = vld [vmem:[#allocation2 + $0x3c] sm:$0xff]   ;;  %v1682_v13 = vld [vmem:[#allocation2 + $0x48] sm:$0xf] }
  0x2f   : > { %5580 = vmatmul.mubr.bf16.gmra.mrb[4].mxu1 %v6566_v18  ;;  %5802 = vmatpush3.bf16.msra.mxu0 %v6310_v21  ;;  %v1835_v60 = vrot.slane %v1834_v54, 4  ;;  %v1855_v10 = vshrl.u32 %v1680_v3, 16  ;;  %v1861_v11 = vshll.u32 %v1681_v4, 16  ;;  %v1683_v19 = vld [vmem:[#allocation2 + $0x4c] sm:$0xf]  ;;  %v1866_v22 = vshrl.u32 %v1682_v13, 16 }
  0x30   : > { %5583 = vmatprep.mubr.bf16.mxu1 %v6578_v34  ;;  %5612 = vmatpush3.bf16.msra.mxu1 %v6318_v48  ;;  %v1844_v14 = vrot.slane %v1842_v6, 4  ;;  %v1847_v15 = vrot.slane %v1845_v7, 5  ;;  %v1853_v16 = vrot.slane %v1851_v8, 5  ;;  %v1869_v23 = vshll.u32 %v1682_v13, 16  ;;  %v6627_v35 = vld [vmem:[#allocation2 + $0x48] sm:$0xff]   ;;  %v6630_v49 = vld [vmem:[#allocation2 + $0x54] sm:$0xff]  }
  0x31   : > { %5803 = vmatprep.subr.bf16.mxu0 %v6314_v43  ;;  %v1840_v0 = vsel %vm6551_vm2, %v1835_v60, %v1839_v36  ;;  %5613 = vmatprep.subr.bf16.mxu1 %v6323_v61  ;;  %v1857_v17 = vrot.slane %v1855_v10, 4  ;;  %v1863_v20 = vrot.slane %v1861_v11, 5  ;;  %v1875_v24 = vshll.u32 %v1683_v19, 16  ;;  %v1685_v37 = vld [vmem:[#allocation2 + $0x54] sm:$0xf]  ;;  %v6641_v62 = vld [vmem:[#allocation2 + $0x60] sm:$0xff]  }
  0x32   : > { %v6615_v1 = vcombine.low %v1830_v59, %v1840_v0  ;;  %v1848_v26 = vor.u32 %v1847_v15, %v1844_v14  ;;  %v1879_v28 = vshrl.u32 %v1683_v19, 16  ;;  %v1868_v31 = vrot.slane %v1866_v22, 4  ;;  %v1687_v45 = vld [vmem:[#allocation2 + $0x5c] sm:$0x1]  ;;  %v1689_v4 = vld [vmem:[#allocation2 + $0x64] sm:$0xf] }
  0x33   : > { %5804 = vmatpush3.bf16.msra.mxu0 %v6314_v43  ;;  %v1858_v27 = vor.u32 %v1857_v17, %v1853_v16  ;;  %v1871_v32 = vrot.slane %v1869_v23, 5  ;;  %v1877_v33 = vrot.slane %v1875_v24, 5  ;;  %v1686_v43 = vld [vmem:[#allocation2 + $0x58] sm:$0xf]  ;;  %v1890_v46 = vshrl.u32 %v1685_v37, 16  ;;  %v473_v22 = vld [vmem:[%s6507_s20 + $0x6c] sm:$0xff]  }
  0x34   : > { %5614 = vmatpush3.bf16.msra.mxu1 %v6323_v61  ;;  %5772 = vmatmul.mubr.bf16.gmra.mrb[4].mxu0 %v6615_v1  ;;  %v1684_v21 = vld [vmem:[#allocation2 + $0x50] sm:$0x1]  ;;  %v1849_v38 = vrot.slane %v1848_v26, 4  ;;  %v1881_v40 = vrot.slane %v1879_v28, 4  ;;  %v1893_v47 = vshll.u32 %v1685_v37, 16  ;;  %v1899_v48 = vshll.u32 %v1686_v43, 16 }
  0x35   : > { %5805 = vmatprep.subr.bf16.mxu0 %v6315_v55  ;;  %v1885_v29 = vshll.u32 %v1684_v21, 16  ;;  %v1859_v39 = vrot.slane %v1858_v27, 4  ;;  %v1872_v44 = vor.u32 %v1871_v32, %v1868_v31  ;;  %v1903_v54 = vshrl.u32 %v1686_v43, 16  ;;  %v1688_v61 = vld [vmem:[#allocation2 + $0x60] sm:$0xf]  ;;  %v6325_v11 = vld [vmem:[%s7295_s2 + $0x1f8] sm:$0xff]  }
  0x36   : > { %v1854_v51 = vsel %vm6551_vm2, %v1849_v38, %v1853_v16  ;;  %v1882_v52 = vor.u32 %v1881_v40, %v1877_v33  ;;  %v1892_v59 = vrot.slane %v1890_v46, 4  ;;  %v1895_v60 = vrot.slane %v1893_v47, 5  ;;  %v1690_v7 = vld [vmem:[#allocation2 + $0x68] sm:$0x1]  ;;  %521 = vst [vmem:[#allocation2 + $0x6c] sm:$0xff] %v473_v22   ;;  %v476_v37 = vld [vmem:[%s6507_s20 + $0x78] sm:$0xff]  }
  0x37   : > { %5584 = vmatmul.mubr.bf16.gmra.mrb[8].mxu1 %v6621_v12  ;;  %5806 = vmatpush3.bf16.msra.mxu0 %v6315_v55  ;;  %v1887_v42 = vrot.slane %v1885_v29, 5  ;;  %v1864_v36 = vsel %vm6551_vm2, %v1859_v39, %v1863_v20  ;;  %v6324_v55 = vld [vmem:[%s7295_s2 + $0x1f0] sm:$0xff]   ;;  %v1873_v58 = vrot.slane %v1872_v44, 4  ;;  %v1901_v0 = vrot.slane %v1899_v48, 5  ;;  %v6328_v29 = vld [vmem:[%s7295_s2 + $0xe0] sm:$0xff]   ;;  %524 = vst [vmem:[#allocation2 + $0x78] sm:$0xff] %v476_v37  }
  0x38   : > { %5807 = vmatprep.subr.bf16.mxu0 %v6319_v5  ;;  %5587 = vmatprep.mubr.bf16.mxu1 %v6627_v35  ;;  %v6639_v56 = vcombine.low %v1854_v51, %v1864_v36  ;;  %v1883_v63 = vrot.slane %v1882_v52, 4  ;;  %v1905_v2 = vrot.slane %v1903_v54, 4  ;;  %v1909_v3 = vshll.u32 %v1687_v45, 16  ;;  %v479_v38 = vld [vmem:[%s6507_s20 + $0x84] sm:$0xff]   ;;  %v482_v45 = vld [vmem:[%s6507_s20 + $0x90] sm:$0xff]   ;;  %v485_v46 = vld [vmem:[%s6507_s20 + $0x9c] sm:$0xff]  }
  0x39   : > { %v1896_v6 = vor.u32 %v1895_v60, %v1892_v59  ;;  %v1914_v8 = vshrl.u32 %v1688_v61, 16  ;;  %v1917_v10 = vshll.u32 %v1688_v61, 16  ;;  %v1923_v16 = vshll.u32 %v1689_v4, 16  ;;  %5615 = vmatprep.subr.bf16.mxu1 %v6328_v29  ;;  %527 = vst [vmem:[#allocation2 + $0x84] sm:$0xff] %v479_v38   ;;  %530 = vst [vmem:[#allocation2 + $0x90] sm:$0xff] %v482_v45   ;;  %v6336_v51 = vld [vmem:[%s7295_s2 + $0xf0] sm:$0xff]  }
  0x3a   : > { %5775 = vmatprep.mubr.bf16.mxu0 %v6639_v56  ;;  %v1888_v13 = vsel %vm6551_vm2, %v1883_v63, %v1887_v42  ;;  %v1906_v14 = vor.u32 %v1905_v2, %v1901_v0  ;;  %v1911_v15 = vrot.slane %v1909_v3, 5  ;;  %v1927_v26 = vshrl.u32 %v1689_v4, 16  ;;  %v6332_v42 = vld [vmem:[%s7295_s2 + $0xe8] sm:$0xff]   ;;  %5616 = vmatpush3.bf16.msra.mxu1 %v6328_v29  ;;  %533 = vst [vmem:[#allocation2 + $0x9c] sm:$0xff] %v485_v46   ;;  %v6340_v60 = vld [vmem:[%s7295_s2 + $0xf8] sm:$0xff]  }
  0x3b   : > { %5808 = vmatpush3.bf16.msra.mxu0 %v6319_v5  ;;  %v1878_v5 = vsel %vm6551_vm2, %v1873_v58, %v1877_v33  ;;  %v1897_v19 = vrot.slane %v1896_v6, 4  ;;  %v1916_v20 = vrot.slane %v1914_v8, 4  ;;  %v1919_v21 = vrot.slane %v1917_v10, 5  ;;  %v6667_v33 = vld [vmem:[%s7295_s2 + $0x80] sm:$0xff]   ;;  %5617 = vmatprep.subr.bf16.mxu1 %v6332_v42  ;;  %v488_v54 = vld [vmem:[%s6507_s20 + $0xa8] sm:$0xff]   ;;  %v491_v58 = vld [vmem:[%s6507_s20 + $0xb4] sm:$0xff]  }
  0x3c   : > { %5809 = vmatprep.subr.bf16.mxu0 %v6320_v25  ;;  %v6653_v17 = vcombine.low %v1878_v5, %v1888_v13  ;;  %v1907_v23 = vrot.slane %v1906_v14, 4  ;;  %v1925_v24 = vrot.slane %v1923_v16, 5  ;;  %v1933_v27 = vshll.u32 %v1690_v7, 16  ;;  %536 = vst [vmem:[#allocation2 + $0xa8] sm:$0xff] %v488_v54   ;;  %539 = vst [vmem:[#allocation2 + $0xb4] sm:$0xff] %v491_v58   ;;  %v6333_v6 = vld [vmem:[%s7295_s2 + $0x88] sm:$0xff]  }
  0x3d   : > { %v1920_v28 = vor.u32 %v1919_v21, %v1916_v20  ;;  %v1929_v32 = vrot.slane %v1927_v26, 4  ;;  %v6684_v36 = vld [vmem:[#allocation2 + $0x6c] sm:$0xff]   ;;  %v475_v61 = vld [vmem:[%s6507_s20 + $0x74] sm:$0x1]  ;;  %v478_v13 = vld [vmem:[%s6507_s20 + $0x80] sm:$0x1] }
  0x3e   : > { %5776 = vmatmul.mubr.bf16.gmra.mrb[8].mxu0 %v6653_v17  ;;  %v1912_v31 = vsel %vm6551_vm2, %v1907_v23, %v1911_v15  ;;  %v1935_v44 = vrot.slane %v1933_v27, 5  ;;  %5618 = vmatpush3.bf16.msra.mxu1 %v6332_v42  ;;  %v6694_v59 = vld [vmem:[#allocation2 + $0x78] sm:$0xff]   ;;  %v1691_v63 = vld [vmem:[#allocation2 + $0x6c] sm:$0xf]  ;;  %523 = vst [vmem:[#allocation2 + $0x74] sm:$0x1] %v475_v61 }
  0x3f   : > { %5588 = vmatmul.mubr.bf16.gmra.mrb[12].mxu1 %v6630_v49  ;;  %5810 = vmatpush3.bf16.msra.mxu0 %v6320_v25  ;;  %v1902_v25 = vsel %vm6551_vm2, %v1897_v19, %v1901_v0  ;;  %v1921_v40 = vrot.slane %v1920_v28, 4  ;;  %v1930_v43 = vor.u32 %v1929_v32, %v1925_v24  ;;  %v1938_v2 = vshrl.u32 %v1691_v63, 16  ;;  %v1692_v5 = vld [vmem:[#allocation2 + $0x70] sm:$0xf]  ;;  %v6720_v14 = vld [vmem:[%s7295_s2 + $0x180] sm:$0xff]  }
  0x40   : > { %5591 = vmatprep.mubr.bf16.mxu1 %v6641_v62  ;;  %5811 = vmatprep.subr.bf16.mxu0 %v6324_v55  ;;  %v6671_v39 = vcombine.low %v1902_v25, %v1912_v31  ;;  %v6703_v0 = vld [vmem:[#allocation2 + $0x84] sm:$0xff]   ;;  %v6705_v3 = vld [vmem:[#allocation2 + $0x90] sm:$0xff]   ;;  %v1941_v4 = vshll.u32 %v1691_v63, 16  ;;  %v1947_v10 = vshll.u32 %v1692_v5, 16  ;;  %526 = vst [vmem:[#allocation2 + $0x80] sm:$0x1] %v478_v13 }
  0x41   : > { %v1926_v47 = vsel %vm6551_vm2, %v1921_v40, %v1925_v24  ;;  %v1931_v48 = vrot.slane %v1930_v43, 4  ;;  %5619 = vmatprep.subr.bf16.mxu1 %v6336_v51  ;;  %v1940_v7 = vrot.slane %v1938_v2, 4  ;;  %v6337_v15 = vld [vmem:[%s7295_s2 + $0x90] sm:$0xff]   ;;  %v1694_v19 = vld [vmem:[#allocation2 + $0x78] sm:$0xf]  ;;  %v6730_v21 = vld [vmem:[#allocation2 + $0x9c] sm:$0xff]  }
  0x42   : > { %5779 = vmatprep.mubr.bf16.mxu0 %v6671_v39  ;;  %5620 = vmatpush3.bf16.msra.mxu1 %v6336_v51  ;;  %v1943_v8 = vrot.slane %v1941_v4, 5  ;;  %v6726_v16 = vrot.slane %v1947_v10, 5  ;;  %v1695_v20 = vld [vmem:[#allocation2 + $0x7c] sm:$0xf]  ;;  %v1962_v24 = vshrl.u32 %v1694_v19, 16  ;;  %v1965_v26 = vshll.u32 %v1694_v19, 16 }
  0x43   : > { %5812 = vmatpush3.bf16.msra.mxu0 %v6324_v55  ;;  %v1936_v52 = vsel %vm6551_vm2, %v1931_v48, %v1935_v44  ;;  %5621 = vmatprep.subr.bf16.mxu1 %v6340_v60  ;;  %v6732_v27 = vld [vmem:[#allocation2 + $0xa8] sm:$0xff]   ;;  %v1971_v28 = vshll.u32 %v1695_v20, 16  ;;  %v1975_v29 = vshrl.u32 %v1695_v20, 16  ;;  %v1697_v43 = vld [vmem:[#allocation2 + $0x84] sm:$0xf]  ;;  %v6341_v44 = vld [vmem:[%s7295_s2 + $0x98] sm:$0xff]  }
  0x44   : > { %5813 = vmatprep.subr.bf16.mxu0 %v6325_v11  ;;  %v6690_v55 = vcombine.low %v1926_v47, %v1936_v52  ;;  %v1944_v31 = vor.u32 %v1943_v8, %v1940_v7  ;;  %v1967_v37 = vrot.slane %v1965_v26, 5  ;;  %v481_v38 = vld [vmem:[%s6507_s20 + $0x8c] sm:$0x1]  ;;  %v1698_v46 = vld [vmem:[#allocation2 + $0x88] sm:$0xf]  ;;  %v1986_v47 = vshrl.u32 %v1697_v43, 16 }
  0x45   : > { %v1693_v22 = vld [vmem:[#allocation2 + $0x74] sm:$0x1]  ;;  %v6737_v40 = vrot.slane %v1971_v28, 5  ;;  %v1977_v42 = vrot.slane %v1975_v29, 4  ;;  %529 = vst [vmem:[#allocation2 + $0x8c] sm:$0x1] %v481_v38 }
  0x46   : > { %5780 = vmatmul.mubr.bf16.gmra.mrb[12].mxu0 %v6690_v55  ;;  %5622 = vmatpush3.bf16.msra.mxu1 %v6340_v60  ;;  %v1957_v25 = vshll.u32 %v1693_v22, 16  ;;  %v1989_v48 = vshll.u32 %v1697_v43, 16  ;;  %v1995_v51 = vshll.u32 %v1698_v46, 16  ;;  %v1999_v52 = vshrl.u32 %v1698_v46, 16  ;;  %v6758_v2 = vld [vmem:[#allocation2 + $0xb4] sm:$0xff]   ;;  %v6343_v7 = vld [vmem:[%s7295_s2 + $0xa0] sm:$0xff]  }
  0x47   : > { %5814 = vmatpush3.bf16.msra.mxu0 %v6325_v11  ;;  %5592 = vmatmul.mubr.bf16.gmra.mrb[16].mxu1 %v6684_v36  ;;  %v1951_v11 = vshrl.u32 %v1692_v5, 16  ;;  %v6750_v54 = vrot.slane %v1944_v31, 4  ;;  %v1696_v61 = vld [vmem:[#allocation2 + $0x80] sm:$0x1]  ;;  %v1978_v63 = vor.u32 %v1977_v42, %v6737_v40  ;;  %v484_v8 = vld [vmem:[%s6507_s20 + $0x98] sm:$0x1] }
  0x48   : > { %5847 = vmatprep.subr.bf16.mxu0 %v6667_v33  ;;  %5815 = vmatprep.mubr.bf16.mxu0 %v6576_v30  ;;  %v6754_v60 = vrot.slane %v1957_v25, 5  ;;  %v1981_v5 = vshll.u32 %v1696_v61, 16  ;;  %v542_v10 = vld [vmem:[%s6746_s12] sm:$0xff]   ;;  %v6768_v13 = vrot.slane %v1995_v51, 5  ;;  %532 = vst [vmem:[#allocation2 + $0x98] sm:$0x1] %v484_v8 }
  0x49   : > { %5595 = vmatprep.mubr.bf16.mxu1 %v6694_v59  ;;  %v1953_v23 = vrot.slane %v1951_v11, 4  ;;  %5655 = vmatprep.subr.bf16.mxu1 %v6720_v14  ;;  %v1991_v11 = vrot.slane %v1989_v48, 5  ;;  %v1700_v19 = vld [vmem:[#allocation2 + $0x90] sm:$0xf]  ;;  %v1701_v20 = vld [vmem:[#allocation2 + $0x94] sm:$0xf]  ;;  %v1950_v38 = vsel %vm6551_vm2, %v6750_v54, %v6726_v16 }
  0x4a   : > { %549 = vst [vmem:[#allocation2 + $0xc0] sm:$0xff] %v542_v10   ;;  %v2001_v22 = vrot.slane %v1999_v52, 4  ;;  %v2019_v26 = vshll.u32 %v1701_v20, 16  ;;  %v1979_v25 = vrot.slane %v1978_v63, 4  ;;  %v2023_v29 = vshrl.u32 %v1701_v20, 16 }
  0x4b   : > { %v1954_v32 = vor.u32 %v1953_v23, %v6726_v16  ;;  %v2010_v23 = vshrl.u32 %v1700_v19, 16  ;;  %v1983_v31 = vrot.slane %v1981_v5, 5  ;;  %v1704_v46 = vld [vmem:[#allocation2 + $0xa0] sm:$0xf]  ;;  %v6345_v16 = vld [vmem:[%s7295_s2 + $0xa8] sm:$0xff]  }
  0x4c   : > { %v1699_v28 = vld [vmem:[#allocation2 + $0x8c] sm:$0x1]  ;;  %v6776_v43 = vrot.slane %v2019_v26, 5  ;;  %v2025_v51 = vrot.slane %v2023_v29, 4  ;;  %v2043_v61 = vshll.u32 %v1704_v46, 16  ;;  %v2047_v63 = vshrl.u32 %v1704_v46, 16 }
  0x4d   : > { %v6752_v58 = vrot.slane %v1954_v32, 4  ;;  %v2012_v32 = vrot.slane %v2010_v23, 4  ;;  %v2005_v48 = vshll.u32 %v1699_v28, 16  ;;  %v1984_v8 = vsel %vm6551_vm2, %v1979_v25, %v1983_v31  ;;  %v1707_v25 = vld [vmem:[#allocation2 + $0xac] sm:$0xf] }
  0x4e   : > { %5816 = vmatmul.mubr.bf16.vlgmr.msra.gmra.mrb[0].mxu0 %v6596_v50  ;;  %v2026_v10 = vor.u32 %v2025_v51, %v6776_v43  ;;  %v2049_v26 = vrot.slane %v2047_v63, 4 }
  0x4f   : > { %5596 = vmatmul.mubr.bf16.gmra.mrb[20].mxu1 %v6703_v0  ;;  %5848 = vmatpush3.bf16.msra.mxu0 %v6667_v33  ;;  %v1964_v33 = vrot.slane %v1962_v24, 4  ;;  %v2013_v24 = vshll.u32 %v1700_v19, 16  ;;  %v1960_v5 = vsel %vm6551_vm2, %v6752_v58, %v6754_v60  ;;  %v6347_v19 = vld [vmem:[%s7295_s2 + $0xb0] sm:$0xff]   ;;  %v2007_v29 = vrot.slane %v2005_v48, 5  ;;  %v6349_v48 = vld [vmem:[%s7295_s2 + $0xb8] sm:$0xff]  }
  0x50   : > { %5599 = vmatprep.mubr.bf16.mxu1 %v6705_v3  ;;  %5819 = vmatprep.mubr.bf16.mxu0 %v6615_v1 }
  0x51   : > { %5849 = vmatprep.subr.bf16.mxu0 %v6333_v6  ;;  %v1968_v45 = vor.u32 %v1967_v37, %v1964_v33  ;;  %v487_v33 = vld [vmem:[%s6507_s20 + $0xa4] sm:$0x1]  ;;  %v545_v37 = vld [vmem:[%s6746_s12 + $0xc] sm:$0xff]  }
  0x52   : > { %535 = vst [vmem:[#allocation2 + $0xa4] sm:$0x1] %v487_v33  ;;  %552 = vst [vmem:[#allocation2 + $0xcc] sm:$0xff] %v545_v37   ;;  %v2027_v37 = vrot.slane %v2026_v10, 4 }
  0x53   : > { %5850 = vmatpush3.bf16.msra.mxu0 %v6333_v6  ;;  %v6760_v4 = vrot.slane %v1968_v45, 4  ;;  %v1988_v6 = vrot.slane %v1986_v47, 4  ;;  %v1703_v45 = vld [vmem:[#allocation2 + $0x9c] sm:$0xf]  ;;  %v2002_v47 = vor.u32 %v2001_v22, %v6768_v13  ;;  %v6801_v22 = vrot.slane %v2043_v61, 5 }
  0x54   : > { %5851 = vmatprep.subr.bf16.mxu0 %v6337_v15  ;;  %v2034_v52 = vshrl.u32 %v1703_v45, 16  ;;  %v2037_v54 = vshll.u32 %v1703_v45, 16  ;;  %v2071_v45 = vshrl.u32 %v1707_v25, 16 }
  0x55   : > { %v1992_v42 = vor.u32 %v1991_v11, %v1988_v6  ;;  %v1974_v6 = vsel %vm6551_vm2, %v6760_v4, %v6737_v40  ;;  %v490_v11 = vld [vmem:[%s6507_s20 + $0xb0] sm:$0x1]  ;;  %v1706_v40 = vld [vmem:[#allocation2 + $0xa8] sm:$0xf]  ;;  %v2003_v23 = vrot.slane %v2002_v47, 4  ;;  %v2050_v51 = vor.u32 %v2049_v26, %v6801_v22 }
  0x56   : > { %5820 = vmatmul.mubr.bf16.gmra.mrb[4].mxu0 %v6639_v56  ;;  %v2036_v60 = vrot.slane %v2034_v52, 4  ;;  %v2039_v20 = vrot.slane %v2037_v54, 5  ;;  %538 = vst [vmem:[#allocation2 + $0xb0] sm:$0x1] %v490_v11  ;;  %v2058_v28 = vshrl.u32 %v1706_v40, 16  ;;  %v2061_v31 = vshll.u32 %v1706_v40, 16 }
  0x57   : > { %5600 = vmatmul.mubr.bf16.gmra.mrb[24].mxu1 %v6730_v21  ;;  %5823 = vmatprep.mubr.bf16.mxu0 %v6653_v17  ;;  %v1993_v4 = vrot.slane %v1992_v42, 4  ;;  %v6810_v33 = vcombine.low %v1974_v6, %v1984_v8  ;;  %v493_v54 = vld [vmem:[%s6507_s20 + $0xbc] sm:$0x1]  ;;  %v2073_v63 = vrot.slane %v2071_v45, 4 }
  0x58   : > { %5603 = vmatprep.mubr.bf16.mxu1 %v6732_v27  ;;  %5852 = vmatpush3.bf16.msra.mxu0 %v6337_v15  ;;  %v2015_v15 = vrot.slane %v2013_v24, 5  ;;  %v6344_v24 = vld [vmem:[%s7295_s2 + $0x188] sm:$0xff]   ;;  %v2040_v47 = vor.u32 %v2039_v20, %v2036_v60  ;;  %541 = vst [vmem:[#allocation2 + $0xbc] sm:$0x1] %v493_v54  ;;  %v2051_v20 = vrot.slane %v2050_v51, 4 }
  0x59   : > { %5853 = vmatprep.subr.bf16.mxu0 %v6341_v44  ;;  %v1705_v42 = vld [vmem:[#allocation2 + $0xa4] sm:$0x1]  ;;  %v1998_v6 = vsel %vm6551_vm2, %v1993_v4, %v6768_v13  ;;  %v6346_v13 = vld [vmem:[%s7295_s2 + $0x190] sm:$0xff]  }
  0x5a   : > { %v2053_v52 = vshll.u32 %v1705_v42, 16  ;;  %v6838_v60 = vrot.slane %v2040_v47, 4 }
  0x5c   : > { %5854 = vmatpush3.bf16.msra.mxu0 %v6341_v44  ;;  %v2016_v44 = vor.u32 %v2015_v15, %v2012_v32  ;;  %v2067_v32 = vshll.u32 %v1707_v25, 16  ;;  %v6808_v15 = vcombine.low %v1950_v38, %v1960_v5  ;;  %v2060_v38 = vrot.slane %v2058_v28, 4  ;;  %v1709_v5 = vld [vmem:[#allocation2 + $0xb4] sm:$0xf]  ;;  %v544_v25 = vld [vmem:[%s6746_s12 + $0x8] sm:$0x1] }
  0x5d   : > { %5855 = vmatprep.subr.bf16.mxu0 %v6343_v7  ;;  %v2082_v8 = vshrl.u32 %v1709_v5, 16  ;;  %v1708_v10 = vld [vmem:[#allocation2 + $0xb0] sm:$0x1]  ;;  %v2085_v11 = vshll.u32 %v1709_v5, 16  ;;  %v2055_v40 = vrot.slane %v2053_v52, 5  ;;  %v6348_v28 = vld [vmem:[%s7295_s2 + $0x198] sm:$0xff]   ;;  %v2046_v52 = vsel %vm6551_vm2, %v6838_v60, %v6801_v22 }
  0x5e   : > { %5824 = vmatmul.mubr.bf16.gmra.mrb[8].mxu0 %v6671_v39  ;;  %v6818_v61 = vrot.slane %v2067_v32, 5  ;;  %551 = vst [vmem:[#allocation2 + $0xc8] sm:$0x1] %v544_v25  ;;  %v1712_v32 = vld [vmem:[#allocation2 + $0xc0] sm:$0xf] }
  0x5f   : > { %5604 = vmatmul.mubr.bf16.gmra.mrb[28].mxu1 %v6758_v2  ;;  %5827 = vmatprep.mubr.bf16.mxu0 %v6690_v55  ;;  %v2084_v26 = vrot.slane %v2082_v8, 4  ;;  %v2106_v45 = vshrl.u32 %v1712_v32, 16  ;;  %v1711_v54 = vld [vmem:[#allocation2 + $0xbc] sm:$0x1] }
  0x60   : > { %5623 = vmatprep.mubr.bf16.mxu1 %v6544_v41  ;;  %v1702_v41 = vld [vmem:[#allocation2 + $0x98] sm:$0x1]  ;;  %5856 = vmatpush3.bf16.msra.mxu0 %v6343_v7  ;;  %v6806_v7 = vrot.slane %v2016_v44, 4  ;;  %v2063_v44 = vrot.slane %v2061_v31, 5  ;;  %v2074_v4 = vor.u32 %v2073_v63, %v6818_v61 }
  0x61   : > { %v2029_v58 = vshll.u32 %v1702_v41, 16  ;;  %5857 = vmatprep.subr.bf16.mxu0 %v6345_v16 }
  0x62   : > { %v2022_v41 = vsel %vm6551_vm2, %v6806_v7, %v6776_v43  ;;  %v2064_v43 = vor.u32 %v2063_v44, %v2060_v38  ;;  %v2075_v63 = vrot.slane %v2074_v4, 4 }
  0x63   : > { %v2031_v46 = vrot.slane %v2029_v58, 5 }
  0x64   : > { %5858 = vmatpush3.bf16.msra.mxu0 %v6345_v16  ;;  %v2008_v16 = vsel %vm6551_vm2, %v2003_v23, %v2007_v29  ;;  %v2077_v23 = vshll.u32 %v1708_v10, 16  ;;  %v6848_v29 = vld [vmem:[%s7295_s2 + $0x140] sm:$0xff]   ;;  %v2065_v44 = vrot.slane %v2064_v43, 4  ;;  %v1715_v10 = vld [vmem:[#allocation2 + $0xcc] sm:$0xf] }
  0x65   : > { %5859 = vmatprep.subr.bf16.mxu0 %v6347_v19  ;;  %v6850_v7 = vcombine.low %v1998_v6, %v2008_v16  ;;  %v2108_v6 = vrot.slane %v2106_v45, 4  ;;  %v547_v16 = vld [vmem:[%s6746_s12 + $0x14] sm:$0x1] }
  0x66   : > { %5828 = vmatmul.mubr.bf16.gmra.mrb[12].mxu0 %v6808_v15  ;;  %v2079_v5 = vrot.slane %v2077_v23, 5  ;;  %554 = vst [vmem:[#allocation2 + $0xd4] sm:$0x1] %v547_v16  ;;  %v2070_v60 = vsel %vm6551_vm2, %v2065_v44, %v6818_v61  ;;  %v448_v23 = vld [vmem:[%s6507_s20 + $0x8] sm:$0x1] }
  0x67   : > { %5624 = vmatmul.mubr.bf16.vlgmr.msra.gmra.mrb[0].mxu1 %v6555_v57  ;;  %v1710_v57 = vld [vmem:[#allocation2 + $0xb8] sm:$0xf]  ;;  %5831 = vmatprep.mubr.bf16.mxu0 %v6810_v33  ;;  %496 = vst [vmem:[#allocation2 + $0x8] sm:$0x1] %v448_v23  ;;  %v6352_v61 = vld [vmem:[%s7295_s2 + $0x1a8] sm:$0xff]   ;;  %v6922_v23 = vld [vmem:[%s7295_s2 + $0x40] sm:$0xff]  }
  0x68   : > { %5656 = vmatpush3.bf16.msra.mxu1 %v6720_v14  ;;  %5627 = vmatprep.mubr.bf16.mxu1 %v6566_v18  ;;  %v2091_v14 = vshll.u32 %v1710_v57, 16  ;;  %v2095_v58 = vshrl.u32 %v1710_v57, 16  ;;  %v2032_v18 = vsel %vm6551_vm2, %v2027_v37, %v2031_v46  ;;  %v1713_v37 = vld [vmem:[#allocation2 + $0xc4] sm:$0xf]  ;;  %v2109_v46 = vshll.u32 %v1712_v32, 16 }
  0x69   : > { %5657 = vmatprep.subr.bf16.mxu1 %v6344_v24  ;;  %5860 = vmatpush3.bf16.msra.mxu0 %v6347_v19  ;;  %v2087_v19 = vrot.slane %v2085_v11, 5  ;;  %v2115_v47 = vshll.u32 %v1713_v37, 16  ;;  %v6854_v51 = vcombine.low %v2022_v41, %v2032_v18  ;;  %v2119_v38 = vshrl.u32 %v1713_v37, 16  ;;  %v1716_v11 = vld [vmem:[#allocation2 + $0xd0] sm:$0xf] }
  0x6a   : > { %5861 = vmatprep.subr.bf16.mxu0 %v6349_v48  ;;  %v6852_v31 = vrot.slane %v2091_v14, 5  ;;  %v2097_v42 = vrot.slane %v2095_v58, 4  ;;  %v2111_v22 = vrot.slane %v2109_v46, 5  ;;  %v2130_v14 = vshrl.u32 %v1715_v10, 16  ;;  %v3192_v44 = vld [vmem:[#allocation2 + $0x4] sm:$0xf] }
  0x6b   : > { %v2088_v57 = vor.u32 %v2087_v19, %v2084_v26  ;;  %v6866_v8 = vrot.slane %v2115_v47, 5  ;;  %v2121_v41 = vrot.slane %v2119_v38, 4  ;;  %v2133_v58 = vshll.u32 %v1715_v10, 16 }
  0x6c   : > { %5658 = vmatpush3.bf16.msra.mxu1 %v6344_v24  ;;  %v2056_v24 = vsel %vm6551_vm2, %v2051_v20, %v2055_v40  ;;  %v2143_v18 = vshrl.u32 %v1716_v11, 16  ;;  %v2080_v20 = vsel %vm6551_vm2, %v2075_v63, %v2079_v5  ;;  %v1714_v40 = vld [vmem:[#allocation2 + $0xc8] sm:$0x1]  ;;  %v2112_v43 = vor.u32 %v2111_v22, %v2108_v6  ;;  %v6354_v5 = vld [vmem:[%s7295_s2 + $0x1b0] sm:$0xff]  }
  0x6d   : > { %5659 = vmatprep.subr.bf16.mxu1 %v6346_v13  ;;  %5862 = vmatpush3.bf16.msra.mxu0 %v6349_v48  ;;  %v2101_v48 = vshll.u32 %v1711_v54, 16  ;;  %v2122_v4 = vor.u32 %v2121_v41, %v6866_v8  ;;  %v6881_v26 = vcombine.low %v2046_v52, %v2056_v24  ;;  %v2089_v25 = vrot.slane %v2088_v57, 4  ;;  %v3191_v57 = vld [vmem:[#allocation2] sm:$0xe] }
  0x6e   : > { %5895 = vmatprep.subr.bf16.mxu0 %v6848_v29  ;;  %5832 = vmatmul.mubr.bf16.gmra.mrb[16].mxu0 %v6850_v7  ;;  %v2125_v19 = vshll.u32 %v1714_v40, 16  ;;  %v2135_v45 = vrot.slane %v2133_v58, 5  ;;  %v6886_v46 = vcombine.low %v2070_v60, %v2080_v20  ;;  %v2145_v54 = vrot.slane %v2143_v18, 4  ;;  %v3193_v10 = vld [vmem:[#allocation2 + $0x8] sm:$0x1] }
  0x6f   : > { %5628 = vmatmul.mubr.bf16.gmra.mrb[4].mxu1 %v6578_v34  ;;  %v2098_v34 = vor.u32 %v2097_v42, %v6852_v31  ;;  %5835 = vmatprep.mubr.bf16.mxu0 %v6854_v51  ;;  %v2103_v37 = vrot.slane %v2101_v48, 5  ;;  %v2132_v42 = vrot.slane %v2130_v14, 4  ;;  %v2113_v52 = vrot.slane %v2112_v43, 4  ;;  %v3194_v40 = vld [vmem:[#allocation2 + $0xc] sm:$0xe] }
  0x70   : > { %5631 = vmatprep.mubr.bf16.mxu1 %v6621_v12  ;;  %5660 = vmatpush3.bf16.msra.mxu1 %v6346_v13  ;;  %v6350_v12 = vld [vmem:[%s7295_s2 + $0x1a0] sm:$0xff]   ;;  %v2139_v13 = vshll.u32 %v1716_v11, 16  ;;  %v2123_v24 = vrot.slane %v2122_v4, 4  ;;  %v2127_v38 = vrot.slane %v2125_v19, 5  ;;  %v2094_v63 = vsel %vm6551_vm2, %v2089_v25, %v6852_v31  ;;  %v6357_v11 = vld [vmem:[%s7295_s2 + $0x1b8] sm:$0xff]  }
  0x71   : > { %5661 = vmatprep.subr.bf16.mxu1 %v6348_v28  ;;  %v2099_v32 = vrot.slane %v2098_v34, 4  ;;  %v2136_v6 = vor.u32 %v2135_v45, %v2132_v42  ;;  %v2118_v22 = vsel %vm6551_vm2, %v2113_v52, %v6866_v8  ;;  %v3304_v41 = vrot.slane %v3192_v44, 5  ;;  %v3198_v43 = vld [vmem:[#allocation2 + $0x1c] sm:$0xf]  ;;  %v3196_v25 = vld [vmem:[#allocation2 + $0x14] sm:$0x1] }
  0x72   : > { %v2141_v47 = vrot.slane %v2139_v13, 5  ;;  %v2128_v31 = vsel %vm6551_vm2, %v2123_v24, %v2127_v38  ;;  %v5070_v48 = vrot.slane %v3191_v57, 9  ;;  %v3195_v13 = vld [vmem:[#allocation2 + $0x10] sm:$0xf]  ;;  %v3307_v60 = vrot.slane %v3193_v10, 5 }
  0x73   : > { %v6910_v14 = vcombine.low %v2118_v22, %v2128_v31  ;;  %v2137_v58 = vrot.slane %v2136_v6, 4  ;;  %v3306_v18 = vrot.slane %v3304_v41, 4  ;;  %v3311_v4 = vrot.slane %v3195_v13, 5  ;;  %v3197_v19 = vld [vmem:[#allocation2 + $0x18] sm:$0xe] }
  0x74   : > { %5662 = vmatpush3.bf16.msra.mxu1 %v6348_v28  ;;  %v1717_v28 = vld [vmem:[#allocation2 + $0xd4] sm:$0x1]  ;;  %v5071_v42 = vrot.slane %v3194_v40, 9  ;;  %v3318_v45 = vrot.slane %v3198_v43, 5  ;;  %v3314_v24 = vrot.slane %v3196_v25, 5  ;;  %v5072_v38 = vrot.slane %v3197_v19, 9 }
  0x75   : > { %5663 = vmatprep.subr.bf16.mxu1 %v6350_v12  ;;  %v2149_v16 = vshll.u32 %v1717_v28, 16  ;;  %v3313_v52 = vrot.slane %v3311_v4, 4  ;;  %v3201_v28 = vld [vmem:[#allocation2 + $0x28] sm:$0xf]  ;;  %v3202_v22 = vld [vmem:[#allocation2 + $0x2c] sm:$0x1] }
  0x76   : > { %5836 = vmatmul.mubr.bf16.gmra.mrb[20].mxu0 %v6881_v26  ;;  %v3320_v44 = vrot.slane %v3318_v45, 4  ;;  %v3319_v57 = vsel %vm6914_vm5, %v5072_v38, %v3318_v45  ;;  %v3207_v40 = vld [vmem:[#allocation2 + $0x40] sm:$0xf]  ;;  %v3210_v43 = vld [vmem:[#allocation2 + $0x4c] sm:$0xf] }
  0x77   : > { %5632 = vmatmul.mubr.bf16.gmra.mrb[8].mxu1 %v6627_v35  ;;  %5839 = vmatprep.mubr.bf16.mxu0 %v6886_v46  ;;  %v2104_v35 = vsel %vm6551_vm2, %v2099_v32, %v2103_v37  ;;  %v3305_v32 = vsel %vm6914_vm5, %v5070_v48, %v3304_v41  ;;  %v3308_v37 = vsel %vm6914_vm5, %v3306_v18, %v3307_v60  ;;  %v3205_v41 = vld [vmem:[#allocation2 + $0x38] sm:$0x1]  ;;  %v3339_v25 = vrot.slane %v3207_v40, 5  ;;  %v3209_v19 = vld [vmem:[#allocation2 + $0x48] sm:$0xe] }
  0x78   : > { %5635 = vmatprep.mubr.bf16.mxu1 %v6630_v49  ;;  %5664 = vmatpush3.bf16.msra.mxu1 %v6350_v12  ;;  %v2146_v49 = vor.u32 %v2145_v54, %v2141_v47  ;;  %v6905_v34 = vcombine.low %v2094_v63, %v2104_v35  ;;  %v2151_v12 = vrot.slane %v2149_v16, 5  ;;  %v3312_v35 = vsel %vm6914_vm5, %v5071_v42, %v3311_v4  ;;  %v3206_v4 = vld [vmem:[#allocation2 + $0x3c] sm:$0xe]  ;;  %v6362_v40 = vld [vmem:[%s7295_s2 + $0x168] sm:$0xff]  }
  0x79   : > { %5665 = vmatprep.subr.bf16.mxu1 %v6352_v61  ;;  %v3315_v6 = vsel %vm6914_vm5, %v3313_v52, %v3314_v24  ;;  %v3325_v16 = vrot.slane %v3201_v28, 5  ;;  %v3335_v60 = vrot.slane %v3205_v41, 5  ;;  %v3346_v42 = vrot.slane %v3210_v43, 5  ;;  %v3216_v24 = vld [vmem:[#allocation2 + $0x64] sm:$0xf] }
  0x7a   : > { %v2147_v8 = vrot.slane %v2146_v49, 4  ;;  %v3200_v49 = vld [vmem:[#allocation2 + $0x24] sm:$0xe]  ;;  %v6944_v10 = vcombine.low %v3312_v35, %v3315_v6  ;;  %v5075_v45 = vrot.slane %v3206_v4, 9  ;;  %v5076_v28 = vrot.slane %v3209_v19, 9 }
  0x7b   : > { %v5073_v48 = vrot.slane %v3200_v49, 9  ;;  %v3348_v35 = vrot.slane %v3346_v42, 4  ;;  %v3214_v49 = vld [vmem:[#allocation2 + $0x5c] sm:$0x1]  ;;  %v6986_v41 = vld [vmem:[#allocation2 + $0xc0] sm:$0xff]  }
  0x7c   : > { %5666 = vmatpush3.bf16.msra.mxu1 %v6352_v61  ;;  %v3199_v61 = vld [vmem:[#allocation2 + $0x20] sm:$0x1]  ;;  %v3219_v4 = vld [vmem:[#allocation2 + $0x70] sm:$0xf] }
  0x7d   : > { %5667 = vmatprep.subr.bf16.mxu1 %v6354_v5  ;;  %v3321_v63 = vrot.slane %v3199_v61, 5  ;;  %v3367_v19 = vrot.slane %v3219_v4, 5  ;;  %v3229_v4 = vld [vmem:[#allocation2 + $0x98] sm:$0x1] }
  0x7e   : > { %5840 = vmatmul.mubr.bf16.gmra.mrb[24].mxu0 %v6905_v34 }
  0x7f   : > { %5636 = vmatmul.mubr.bf16.gmra.mrb[12].mxu1 %v6641_v62  ;;  %5843 = vmatprep.mubr.bf16.mxu0 %v6910_v14  ;;  %v2142_v62 = vsel %vm6551_vm2, %v2137_v58, %v2141_v47  ;;  %v5104_v47 = vcombine.low %v3305_v32, %v3308_v37  ;;  %v3327_v58 = vrot.slane %v3325_v16, 4  ;;  %v3211_v37 = vld [vmem:[#allocation2 + $0x50] sm:$0x1] }
  0x80   : > { %5639 = vmatprep.mubr.bf16.mxu1 %v6684_v36  ;;  %5668 = vmatpush3.bf16.msra.mxu1 %v6354_v5  ;;  %v2152_v36 = vsel %vm6551_vm2, %v2147_v8, %v2151_v12  ;;  %v3204_v5 = vld [vmem:[#allocation2 + $0x34] sm:$0xf]  ;;  %v3328_v8 = vrot.slane %v3202_v22, 5  ;;  %v6353_v12 = vld [vmem:[%s7295_s2 + $0x148] sm:$0xff]   ;;  %v3340_v22 = vsel %vm6914_vm5, %v5075_v45, %v3339_v25 }
  0x81   : > { %5669 = vmatprep.subr.bf16.mxu1 %v6357_v11  ;;  %v5061_v54 = vcombine.low %v2142_v62, %v2152_v36  ;;  %v3332_v31 = vrot.slane %v3204_v5, 5  ;;  %v3208_v62 = vld [vmem:[#allocation2 + $0x44] sm:$0x1]  ;;  %v6358_v5 = vld [vmem:[%s7295_s2 + $0x158] sm:$0xff]  }
  0x82   : > { %v3329_v36 = vsel %vm6914_vm5, %v3327_v58, %v3328_v8  ;;  %v3342_v61 = vrot.slane %v3208_v62, 5  ;;  %v3356_v58 = vrot.slane %v3214_v49, 5  ;;  %v6380_v62 = vld [vmem:[#allocation2 + $0x18] sm:$0xff]   ;;  %v3225_v49 = vld [vmem:[#allocation2 + $0x88] sm:$0xf] }
  0x83   : > { %v3334_v18 = vrot.slane %v3332_v31, 4 }
  0x84   : > { %5670 = vmatpush3.bf16.msra.mxu1 %v6357_v11 }
  0x85   : > { %5703 = vmatprep.subr.bf16.mxu1 %v6922_v23  ;;  %v3336_v32 = vsel %vm6914_vm5, %v3334_v18, %v3335_v60 }
  0x86   : > { %5844 = vmatmul.mubr.bf16.gmra.mrb[28].mxu0 %v5061_v54  ;;  %v3213_v54 = vld [vmem:[#allocation2 + $0x58] sm:$0xf] }
  0x87   : > { %5640 = vmatmul.mubr.bf16.gmra.mrb[16].mxu1 %v6694_v59  ;;  %5863 = vmatprep.mubr.bf16.mxu0 %v5104_v47  ;;  %v3322_v59 = vsel %vm6914_vm5, %v3320_v44, %v3321_v63  ;;  %v3341_v47 = vrot.slane %v3339_v25, 4  ;;  %v3349_v44 = vrot.slane %v3211_v37, 5  ;;  %v3212_v63 = vld [vmem:[#allocation2 + $0x54] sm:$0xe]  ;;  %v3353_v6 = vrot.slane %v3213_v54, 5 }
  0x88   : > { %5643 = vmatprep.mubr.bf16.mxu1 %v6703_v0  ;;  %v3203_v0 = vld [vmem:[#allocation2 + $0x30] sm:$0xe]  ;;  %v6946_v11 = vcombine.low %v3319_v57, %v3322_v59  ;;  %v3360_v57 = vrot.slane %v3216_v24, 5  ;;  %v3217_v59 = vld [vmem:[#allocation2 + $0x68] sm:$0x1] }
  0x89   : > { %v5074_v13 = vrot.slane %v3203_v0, 9  ;;  %v5077_v0 = vrot.slane %v3212_v63, 9  ;;  %v3363_v18 = vrot.slane %v3217_v59, 5  ;;  %v3222_v25 = vld [vmem:[#allocation2 + $0x7c] sm:$0xf] }
  0x8a   : > { %v3374_v45 = vrot.slane %v3222_v25, 5  ;;  %v3223_v54 = vld [vmem:[#allocation2 + $0x80] sm:$0x1]  ;;  %v6366_v63 = vld [vmem:[%s7295_s2 + $0x178] sm:$0xff]  }
  0x8b   : > { %v3377_v59 = vrot.slane %v3223_v54, 5  ;;  %v3234_v54 = vld [vmem:[#allocation2 + $0xac] sm:$0xf] }
  0x8e   : > { %5864 = vmatmul.mubr.bf16.vlgmr.msra.gmra.mrb[0].mxu0 %v6944_v10 }
  0x8f   : > { %5644 = vmatmul.mubr.bf16.gmra.mrb[20].mxu1 %v6705_v3  ;;  %5896 = vmatpush3.bf16.msra.mxu0 %v6848_v29  ;;  %v3326_v3 = vsel %vm6914_vm5, %v5073_v48, %v3325_v16  ;;  %v6355_v29 = vld [vmem:[%s7295_s2 + $0x150] sm:$0xff]   ;;  %v3215_v16 = vld [vmem:[#allocation2 + $0x60] sm:$0xe]  ;;  %v3355_v48 = vrot.slane %v3353_v6, 4 }
  0x90   : > { %5647 = vmatprep.mubr.bf16.mxu1 %v6730_v21  ;;  %5867 = vmatprep.mubr.bf16.mxu0 %v6946_v11  ;;  %v3333_v21 = vsel %vm6914_vm5, %v5074_v13, %v3332_v31  ;;  %v6967_v52 = vcombine.low %v3326_v3, %v3329_v36  ;;  %v3343_v31 = vsel %vm6914_vm5, %v3341_v47, %v3342_v61  ;;  %v5078_v8 = vrot.slane %v3215_v16, 9  ;;  %v3218_v3 = vld [vmem:[#allocation2 + $0x6c] sm:$0xe]  ;;  %v3220_v36 = vld [vmem:[#allocation2 + $0x74] sm:$0x1]  ;;  %v6381_v16 = vld [vmem:[#allocation2 + $0x24] sm:$0xff]  }
  0x91   : > { %5897 = vmatprep.subr.bf16.mxu0 %v6353_v12  ;;  %v6969_v38 = vcombine.low %v3333_v21, %v3336_v32  ;;  %v3362_v13 = vrot.slane %v3360_v57, 4  ;;  %v6991_v60 = vcombine.low %v3340_v22, %v3343_v31  ;;  %v3354_v21 = vsel %vm6914_vm5, %v5077_v0, %v3353_v6  ;;  %v6364_v61 = vld [vmem:[%s7295_s2 + $0x170] sm:$0xff]  }
  0x92   : > { %v3357_v32 = vsel %vm6914_vm5, %v3355_v48, %v3356_v58  ;;  %v3361_v37 = vsel %vm6914_vm5, %v5078_v8, %v3360_v57  ;;  %v5079_v47 = vrot.slane %v3218_v3, 9  ;;  %v3376_v57 = vrot.slane %v3374_v45, 4  ;;  %v6382_v22 = vld [vmem:[#allocation2 + $0x30] sm:$0xff]   ;;  %v3224_v48 = vld [vmem:[#allocation2 + $0x84] sm:$0xe]  ;;  %v6365_v3 = vld [vmem:[%s7295_s2 + $0x58] sm:$0xff]  }
  0x93   : > { %5898 = vmatpush3.bf16.msra.mxu0 %v6353_v12  ;;  %v6360_v12 = vld [vmem:[%s7295_s2 + $0x160] sm:$0xff]   ;;  %v7012_v24 = vcombine.low %v3354_v21, %v3357_v32  ;;  %v3228_v31 = vld [vmem:[#allocation2 + $0x94] sm:$0xf]  ;;  %v5081_v25 = vrot.slane %v3224_v48, 9 }
  0x94   : > { %5899 = vmatprep.subr.bf16.mxu0 %v6355_v29  ;;  %v3368_v0 = vsel %vm6914_vm5, %v5079_v47, %v3367_v19  ;;  %v3378_v8 = vsel %vm6914_vm5, %v3376_v57, %v3377_v59  ;;  %v6383_v32 = vld [vmem:[#allocation2 + $0x3c] sm:$0xff]   ;;  %v3402_v57 = vrot.slane %v3234_v54, 5  ;;  %v3233_v59 = vld [vmem:[#allocation2 + $0xa8] sm:$0xe] }
  0x95   : > { %v6367_v47 = vld [vmem:[%s7295_s2 + $0x60] sm:$0xff]  }
  0x96   : > { %5868 = vmatmul.mubr.bf16.gmra.mrb[4].mxu0 %v6967_v52 }
  0x97   : > { %5648 = vmatmul.mubr.bf16.gmra.mrb[24].mxu1 %v6732_v27  ;;  %5871 = vmatprep.mubr.bf16.mxu0 %v6969_v38  ;;  %v3347_v27 = vsel %vm6914_vm5, %v5076_v28, %v3346_v42  ;;  %v3364_v42 = vsel %vm6914_vm5, %v3362_v13, %v3363_v18  ;;  %v3370_v28 = vrot.slane %v3220_v36, 5  ;;  %v3388_v13 = vrot.slane %v3228_v31, 5  ;;  %v7039_v18 = vld [vmem:[%s7295_s2 + $0x200] sm:$0xff]  }
  0x98   : > { %5651 = vmatprep.mubr.bf16.mxu1 %v6758_v2  ;;  %5900 = vmatpush3.bf16.msra.mxu0 %v6355_v29  ;;  %v3350_v2 = vsel %vm6914_vm5, %v3348_v35, %v3349_v44  ;;  %v3221_v29 = vld [vmem:[#allocation2 + $0x78] sm:$0xe]  ;;  %v6361_v44 = vld [vmem:[%s7295_s2 + $0x48] sm:$0xff]   ;;  %v3369_v35 = vrot.slane %v3367_v19, 4 }
  0x99   : > { %5901 = vmatprep.subr.bf16.mxu0 %v6358_v5  ;;  %v6996_v43 = vcombine.low %v3347_v27, %v3350_v2  ;;  %v5080_v6 = vrot.slane %v3221_v29, 9  ;;  %v6363_v27 = vld [vmem:[%s7295_s2 + $0x50] sm:$0xff]  }
  0x9a   : > { %v3371_v2 = vsel %vm6914_vm5, %v3369_v35, %v3370_v28 }
  0x9b   : > { %v3375_v58 = vsel %vm6914_vm5, %v5080_v6, %v3374_v45  ;;  %v3231_v45 = vld [vmem:[#allocation2 + $0xa0] sm:$0xf] }
  0x9c   : > { %5902 = vmatpush3.bf16.msra.mxu0 %v6358_v5  ;;  %v7020_v5 = vcombine.low %v3361_v37, %v3364_v42  ;;  %v7046_v36 = vcombine.low %v3375_v58, %v3378_v8  ;;  %v3390_v37 = vrot.slane %v3388_v13, 4  ;;  %v3391_v42 = vrot.slane %v3229_v4, 5  ;;  %v6385_v58 = vld [vmem:[#allocation2 + $0x54] sm:$0xff]   ;;  %v6386_v4 = vld [vmem:[#allocation2 + $0x60] sm:$0xff]  }
  0x9d   : > { %5903 = vmatprep.subr.bf16.mxu0 %v6360_v12  ;;  %v5084_v8 = vrot.slane %v3233_v59, 9  ;;  %v1664_v59 = vld [vmem:[#allocation2] sm:$0xf] }
  0x9e   : > { %5872 = vmatmul.mubr.bf16.gmra.mrb[8].mxu0 %v6991_v60  ;;  %v3392_v6 = vsel %vm6914_vm5, %v3390_v37, %v3391_v42  ;;  %v3236_v37 = vld [vmem:[#allocation2 + $0xb4] sm:$0xe]  ;;  %v3238_v42 = vld [vmem:[#allocation2 + $0xbc] sm:$0x1] }
  0x9f   : > { %5652 = vmatmul.mubr.bf16.gmra.mrb[28].mxu1 %v6986_v41  ;;  %5875 = vmatprep.mubr.bf16.mxu0 %v6996_v43 }
  0xa0   : > { %5671 = vmatprep.mubr.bf16.mxu1 %v6380_v62  ;;  %5904 = vmatpush3.bf16.msra.mxu0 %v6360_v12  ;;  %v3226_v12 = vld [vmem:[#allocation2 + $0x8c] sm:$0x1]  ;;  %v7041_v62 = vcombine.low %v3368_v0, %v3371_v2 }
  0xa1   : > { %5905 = vmatprep.subr.bf16.mxu0 %v6362_v40  ;;  %v3384_v21 = vrot.slane %v3226_v12, 5  ;;  %v3404_v12 = vrot.slane %v3402_v57, 4 }
  0xa4   : > { %5906 = vmatpush3.bf16.msra.mxu0 %v6362_v40  ;;  %v3227_v40 = vld [vmem:[#allocation2 + $0x90] sm:$0xe] }
  0xa5   : > { %5907 = vmatprep.subr.bf16.mxu0 %v6364_v61  ;;  %v5082_v29 = vrot.slane %v3227_v40, 9  ;;  %v3237_v40 = vld [vmem:[#allocation2 + $0xb8] sm:$0xf] }
  0xa6   : > { %5876 = vmatmul.mubr.bf16.gmra.mrb[12].mxu0 %v7012_v24 }
  0xa7   : > { %5672 = vmatmul.mubr.bf16.vlgmr.msra.gmra.mrb[0].mxu1 %v6381_v16  ;;  %5879 = vmatprep.mubr.bf16.mxu0 %v7020_v5  ;;  %v3389_v35 = vsel %vm6914_vm5, %v5082_v29, %v3388_v13  ;;  %v3232_v16 = vld [vmem:[#allocation2 + $0xa4] sm:$0x1] }
  0xa8   : > { %5704 = vmatpush3.bf16.msra.mxu1 %v6922_v23  ;;  %5675 = vmatprep.mubr.bf16.mxu1 %v6382_v22  ;;  %v3381_v23 = vrot.slane %v3225_v49, 5  ;;  %v3230_v49 = vld [vmem:[#allocation2 + $0x9c] sm:$0xe]  ;;  %v3235_v22 = vld [vmem:[#allocation2 + $0xb0] sm:$0x1]  ;;  %v7067_v0 = vcombine.low %v3389_v35, %v3392_v6 }
  0xa9   : > { %5705 = vmatprep.subr.bf16.mxu1 %v6361_v44  ;;  %5908 = vmatpush3.bf16.msra.mxu0 %v6364_v61  ;;  %v6384_v61 = vld [vmem:[#allocation2 + $0x48] sm:$0xff]   ;;  %v5083_v2 = vrot.slane %v3230_v49, 9  ;;  %v3405_v13 = vrot.slane %v3235_v22, 5  ;;  %v6388_v35 = vld [vmem:[#allocation2 + $0x78] sm:$0xff]   ;;  %v1665_v22 = vld [vmem:[#allocation2 + $0x4] sm:$0xf] }
  0xaa   : > { %5909 = vmatprep.subr.bf16.mxu0 %v6366_v63  ;;  %v3383_v19 = vrot.slane %v3381_v23, 4  ;;  %v3382_v28 = vsel %vm6914_vm5, %v5081_v25, %v3381_v23  ;;  %v3398_v23 = vrot.slane %v3232_v16, 5 }
  0xab   : > { %v3406_v29 = vsel %vm6914_vm5, %v3404_v12, %v3405_v13 }
  0xac   : > { %5706 = vmatpush3.bf16.msra.mxu1 %v6361_v44  ;;  %v3385_v44 = vsel %vm6914_vm5, %v3383_v19, %v3384_v21  ;;  %v3409_v21 = vrot.slane %v3237_v40, 5 }
  0xad   : > { %5707 = vmatprep.subr.bf16.mxu1 %v6363_v27  ;;  %5910 = vmatpush3.bf16.msra.mxu0 %v6366_v63  ;;  %v3395_v63 = vrot.slane %v3231_v45, 5  ;;  %v7062_v31 = vcombine.low %v3382_v28, %v3385_v44  ;;  %v3412_v44 = vrot.slane %v3238_v42, 5 }
  0xae   : > { %5943 = vmatprep.subr.bf16.mxu0 %v7039_v18  ;;  %5880 = vmatmul.mubr.bf16.gmra.mrb[16].mxu0 %v7041_v62  ;;  %v3411_v28 = vrot.slane %v3409_v21, 4 }
  0xaf   : > { %5676 = vmatmul.mubr.bf16.gmra.mrb[4].mxu1 %v6383_v32  ;;  %5883 = vmatprep.mubr.bf16.mxu0 %v7046_v36  ;;  %v3397_v48 = vrot.slane %v3395_v63, 4  ;;  %v3396_v25 = vsel %vm6914_vm5, %v5083_v2, %v3395_v63  ;;  %v3403_v32 = vsel %vm6914_vm5, %v5084_v8, %v3402_v57  ;;  %v6387_v63 = vld [vmem:[#allocation2 + $0x6c] sm:$0xff]   ;;  %v7100_v57 = vld [vmem:[%s7295_s2 + $0x100] sm:$0xff]   ;;  %v1735_v8 = vshrl.u32 %v1665_v22, 16 }
  0xb0   : > { %5679 = vmatprep.mubr.bf16.mxu1 %v6384_v61  ;;  %5708 = vmatpush3.bf16.msra.mxu1 %v6363_v27  ;;  %v6369_v27 = vld [vmem:[%s7295_s2 + $0x68] sm:$0xff]   ;;  %v6374_v61 = vld [vmem:[%s7295_s2 + $0x78] sm:$0xff]   ;;  %v7087_v54 = vcombine.low %v3403_v32, %v3406_v29  ;;  %v3413_v49 = vsel %vm6914_vm5, %v3411_v28, %v3412_v44  ;;  %v6391_v2 = vld [vmem:[#allocation2 + $0x90] sm:$0xff]  }
  0xb1   : > { %5709 = vmatprep.subr.bf16.mxu1 %v6365_v3  ;;  %v3399_v19 = vsel %vm6914_vm5, %v3397_v48, %v3398_v23  ;;  %v1722_v48 = vshrl.u32 %v1664_v59, 16  ;;  %v1725_v23 = vshll.u32 %v1664_v59, 16  ;;  %v6394_v28 = vld [vmem:[#allocation2 + $0xb4] sm:$0xff]  }
  0xb2   : > { %v7082_v45 = vcombine.low %v3396_v25, %v3399_v19  ;;  %v6392_v25 = vld [vmem:[#allocation2 + $0x9c] sm:$0xff]   ;;  %v6370_v19 = vld [vmem:[%s7295_s2 + $0x208] sm:$0xff]  }
  0xb3   : > { %v1724_v12 = vrot.slane %v1722_v48, 4  ;;  %v1727_v13 = vrot.slane %v1725_v23, 5  ;;  %v6375_v44 = vld [vmem:[%s7295_s2 + $0x218] sm:$0xff]   ;;  %v3241_v48 = vld [vmem:[#allocation2 + $0xc8] sm:$0x1] }
  0xb4   : > { %5710 = vmatpush3.bf16.msra.mxu1 %v6365_v3  ;;  %v6371_v3 = vld [vmem:[%s7295_s2 + $0x70] sm:$0xff]   ;;  %v6379_v59 = vld [vmem:[%s7295_s2 + $0x238] sm:$0xff]  }
  0xb5   : > { %5711 = vmatprep.subr.bf16.mxu1 %v6367_v47  ;;  %v1728_v32 = vor.u32 %v1727_v13, %v1724_v12 }
  0xb6   : > { %5884 = vmatmul.mubr.bf16.gmra.mrb[20].mxu0 %v7062_v31 }
  0xb7   : > { %5680 = vmatmul.mubr.bf16.gmra.mrb[8].mxu1 %v6385_v58  ;;  %5887 = vmatprep.mubr.bf16.mxu0 %v7067_v0  ;;  %v1731_v58 = vshll.u32 %v1665_v22, 16  ;;  %v1729_v42 = vrot.slane %v1728_v32, 4  ;;  %v6395_v22 = vld [vmem:[%s7295_s2 + $0x108] sm:$0xff]  }
  0xb8   : > { %5683 = vmatprep.mubr.bf16.mxu1 %v6386_v4  ;;  %5712 = vmatpush3.bf16.msra.mxu1 %v6367_v47  ;;  %v5085_v47 = vrot.slane %v3236_v37, 9  ;;  %v1737_v4 = vrot.slane %v1735_v8, 4  ;;  %v6401_v8 = vld [vmem:[%s7295_s2 + $0x138] sm:$0xff]  }
  0xb9   : > { %5713 = vmatprep.subr.bf16.mxu1 %v6369_v27  ;;  %v1733_v40 = vrot.slane %v1731_v58, 5  ;;  %v3419_v58 = vrot.slane %v3241_v48, 5 }
  0xba   : > { %v3410_v6 = vsel %vm6914_vm5, %v5085_v47, %v3409_v21  ;;  %v6393_v21 = vld [vmem:[#allocation2 + $0xa8] sm:$0xff]  }
  0xbb   : > { %v7095_v16 = vcombine.low %v3410_v6, %v3413_v49  ;;  %v1738_v29 = vor.u32 %v1737_v4, %v1733_v40  ;;  %v6376_v6 = vld [vmem:[%s7295_s2 + $0x220] sm:$0xff]  }
  0xbc   : > { %5714 = vmatpush3.bf16.msra.mxu1 %v6369_v27  ;;  %v6390_v27 = vld [vmem:[#allocation2 + $0x84] sm:$0xff]  }
  0xbd   : > { %5715 = vmatprep.subr.bf16.mxu1 %v6371_v3 }
  0xbe   : > { %5888 = vmatmul.mubr.bf16.gmra.mrb[24].mxu0 %v7082_v45 }
  0xbf   : > { %5684 = vmatmul.mubr.bf16.gmra.mrb[12].mxu1 %v6387_v63  ;;  %5891 = vmatprep.mubr.bf16.mxu0 %v7087_v54 }
  0xc0   : > { %5687 = vmatprep.mubr.bf16.mxu1 %v6388_v35  ;;  %5716 = vmatpush3.bf16.msra.mxu1 %v6371_v3  ;;  %v1666_v3 = vld [vmem:[#allocation2 + $0x8] sm:$0x1]  ;;  %v6373_v35 = vld [vmem:[#allocation2 + $0xcc] sm:$0xff]  }
  0xc1   : > { %5717 = vmatprep.subr.bf16.mxu1 %v6374_v61  ;;  %v1741_v37 = vshll.u32 %v1666_v3, 16 }
  0xc3   : > { %v1743_v47 = vrot.slane %v1741_v37, 5 }
  0xc4   : > { %5718 = vmatpush3.bf16.msra.mxu1 %v6374_v61  ;;  %v1739_v61 = vrot.slane %v1738_v29, 4 }
  0xc5   : > { %5991 = vmatprep.subr.bf16.mxu1 %v7100_v57 }
  0xc6   : > { %5892 = vmatmul.mubr.bf16.gmra.mrb[28].mxu0 %v7095_v16  ;;  %v1744_v63 = vsel %vm6551_vm2, %v1739_v61, %v1743_v47 }
  0xc7   : > { %5688 = vmatmul.mubr.bf16.gmra.mrb[16].mxu1 %v6390_v27  ;;  %5911 = vmatprep.mubr.bf16.mxu0 %v6944_v10  ;;  %v6372_v10 = vld [vmem:[%s7295_s2 + $0x210] sm:$0xff]  }
  0xc8   : > { %5691 = vmatprep.mubr.bf16.mxu1 %v6391_v2  ;;  %v3239_v2 = vld [vmem:[#allocation2 + $0xc0] sm:$0xe] }
  0xce   : > { %5912 = vmatmul.mubr.bf16.vlgmr.msra.gmra.mrb[0].mxu0 %v6946_v11 }
  0xcf   : > { %5692 = vmatmul.mubr.bf16.gmra.mrb[20].mxu1 %v6392_v25  ;;  %5944 = vmatpush3.bf16.msra.mxu0 %v7039_v18  ;;  %v1734_v18 = vsel %vm6551_vm2, %v1729_v42, %v1733_v40  ;;  %v7224_v25 = vld [vmem:[%s7296_s3] ss:$0 sm:$0xff] }
  0xd0   : > { %5695 = vmatprep.mubr.bf16.mxu1 %v6393_v21  ;;  %5915 = vmatprep.mubr.bf16.mxu0 %v6967_v52  ;;  %v4996_v49 = vcombine.low %v1734_v18, %v1744_v63 }
  0xd1   : > { %5945 = vmatprep.subr.bf16.mxu0 %v6370_v19 }
  0xd3   : > { %5946 = vmatpush3.bf16.msra.mxu0 %v6370_v19 }
  0xd4   : > { %5947 = vmatprep.subr.bf16.mxu0 %v6372_v10 }
  0xd6   : > { %5916 = vmatmul.mubr.bf16.gmra.mrb[4].mxu0 %v6969_v38 }
  0xd7   : > { %5696 = vmatmul.mubr.bf16.gmra.mrb[24].mxu1 %v6394_v28  ;;  %5919 = vmatprep.mubr.bf16.mxu0 %v6991_v60 }
  0xd8   : > { %5699 = vmatprep.mubr.bf16.mxu1 %v6986_v41  ;;  %5948 = vmatpush3.bf16.msra.mxu0 %v6372_v10  ;;  %v6377_v41 = vld [vmem:[%s7295_s2 + $0x228] sm:$0xff]  }
  0xd9   : > { %5949 = vmatprep.subr.bf16.mxu0 %v6375_v44 }
  0xdc   : > { %5950 = vmatpush3.bf16.msra.mxu0 %v6375_v44 }
  0xdd   : > { %5951 = vmatprep.subr.bf16.mxu0 %v6376_v6 }
  0xde   : > { %5920 = vmatmul.mubr.bf16.gmra.mrb[8].mxu0 %v6996_v43 }
  0xdf   : > { %5700 = vmatmul.mubr.bf16.gmra.mrb[28].mxu1 %v6373_v35  ;;  %5923 = vmatprep.mubr.bf16.mxu0 %v7012_v24 }
  0xe0   : > { %5719 = vmatprep.mubr.bf16.mxu1 %v4996_v49  ;;  %5952 = vmatpush3.bf16.msra.mxu0 %v6376_v6 }
  0xe1   : > { %5953 = vmatprep.subr.bf16.mxu0 %v6377_v41 }
  0xe4   : > { %5954 = vmatpush3.bf16.msra.mxu0 %v6377_v41 }
  0xe5   : > { %5955 = vmatprep.subr.bf16.mxu0 %v6378_v53 }
  0xe6   : > { %5924 = vmatmul.mubr.bf16.gmra.mrb[12].mxu0 %v7020_v5 }
  0xe7   : > { %5720 = vmatmul.mubr.bf16.vlgmr.msra.gmra.mrb[0].mxu1 %v6563_v9  ;;  %5927 = vmatprep.mubr.bf16.mxu0 %v7041_v62  ;;  %v6396_v9 = vld [vmem:[%s7295_s2 + $0x110] sm:$0xff]  }
  0xe8   : > { %5999 = vmatpush3.bf16.msra.mxu1 %v7100_v57  ;;  %5723 = vmatprep.mubr.bf16.mxu1 %v6576_v30  ;;  %v6397_v30 = vld [vmem:[%s7295_s2 + $0x118] sm:$0xff]   ;;  %v6398_v57 = vld [vmem:[%s7295_s2 + $0x120] sm:$0xff]  }
  0xe9   : > { %5992 = vmatprep.subr.bf16.mxu1 %v6395_v22  ;;  %5956 = vmatpush3.bf16.msra.mxu0 %v6378_v53 }
  0xea   : > { %5957 = vmatprep.subr.bf16.mxu0 %v6379_v59 }
  0xec   : > { %6000 = vmatpush3.bf16.msra.mxu1 %v6395_v22 }
  0xed   : > { %5993 = vmatprep.subr.bf16.mxu1 %v6396_v9  ;;  %5958 = vmatpush3.bf16.msra.mxu0 %v6379_v59 }
  0xee   : > { %5928 = vmatmul.mubr.bf16.gmra.mrb[16].mxu0 %v7046_v36 }
  0xef   : > { %5724 = vmatmul.mubr.bf16.gmra.mrb[4].mxu1 %v6596_v50  ;;  %5931 = vmatprep.mubr.bf16.mxu0 %v7062_v31  ;;  %v3240_v50 = vld [vmem:[#allocation2 + $0xc4] sm:$0xf] }
  0xf0   : > { %5727 = vmatprep.mubr.bf16.mxu1 %v6615_v1  ;;  %6001 = vmatpush3.bf16.msra.mxu1 %v6396_v9  ;;  %v6399_v1 = vld [vmem:[%s7295_s2 + $0x128] sm:$0xff]   ;;  %v3416_v27 = vrot.slane %v3240_v50, 5 }
  0xf1   : > { %5994 = vmatprep.subr.bf16.mxu1 %v6397_v30 }
  0xf2   : > { %v3418_v23 = vrot.slane %v3416_v27, 4 }
  0xf4   : > { %6002 = vmatpush3.bf16.msra.mxu1 %v6397_v30  ;;  %v3420_v13 = vsel %vm6914_vm5, %v3418_v23, %v3419_v58 }
  0xf5   : > { %5995 = vmatprep.subr.bf16.mxu1 %v6398_v57 }
  0xf6   : > { %5932 = vmatmul.mubr.bf16.gmra.mrb[20].mxu0 %v7067_v0 }
  0xf7   : > { %5728 = vmatmul.mubr.bf16.gmra.mrb[8].mxu1 %v6639_v56  ;;  %5935 = vmatprep.mubr.bf16.mxu0 %v7082_v45  ;;  %v6400_v56 = vld [vmem:[%s7295_s2 + $0x130] sm:$0xff]  }
  0xf8   : > { %5731 = vmatprep.mubr.bf16.mxu1 %v6653_v17  ;;  %6003 = vmatpush3.bf16.msra.mxu1 %v6398_v57  ;;  %v5086_v17 = vrot.slane %v3239_v2, 9 }
  0xf9   : > { %5996 = vmatprep.subr.bf16.mxu1 %v6399_v1 }
  0xfa   : > { %v3417_v12 = vsel %vm6914_vm5, %v5086_v17, %v3416_v27 }
  0xfc   : > { %6004 = vmatpush3.bf16.msra.mxu1 %v6399_v1 }
  0xfd   : > { %5997 = vmatprep.subr.bf16.mxu1 %v6400_v56 }
  0xfe   : > { %5936 = vmatmul.mubr.bf16.gmra.mrb[24].mxu0 %v7087_v54 }
  0xff   : > { %5732 = vmatmul.mubr.bf16.gmra.mrb[12].mxu1 %v6671_v39  ;;  %5939 = vmatprep.mubr.bf16.mxu0 %v7095_v16  ;;  %v5144_v39 = vcombine.low %v3417_v12, %v3420_v13 }
 0x100   : > { %5735 = vmatprep.mubr.bf16.mxu1 %v6690_v55  ;;  %6005 = vmatpush3.bf16.msra.mxu1 %v6400_v56  ;;  %v3243_v55 = vld [vmem:[#allocation2 + $0xd0] sm:$0xf] }
 0x101   : > { %5998 = vmatprep.subr.bf16.mxu1 %v6401_v8 }
 0x104   : > { %6006 = vmatpush3.bf16.msra.mxu1 %v6401_v8 }
 0x106   : > { %5940 = vmatmul.mubr.bf16.gmra.mrb[28].mxu0 %v5144_v39 }
 0x107   : > { %5736 = vmatmul.mubr.bf16.gmra.mrb[16].mxu1 %v6808_v15  ;;  %5959 = vmatprep.mubr.bf16.mxu0 %v6946_v11 }
 0x108   : > { %5739 = vmatprep.mubr.bf16.mxu1 %v6810_v33 }
 0x10e   : > { %5960 = vmatmul.mubr.bf16.vlgmr.msra.gmra.mrb[0].mxu0 %v6967_v52 }
 0x10f   : > { %5740 = vmatmul.mubr.bf16.gmra.mrb[20].mxu1 %v6850_v7  ;;  %5963 = vmatprep.mubr.bf16.mxu0 %v6969_v38 }
 0x110   : > { %5743 = vmatprep.mubr.bf16.mxu1 %v6854_v51 }
 0x116   : > { %5964 = vmatmul.mubr.bf16.gmra.mrb[4].mxu0 %v6991_v60 }
 0x117   : > { %5744 = vmatmul.mubr.bf16.gmra.mrb[24].mxu1 %v6881_v26  ;;  %5967 = vmatprep.mubr.bf16.mxu0 %v6996_v43 }
 0x118   : > { %5747 = vmatprep.mubr.bf16.mxu1 %v6886_v46 }
 0x11e   : > { %5968 = vmatmul.mubr.bf16.gmra.mrb[8].mxu0 %v7012_v24 }
 0x11f   : > { %5748 = vmatmul.mubr.bf16.gmra.mrb[28].mxu1 %v6905_v34  ;;  %5971 = vmatprep.mubr.bf16.mxu0 %v7020_v5 }
 0x120   : > { %5783 = vmatprep.mubr.bf16.mxu1 %v6808_v15  ;;  %v3423_v15 = vrot.slane %v3243_v55, 5 }
 0x126   : > { %5972 = vmatmul.mubr.bf16.gmra.mrb[12].mxu0 %v7041_v62 }
 0x127   : > { %5784 = vmatmul.mubr.bf16.vlgmr.msra.gmra.mrb[16].mxu1 %v6810_v33  ;;  %5975 = vmatprep.mubr.bf16.mxu0 %v7046_v36  ;;  %v3242_v33 = vld [vmem:[#allocation2 + $0xcc] sm:$0xe] }
 0x128   : > { %5787 = vmatprep.mubr.bf16.mxu1 %v6850_v7  ;;  %v3244_v7 = vld [vmem:[#allocation2 + $0xd4] sm:$0x1]  ;;  %v5087_v11 = vrot.slane %v3242_v33, 9 }
 0x129   : > { %v3426_v52 = vrot.slane %v3244_v7, 5 }
 0x12e   : > { %5976 = vmatmul.mubr.bf16.gmra.mrb[16].mxu0 %v7062_v31 }
 0x12f   : > { %5788 = vmatmul.mubr.bf16.gmra.mrb[20].mxu1 %v6854_v51  ;;  %5979 = vmatprep.mubr.bf16.mxu0 %v7067_v0  ;;  %v3425_v51 = vrot.slane %v3423_v15, 4 }
 0x130   : > { %5791 = vmatprep.mubr.bf16.mxu1 %v6881_v26  ;;  %v3424_v26 = vsel %vm6914_vm5, %v5087_v11, %v3423_v15 }
 0x136   : > { %5980 = vmatmul.mubr.bf16.gmra.mrb[20].mxu0 %v7082_v45 }
 0x137   : > { %5792 = vmatmul.mubr.bf16.gmra.mrb[24].mxu1 %v6886_v46  ;;  %5983 = vmatprep.mubr.bf16.mxu0 %v7087_v54  ;;  %v3427_v46 = vsel %vm6914_vm5, %v3425_v51, %v3426_v52 }
 0x138   : > { %5795 = vmatprep.mubr.bf16.mxu1 %v6905_v34  ;;  %v5169_v34 = vcombine.low %v3424_v26, %v3427_v46 }
 0x13e   : > { %5984 = vmatmul.mubr.bf16.gmra.mrb[24].mxu0 %v7095_v16 }
 0x13f   : > { %5796 = vmatmul.mubr.bf16.gmra.mrb[28].mxu1 %v6910_v14  ;;  %5987 = vmatprep.mubr.bf16.mxu0 %v5144_v39 }
 0x146   : > { %5988 = vmatmul.mubr.bf16.gmra.mrb[28].mxu0 %v5169_v34 }
 0x1ba   : > { %v5721_v38 = vpop.f32.mrb[0].mxu1 }
 0x1bb   : > { %v2348_v60 = vpop.f32.mrb[1].mxu1 }
 0x1bc   : > { %v5722_v43 = vpop.f32.mrb[2].mxu1 }
 0x1bd   : > { %v2351_v24 = vpop.f32.mrb[3].mxu1 }
 0x1c2   : > { %v5725_v5 = vpop.f32.mrb[4].mxu1 }
 0x1c3   : > { %v2364_v62 = vpop.f32.mrb[5].mxu1 }
 0x1c4   : > { %v5726_v36 = vpop.f32.mrb[6].mxu1 }
 0x1c5   : > { %v2367_v31 = vpop.f32.mrb[7].mxu1 }
 0x1ca   : > { %v5729_v14 = vpop.f32.mrb[8].mxu1 }
 0x1cb   : > { %v2380_v0 = vpop.f32.mrb[9].mxu1 }
 0x1cc   : > { %v5730_v45 = vpop.f32.mrb[10].mxu1 }
 0x1cd   : > { %v2383_v54 = vpop.f32.mrb[11].mxu1 }
 0x1d2   : > { %v7213_v16 = vpop.f32.mrb[12].mxu1 }
 0x1d3   : > { %v7215_v40 = vpop.f32.mrb[13].mxu1 }
 0x1d4   : > { %v7217_v20 = vpop.f32.mrb[14].mxu1 }
 0x1d5   : > { %v7219_v4 = vpop.f32.mrb[15].mxu1 }
 0x1e1   : > { %v5961_v3 = vpop.f32.mrb[0].mxu0 }
 0x1e2   : > { %v6007_v19 = vadd.f32 %v5961_v3, %v5721_v38  ;;  %v4275_v21 = vpop.f32.mrb[1].mxu0 }
 0x1e3   : > { %v6008_v32 = vadd.f32 %v4275_v21, %v2348_v60  ;;  %v5962_v29 = vpop.f32.mrb[2].mxu0 }
 0x1e4   : > { %v4510_v37 = vadd.f32 %v6007_v19, %v7224_v25  ;;  %v6009_v10 = vadd.f32 %v5962_v29, %v5722_v43  ;;  %v4278_v42 = vpop.f32.mrb[3].mxu0 }
 0x1e5   : > { %v4508_v61 = vadd.f32 %v6008_v32, %v7224_v25  ;;  %v6010_v47 = vadd.f32 %v4278_v42, %v2351_v24 }
 0x1e6   : > { %v4511_v28 = vadd.f32 %v6009_v10, %v7224_v25  ;;  %v4542_v18 = vmax.f32 %v4510_v37, 0.0 }
 0x1e7   : > { %v4509_v44 = vadd.f32 %v6010_v47, %v7224_v25  ;;  %v4540_v35 = vmax.f32 %v4508_v61, 0.0 }
 0x1e8   : > { %v4543_v63 = vmax.f32 %v4511_v28, 0.0 }
 0x1e9   : > { %v4541_v6 = vmax.f32 %v4509_v44, 0.0  ;;  %v5965_v49 = vpop.f32.mrb[4].mxu0 }
 0x1ea   : > { %v5256_v41 = vpack.c.bf16 %v4543_v63, %v4542_v18  ;;  %v6011_v53 = vadd.f32 %v5965_v49, %v5725_v5  ;;  %v4291_v59 = vpop.f32.mrb[5].mxu0 }
 0x1eb   : > { %v5251_v22 = vpack.c.bf16 %v4541_v6, %v4540_v35  ;;  %v6012_v9 = vadd.f32 %v4291_v59, %v2364_v62  ;;  %v5966_v30 = vpop.f32.mrb[6].mxu0 }
 0x1ec   : > { %5328 = vst [vmem:[%s7234_s21 + $0x8] sm:$0xff] %v5256_v41   ;;  %v4514_v57 = vadd.f32 %v6011_v53, %v7224_v25  ;;  %v6013_v50 = vadd.f32 %v5966_v30, %v5726_v36  ;;  %v4294_v1 = vpop.f32.mrb[7].mxu0 }
 0x1ed   : > { %5252 = vst [vmem:[%s7234_s21] sm:$0xff] %v5251_v22   ;;  %v4512_v27 = vadd.f32 %v6012_v9, %v7224_v25  ;;  %v6014_v2 = vadd.f32 %v4294_v1, %v2367_v31 }
 0x1ee   : > { %v4515_v48 = vadd.f32 %v6013_v50, %v7224_v25  ;;  %v4546_v17 = vmax.f32 %v4514_v57, 0.0 }
 0x1ef   : > { %v4513_v56 = vadd.f32 %v6014_v2, %v7224_v25  ;;  %v4544_v58 = vmax.f32 %v4512_v27, 0.0 }
 0x1f0   : > { %v4547_v23 = vmax.f32 %v4515_v48, 0.0 }
 0x1f1   : > { %v4545_v8 = vmax.f32 %v4513_v56, 0.0  ;;  %v5969_v12 = vpop.f32.mrb[8].mxu0 }
 0x1f2   : > { %v5266_v13 = vpack.c.bf16 %v4547_v23, %v4546_v17  ;;  %v6015_v39 = vadd.f32 %v5969_v12, %v5729_v14  ;;  %v4307_v55 = vpop.f32.mrb[9].mxu0 }
 0x1f3   : > { %v5261_v15 = vpack.c.bf16 %v4545_v8, %v4544_v58  ;;  %v6016_v33 = vadd.f32 %v4307_v55, %v2380_v0  ;;  %v5970_v7 = vpop.f32.mrb[10].mxu0 }
 0x1f4   : > { %5330 = vst [vmem:[%s7234_s21 + $0x18] sm:$0xff] %v5266_v13   ;;  %v4518_v11 = vadd.f32 %v6015_v39, %v7224_v25  ;;  %v6017_v51 = vadd.f32 %v5970_v7, %v5730_v45  ;;  %v4310_v52 = vpop.f32.mrb[11].mxu0 }
 0x1f5   : > { %5329 = vst [vmem:[%s7234_s21 + $0x10] sm:$0xff] %v5261_v15   ;;  %v4516_v26 = vadd.f32 %v6016_v33, %v7224_v25  ;;  %v6018_v46 = vadd.f32 %v4310_v52, %v2383_v54 }
 0x1f6   : > { %v4519_v34 = vadd.f32 %v6017_v51, %v7224_v25  ;;  %v4550_v43 = vmax.f32 %v4518_v11, 0.0 }
 0x1f7   : > { %v4517_v38 = vadd.f32 %v6018_v46, %v7224_v25  ;;  %v4548_v62 = vmax.f32 %v4516_v26, 0.0 }
 0x1f8   : > { %v4551_v24 = vmax.f32 %v4519_v34, 0.0 }
 0x1f9   : > { %v4549_v36 = vmax.f32 %v4517_v38, 0.0  ;;  %v5973_v31 = vpop.f32.mrb[12].mxu0 }
 0x1fa   : > { %v5785_v60 = vpop.f32.mrb[16].mxu1  ;;  %v5276_v0 = vpack.c.bf16 %v4551_v24, %v4550_v43  ;;  %v6019_v45 = vadd.f32 %v5973_v31, %v7213_v16  ;;  %v4323_v3 = vpop.f32.mrb[13].mxu0 }
 0x1fb   : > { %v2738_v5 = vpop.f32.mrb[17].mxu1  ;;  %v5271_v54 = vpack.c.bf16 %v4549_v36, %v4548_v62  ;;  %v6020_v21 = vadd.f32 %v4323_v3, %v7215_v40  ;;  %v5974_v32 = vpop.f32.mrb[14].mxu0 }
 0x1fc   : > { %v5786_v14 = vpop.f32.mrb[18].mxu1  ;;  %5332 = vst [vmem:[%s7234_s21 + $0x28] sm:$0xff] %v5276_v0   ;;  %v4522_v29 = vadd.f32 %v6019_v45, %v7224_v25  ;;  %v6021_v37 = vadd.f32 %v5974_v32, %v7217_v20  ;;  %v4326_v10 = vpop.f32.mrb[15].mxu0 }
 0x1fd   : > { %v2741_v19 = vpop.f32.mrb[19].mxu1  ;;  %5331 = vst [vmem:[%s7234_s21 + $0x20] sm:$0xff] %v5271_v54   ;;  %v4520_v42 = vadd.f32 %v6020_v21, %v7224_v25  ;;  %v6022_v61 = vadd.f32 %v4326_v10, %v7219_v4 }
 0x1fe   : > { %v4523_v47 = vadd.f32 %v6021_v37, %v7224_v25  ;;  %v4554_v44 = vmax.f32 %v4522_v29, 0.0 }
 0x1ff   : > { %v4521_v16 = vadd.f32 %v6022_v61, %v7224_v25  ;;  %v4552_v63 = vmax.f32 %v4520_v42, 0.0 }
 0x200   : > { %v4555_v40 = vmax.f32 %v4523_v47, 0.0 }
 0x201   : > { %v4553_v35 = vmax.f32 %v4521_v16, 0.0  ;;  %v5977_v6 = vpop.f32.mrb[16].mxu0 }
 0x202   : > { %v5789_v28 = vpop.f32.mrb[20].mxu1  ;;  %v5286_v49 = vpack.c.bf16 %v4555_v40, %v4554_v44  ;;  %v6023_v41 = vadd.f32 %v5977_v6, %v5785_v60  ;;  %v4339_v53 = vpop.f32.mrb[17].mxu0 }
 0x203   : > { %v2754_v18 = vpop.f32.mrb[21].mxu1  ;;  %v5281_v22 = vpack.c.bf16 %v4553_v35, %v4552_v63  ;;  %v6024_v4 = vadd.f32 %v4339_v53, %v2738_v5  ;;  %v5978_v9 = vpop.f32.mrb[18].mxu0 }
 0x204   : > { %v5790_v20 = vpop.f32.mrb[22].mxu1  ;;  %5334 = vst [vmem:[%s7234_s21 + $0x38] sm:$0xff] %v5286_v49   ;;  %v4526_v30 = vadd.f32 %v6023_v41, %v7224_v25  ;;  %v6025_v57 = vadd.f32 %v5978_v9, %v5786_v14  ;;  %v4342_v50 = vpop.f32.mrb[19].mxu0 }
 0x205   : > { %v2757_v59 = vpop.f32.mrb[23].mxu1  ;;  %5333 = vst [vmem:[%s7234_s21 + $0x30] sm:$0xff] %v5281_v22   ;;  %v4524_v1 = vadd.f32 %v6024_v4, %v7224_v25  ;;  %v6026_v27 = vadd.f32 %v4342_v50, %v2741_v19 }
 0x206   : > { %v4527_v2 = vadd.f32 %v6025_v57, %v7224_v25  ;;  %v4558_v17 = vmax.f32 %v4526_v30, 0.0 }
 0x207   : > { %v4525_v48 = vadd.f32 %v6026_v27, %v7224_v25  ;;  %v4556_v8 = vmax.f32 %v4524_v1, 0.0 }
 0x208   : > { %v4559_v23 = vmax.f32 %v4527_v2, 0.0 }
 0x209   : > { %v4557_v12 = vmax.f32 %v4525_v48, 0.0  ;;  %v5981_v13 = vpop.f32.mrb[20].mxu0 }
 0x20a   : > { %v5793_v56 = vpop.f32.mrb[24].mxu1  ;;  %v5296_v55 = vpack.c.bf16 %v4559_v23, %v4558_v17  ;;  %v6027_v15 = vadd.f32 %v5981_v13, %v5789_v28  ;;  %v4355_v33 = vpop.f32.mrb[21].mxu0 }
 0x20b   : > { %v2770_v58 = vpop.f32.mrb[25].mxu1  ;;  %v5291_v11 = vpack.c.bf16 %v4557_v12, %v4556_v8  ;;  %v6028_v51 = vadd.f32 %v4355_v33, %v2754_v18  ;;  %v5982_v52 = vpop.f32.mrb[22].mxu0 }
 0x20c   : > { %v5794_v39 = vpop.f32.mrb[26].mxu1  ;;  %5336 = vst [vmem:[%s7234_s21 + $0x48] sm:$0xff] %v5296_v55   ;;  %v4530_v26 = vadd.f32 %v6027_v15, %v7224_v25  ;;  %v6029_v46 = vadd.f32 %v5982_v52, %v5790_v20  ;;  %v4358_v34 = vpop.f32.mrb[23].mxu0 }
 0x20d   : > { %v2773_v7 = vpop.f32.mrb[27].mxu1  ;;  %5335 = vst [vmem:[%s7234_s21 + $0x40] sm:$0xff] %v5291_v11   ;;  %v4528_v38 = vadd.f32 %v6028_v51, %v7224_v25  ;;  %v6030_v60 = vadd.f32 %v4358_v34, %v2757_v59 }
 0x20e   : > { %v4531_v43 = vadd.f32 %v6029_v46, %v7224_v25  ;;  %v4562_v62 = vmax.f32 %v4530_v26, 0.0 }
 0x20f   : > { %v4529_v24 = vadd.f32 %v6030_v60, %v7224_v25  ;;  %v4560_v14 = vmax.f32 %v4528_v38, 0.0 }
 0x210   : > { %v4563_v36 = vmax.f32 %v4531_v43, 0.0 }
 0x211   : > { %v4561_v0 = vmax.f32 %v4529_v24, 0.0  ;;  %v5985_v45 = vpop.f32.mrb[24].mxu0 }
 0x212   : > { %v5797_v5 = vpop.f32.mrb[28].mxu1  ;;  %v5306_v19 = vpack.c.bf16 %v4563_v36, %v4562_v62  ;;  %v6031_v54 = vadd.f32 %v5985_v45, %v5793_v56  ;;  %v4371_v21 = vpop.f32.mrb[25].mxu0 }
 0x213   : > { %v2786_v31 = vpop.f32.mrb[29].mxu1  ;;  %v5301_v29 = vpack.c.bf16 %v4561_v0, %v4560_v14  ;;  %v6032_v37 = vadd.f32 %v4371_v21, %v2770_v58  ;;  %v5986_v10 = vpop.f32.mrb[26].mxu0 }
 0x214   : > { %v5798_v3 = vpop.f32.mrb[30].mxu1  ;;  %5338 = vst [vmem:[%s7234_s21 + $0x58] sm:$0xff] %v5306_v19   ;;  %v4534_v42 = vadd.f32 %v6031_v54, %v7224_v25  ;;  %v6033_v61 = vadd.f32 %v5986_v10, %v5794_v39  ;;  %v4374_v47 = vpop.f32.mrb[27].mxu0 }
 0x215   : > { %v2789_v32 = vpop.f32.mrb[31].mxu1  ;;  %5337 = vst [vmem:[%s7234_s21 + $0x50] sm:$0xff] %v5301_v29   ;;  %v4532_v16 = vadd.f32 %v6032_v37, %v7224_v25  ;;  %v6034_v28 = vadd.f32 %v4374_v47, %v2773_v7 }
 0x216   : > { %v4535_v44 = vadd.f32 %v6033_v61, %v7224_v25  ;;  %v4566_v18 = vmax.f32 %v4534_v42, 0.0 }
 0x217   : > { %v4533_v40 = vadd.f32 %v6034_v28, %v7224_v25  ;;  %v4564_v35 = vmax.f32 %v4532_v16, 0.0 }
 0x218   : > { %v4567_v63 = vmax.f32 %v4535_v44, 0.0 }
 0x219   : > { %v4565_v6 = vmax.f32 %v4533_v40, 0.0  ;;  %v5989_v20 = vpop.f32.mrb[28].mxu0 }
 0x21a   : > { %v5316_v49 = vpack.c.bf16 %v4567_v63, %v4566_v18  ;;  %v6035_v41 = vadd.f32 %v5989_v20, %v5797_v5  ;;  %v4387_v53 = vpop.f32.mrb[29].mxu0 }
 0x21b   : > { %v5311_v59 = vpack.c.bf16 %v4565_v6, %v4564_v35  ;;  %v6036_v22 = vadd.f32 %v4387_v53, %v2786_v31  ;;  %v5990_v4 = vpop.f32.mrb[30].mxu0 }
 0x21c   : > { %5340 = vst [vmem:[%s7234_s21 + $0x68] sm:$0xff] %v5316_v49   ;;  %v4538_v9 = vadd.f32 %v6035_v41, %v7224_v25  ;;  %v6037_v30 = vadd.f32 %v5990_v4, %v5798_v3  ;;  %v4390_v57 = vpop.f32.mrb[31].mxu0 }
 0x21d   : > { %5339 = vst [vmem:[%s7234_s21 + $0x60] sm:$0xff] %v5311_v59   ;;  %v4536_v50 = vadd.f32 %v6036_v22, %v7224_v25  ;;  %v6038_v1 = vadd.f32 %v4390_v57, %v2789_v32 }
 0x21e   : > { %v4539_v27 = vadd.f32 %v6037_v30, %v7224_v25  ;;  %v4570_v48 = vmax.f32 %v4538_v9, 0.0 }
 0x21f   : > { %v4537_v2 = vadd.f32 %v6038_v1, %v7224_v25  ;;  %v4568_v17 = vmax.f32 %v4536_v50, 0.0 }
 0x220   : > { %v4571_v56 = vmax.f32 %v4539_v27, 0.0 }
 0x221   : > { %v4569_v23 = vmax.f32 %v4537_v2, 0.0 }
 0x222   : > { %v5326_v58 = vpack.c.bf16 %v4571_v56, %v4570_v48 }
 0x223   : > { %v5321_v8 = vpack.c.bf16 %v4569_v23, %v4568_v17 }
 0x224   : > { %5342 = vst [vmem:[%s7234_s21 + $0x78] sm:$0xff] %v5326_v58  }
 0x225   : > { %5341 = vst [vmem:[%s7234_s21 + $0x70] sm:$0xff] %v5321_v8  }
 0x226 PF: > { %s14_s17 = sadd.s32 1, %s6424_s17   ;;  %s7302_s15 = smov %s6420_s16 }
 0x227   : > { %p11_p5 = scmp.ge.s32.totalorder %s14_s17, 4   ;;  %s7303_s16 = smov %s7305_s18 }
 0x229   :  { %13 = sbr.rel (!%p11_p5) target bundleno = 2 (0x2), region = 92 }

</bundles_post_ra>
